<compile_context>
chip_gen: v6e
topology: v6e:2x2x1
jax: 0.10.0
libtpu: 0.0.40
codegen_flags: <defaults>
</compile_context>

<pallas_src>
import functools

import jax
import jax.numpy as jnp
from jax import lax
from jax.experimental import pallas as pl
from jax.experimental.pallas import tpu as pltpu

BN_EPS = 1e-5
LANE = 128
VMEM_LIMIT = 48 * 1024 * 1024


def _round_up(x, m):
    return (x + m - 1) // m * m


# ---------------------------------------------------------------------------
# Kernel A: 3x3 conv (stride s) from phase-packed padded input
#           + per-image partial BN stats (sum, sum of squares).
# ---------------------------------------------------------------------------
def _conv3x3_stats_kernel(x_ref, w_ref, y_ref, st_ref, acc_ref, *,
                          ho, wo, hp, stride):
    acc_ref[...] = jnp.zeros_like(acc_ref)
    for ky in range(3):
        for kx in range(3):
            # tap (ky, kx) is a *contiguous* window of phase (ky%stride, kx%stride)
            ph = (ky % stride) * stride + (kx % stride)
            r0 = ph * hp + ky // stride
            c0 = kx // stride
            win = x_ref[0, r0:r0 + ho, c0:c0 + wo, :]          # (ho, wo, cin_p) bf16
            win = win.reshape(ho * wo, win.shape[-1])
            acc_ref[...] += jnp.dot(win, w_ref[ky * 3 + kx],
                                    preferred_element_type=jnp.float32)
    y = acc_ref[...]
    y_ref[0] = y
    st_ref[0] = jnp.concatenate(
        [jnp.sum(y, axis=0, keepdims=True),
         jnp.sum(y * y, axis=0, keepdims=True)], axis=0)


# ---------------------------------------------------------------------------
# Kernel B: fused BN1-affine + ReLU + in-VMEM zero pad + 3x3 conv (stride 1)
#           + per-image partial BN2 stats.
# ---------------------------------------------------------------------------
def _bn_relu_conv3x3_stats_kernel(y1_ref, w_ref, sc_ref, sh_ref,
                                  y2_ref, st_ref, pad_ref, acc_ref, *,
                                  ho, wo, cp):
    a1 = jnp.maximum(y1_ref[0] * sc_ref[...] + sh_ref[...], 0.0)   # (ho*wo, cp) f32
    pad_ref[...] = jnp.zeros_like(pad_ref)
    pad_ref[1:ho + 1, 1:wo + 1, :] = a1.reshape(ho, wo, cp)
    acc_ref[...] = jnp.zeros_like(acc_ref)
    for ky in range(3):
        for kx in range(3):
            win = pad_ref[ky:ky + ho, kx:kx + wo, :]
            win = win.reshape(ho * wo, cp).astype(jnp.bfloat16)
            acc_ref[...] += jnp.dot(win, w_ref[ky * 3 + kx],
                                    preferred_element_type=jnp.float32)
    y2 = acc_ref[...]
    y2_ref[0] = y2
    st_ref[0] = jnp.concatenate(
        [jnp.sum(y2, axis=0, keepdims=True),
         jnp.sum(y2 * y2, axis=0, keepdims=True)], axis=0)


# ---------------------------------------------------------------------------
# Kernel C: BN2-affine + 1x1 shortcut conv (or identity via eye) + add + ReLU.
# ---------------------------------------------------------------------------
def _bn_shortcut_relu_kernel(y2_ref, xs_ref, wsc_ref, sc_ref, sh_ref, o_ref):
    res = jnp.dot(xs_ref[0], wsc_ref[...], preferred_element_type=jnp.float32)
    o_ref[0] = jnp.maximum(y2_ref[0] * sc_ref[...] + sh_ref[...] + res, 0.0)


# ---------------------------------------------------------------------------
# Host-side glue (cheap, ~1x input bytes — no im2col amplification)
# ---------------------------------------------------------------------------
def _phase_pack(xp, stride, hp, wp):
    """xp: (N, H+2, W+2, C) spatially padded.  Returns (N, stride*stride*hp, wp, C)
    where phase (a, b) = xp[:, a::stride, b::stride, :] occupies rows
    [(a*stride+b)*hp, (a*stride+b+1)*hp).  Makes every strided conv tap a
    contiguous slice inside the kernel."""
    if stride == 1:
        return xp
    blocks = []
    for a in range(stride):
        for b in range(stride):
            blk = xp[:, a::stride, b::stride, :]
            blk = blk[:, :hp, :wp, :]
            ph, pw = blk.shape[1], blk.shape[2]
            blk = jnp.pad(blk, ((0, 0), (0, hp - ph), (0, wp - pw), (0, 0)))
            blocks.append(blk)
    return jnp.concatenate(blocks, axis=1)


def _bn_scale_shift(stats, count, gamma, beta):
    """Reduce per-image (sum, sumsq) partials to per-channel scale/shift."""
    s1 = jnp.sum(stats[:, 0, :], axis=0)
    s2 = jnp.sum(stats[:, 1, :], axis=0)
    mean = s1 / count
    var = jnp.maximum(s2 / count - mean * mean, 0.0)
    scale = gamma * lax.rsqrt(var + BN_EPS)
    shift = beta - mean * scale
    return scale.reshape(1, -1), shift.reshape(1, -1)


# ---------------------------------------------------------------------------
# Forward pass of the ResidualBlock
# ---------------------------------------------------------------------------
@functools.partial(jax.jit, static_argnames=("stride",))
def residual_block_forward(x_nchw, w1, g1, b1, w2, g2, b2, w_sc, stride):
    """x_nchw: (N, Cin, H, W) f32.  w1/w2 in HWIO, w_sc (Cin, Cout)."""
    n, cin, h, w = x_nchw.shape
    cout = w1.shape[-1]
    cin_p = _round_up(cin, LANE)
    cout_p = _round_up(cout, LANE)
    s = stride
    ho = (h - 1) // s + 1
    wo = (w - 1) // s + 1
    hp = ho + 2 // s
    wp = wo + 2 // s
    m = ho * wo

    x = jnp.transpose(x_nchw, (0, 2, 3, 1))                       # NHWC f32

    # ---- data prep ---------------------------------------------------
    xp = jnp.pad(x, ((0, 0), (1, 1), (1, 1), (0, cin_p - cin)))
    xph = _phase_pack(xp, s, hp, wp).astype(jnp.bfloat16)          # (N, s*s*hp, wp, cin_p)

    w1_p = jnp.zeros((3, 3, cin_p, cout_p), jnp.float32).at[:, :, :cin, :cout].set(w1)
    w1_t = w1_p.reshape(9, cin_p, cout_p).astype(jnp.bfloat16)
    w2_p = jnp.zeros((3, 3, cout_p, cout_p), jnp.float32).at[:, :, :cout, :cout].set(w2)
    w2_t = w2_p.reshape(9, cout_p, cout_p).astype(jnp.bfloat16)
    wsc_p = jnp.zeros((cin_p, cout_p), jnp.float32).at[:cin, :cout].set(w_sc)
    wsc_p = wsc_p.astype(jnp.bfloat16)

    g1_p = jnp.zeros((cout_p,), jnp.float32).at[:cout].set(g1)
    b1_p = jnp.zeros((cout_p,), jnp.float32).at[:cout].set(b1)
    g2_p = jnp.zeros((cout_p,), jnp.float32).at[:cout].set(g2)
    b2_p = jnp.zeros((cout_p,), jnp.float32).at[:cout].set(b2)

    xs = x[:, ::s, ::s, :]                                         # shortcut input
    xs = jnp.pad(xs, ((0, 0), (0, 0), (0, 0), (0, cin_p - cin)))
    xs = xs.reshape(n, m, cin_p).astype(jnp.bfloat16)

    cparams = pltpu.CompilerParams(dimension_semantics=("parallel",),
                                   vmem_limit_bytes=VMEM_LIMIT)

    # ---- pass 1: conv1 + partial BN1 stats ----------------------------
    y1, st1 = pl.pallas_call(
        functools.partial(_conv3x3_stats_kernel, ho=ho, wo=wo, hp=hp, stride=s),
        grid=(n,),
        in_specs=[
            pl.BlockSpec((1, s * s * hp, wp, cin_p), lambda i: (i, 0, 0, 0)),
            pl.BlockSpec((9, cin_p, cout_p), lambda i: (0, 0, 0)),   # weight-stationary
        ],
        out_specs=(
            pl.BlockSpec((1, m, cout_p), lambda i: (i, 0, 0)),
            pl.BlockSpec((1, 2, cout_p), lambda i: (i, 0, 0)),
        ),
        out_shape=(
            jax.ShapeDtypeStruct((n, m, cout_p), jnp.float32),
            jax.ShapeDtypeStruct((n, 2, cout_p), jnp.float32),
        ),
        scratch_shapes=[pltpu.VMEM((m, cout_p), jnp.float32)],
        compiler_params=cparams,
    )(xph, w1_t)

    sc1, sh1 = _bn_scale_shift(st1, float(n * m), g1_p, b1_p)

    # ---- pass 2: fused BN1-affine + ReLU + conv2 + partial BN2 stats ---
    y2, st2 = pl.pallas_call(
        functools.partial(_bn_relu_conv3x3_stats_kernel, ho=ho, wo=wo, cp=cout_p),
        grid=(n,),
        in_specs=[
            pl.BlockSpec((1, m, cout_p), lambda i: (i, 0, 0)),
            pl.BlockSpec((9, cout_p, cout_p), lambda i: (0, 0, 0)),  # weight-stationary
            pl.BlockSpec((1, cout_p), lambda i: (0, 0)),
            pl.BlockSpec((1, cout_p), lambda i: (0, 0)),
        ],
        out_specs=(
            pl.BlockSpec((1, m, cout_p), lambda i: (i, 0, 0)),
            pl.BlockSpec((1, 2, cout_p), lambda i: (i, 0, 0)),
        ),
        out_shape=(
            jax.ShapeDtypeStruct((n, m, cout_p), jnp.float32),
            jax.ShapeDtypeStruct((n, 2, cout_p), jnp.float32),
        ),
        scratch_shapes=[
            pltpu.VMEM((ho + 2, wo + 2, cout_p), jnp.float32),   # padded activation
            pltpu.VMEM((m, cout_p), jnp.float32),                # f32 accumulator
        ],
        compiler_params=cparams,
    )(y1, w2_t, sc1, sh1)

    sc2, sh2 = _bn_scale_shift(st2, float(n * m), g2_p, b2_p)

    # ---- pass 3: BN2-affine + shortcut + add + ReLU --------------------
    out = pl.pallas_call(
        _bn_shortcut_relu_kernel,
        grid=(n,),
        in_specs=[
            pl.BlockSpec((1, m, cout_p), lambda i: (i, 0, 0)),
            pl.BlockSpec((1, m, cin_p), lambda i: (i, 0, 0)),
            pl.BlockSpec((cin_p, cout_p), lambda i: (0, 0)),     # weight-stationary
            pl.BlockSpec((1, cout_p), lambda i: (0, 0)),
            pl.BlockSpec((1, cout_p), lambda i: (0, 0)),
        ],
        out_specs=pl.BlockSpec((1, m, cout_p), lambda i: (i, 0, 0)),
        out_shape=jax.ShapeDtypeStruct((n, m, cout_p), jnp.float32),
        compiler_params=cparams,
    )(y2, xs, wsc_p, sc2, sh2)

    out = out.reshape(n, ho, wo, cout_p)[:, :, :, :cout]
    return jnp.transpose(out, (0, 3, 1, 2))                       # NHWC -> NCHW


# ---------------------------------------------------------------------------
# Pure-JAX f32 reference (for the correctness check)
# ---------------------------------------------------------------------------
def _reference_forward(x_nchw, w1, g1, b1, w2, g2, b2, w_sc, stride):
    x = jnp.transpose(x_nchw, (0, 2, 3, 1))
    dn = ("NHWC", "HWIO", "NHWC")

    def bn(y, g, b):
        mean = jnp.mean(y, axis=(0, 1, 2), keepdims=True)
        var = jnp.mean((y - mean) ** 2, axis=(0, 1, 2), keepdims=True)
        return (y - mean) * lax.rsqrt(var + BN_EPS) * g + b

    y1 = lax.conv_general_dilated(x, w1, (stride, stride), ((1, 1), (1, 1)),
                                  dimension_numbers=dn)
    y1 = jnp.maximum(bn(y1, g1, b1), 0.0)
    y2 = lax.conv_general_dilated(y1, w2, (1, 1), ((1, 1), (1, 1)),
                                  dimension_numbers=dn)
    y2 = bn(y2, g2, b2)
    res = lax.conv_general_dilated(x, w_sc[None, None], (stride, stride),
                                   ((0, 0), (0, 0)), dimension_numbers=dn)
    out = jnp.maximum(y2 + res, 0.0)
    return jnp.transpose(out, (0, 3, 1, 2))


# ---------------------------------------------------------------------------
if __name__ == "__main__":
    def run_case(case_id, n, cin, cout, h, w, stride):
        key = jax.random.fold_in(jax.random.PRNGKey(0), case_id)
        kx_, k1, k2, k3 = jax.random.split(key, 4)
        x = jax.random.normal(kx_, (n, cin, h, w), jnp.float32)
        w1 = jax.random.normal(k1, (3, 3, cin, cout), jnp.float32) * 0.1
        w2 = jax.random.normal(k2, (3, 3, cout, cout), jnp.float32) * 0.1
        g1 = jnp.ones((cout,), jnp.float32); b1 = jnp.zeros((cout,), jnp.float32)
        g2 = jnp.ones((cout,), jnp.float32); b2 = jnp.zeros((cout,), jnp.float32)
        if stride != 1 or cin != cout:
            w_sc = jax.random.normal(k3, (cin, cout), jnp.float32) * 0.1
        else:
            w_sc = jnp.eye(cin, dtype=jnp.float32)          # identity shortcut

        out = residual_block_forward(x, w1, g1, b1, w2, g2, b2, w_sc, stride)
        out = jax.block_until_ready(out)
        ref = _reference_forward(x, w1, g1, b1, w2, g2, b2, w_sc, stride)

        ho = (h - 1) // stride + 1
        wo = (w - 1) // stride + 1
        assert out.shape == (n, cout, ho, wo), out.shape
        max_err = float(jnp.max(jnp.abs(out - ref)))
        mean_err = float(jnp.mean(jnp.abs(out - ref)))
        # bf16 MXU inputs vs. pure-f32 reference -> loosened tolerance
        assert max_err < 1e-1 and mean_err < 1e-2, (max_err, mean_err)

    run_case(0, 2, 4, 8, 16, 16, 2)   # projection shortcut (stride 2, cin != cout)
    run_case(1, 2, 4, 4, 16, 16, 1)   # identity shortcut   (stride 1, cin == cout)
    print("KERNEL_OK")
</pallas_src>

<mosaic_0001>
module attributes {stable_mosaic.version = 11 : i64} {
  func.func @_conv3x3_stats_kernel(%arg0: i32, %arg1: memref<1x36x9x128xbf16, #tpu.memory_space<vmem>>, %arg2: memref<9x128x128xbf16, #tpu.memory_space<vmem>>, %arg3: memref<1x64x128xf32, #tpu.memory_space<vmem>>, %arg4: memref<1x2x128xf32, #tpu.memory_space<vmem>>, %arg5: memref<64x128xf32, #tpu.memory_space<vmem>>) attributes {dimension_semantics = [#tpu.dimension_semantics<parallel>], iteration_bounds = array<i64: 2>, scalar_prefetch = 0 : i64, scratch_operands = 1 : i64, tpu.core_type = #tpu.core_type<tc>, window_params = [{transform_indices = @transform_0, window_bounds = array<i64: 1, 36, 9, 128>}, {pipeline_mode = #tpu.pipeline_mode<synchronous>, transform_indices = @transform_1, window_bounds = array<i64: 9, 128, 128>}, {transform_indices = @transform_2, window_bounds = array<i64: 1, 64, 128>}, {transform_indices = @transform_3, window_bounds = array<i64: 1, 2, 128>}]} {
    %cst = arith.constant 0.000000e+00 : f32
    %0 = vector.broadcast %cst : f32 to vector<64x128xf32>
    %c0 = arith.constant 0 : index
    %c0_0 = arith.constant 0 : index
    %1 = vector.load %arg5[%c0, %c0_0] : memref<64x128xf32, #tpu.memory_space<vmem>>, vector<64x128xf32>
    tpu.vector_store %arg5[%c0, %c0_0], %0 {strides = array<i32>} : memref<64x128xf32, #tpu.memory_space<vmem>>, vector<64x128xf32>,
    %c0_1 = arith.constant 0 : index
    %c0_2 = arith.constant 0 : index
    %c0_3 = arith.constant 0 : index
    %c0_4 = arith.constant 0 : index
    %2 = vector.load %arg1[%c0_1, %c0_2, %c0_3, %c0_4] : memref<1x36x9x128xbf16, #tpu.memory_space<vmem>>, vector<1x8x8x128xbf16>
    %3 = vector.shape_cast %2 : vector<1x8x8x128xbf16> to vector<8x8x128xbf16>
    %4 = vector.shape_cast %3 : vector<8x8x128xbf16> to vector<64x128xbf16>
    %c0_5 = arith.constant 0 : index
    %c0_6 = arith.constant 0 : index
    %5 = vector.load %arg5[%c0_5, %c0_6] : memref<64x128xf32, #tpu.memory_space<vmem>>, vector<64x128xf32>
    %c0_7 = arith.constant 0 : index
    %c0_8 = arith.constant 0 : index
    %c0_9 = arith.constant 0 : index
    %6 = vector.load %arg2[%c0_7, %c0_8, %c0_9] : memref<9x128x128xbf16, #tpu.memory_space<vmem>>, vector<1x128x128xbf16>
    %7 = vector.shape_cast %6 : vector<1x128x128xbf16> to vector<128x128xbf16>
    %cst_10 = arith.constant dense<0.000000e+00> : vector<64x128xf32>
    %8 = tpu.matmul %4, %7, %cst_10 {dimension_numbers = #tpu.dot_dimension_numbers<[1], [0], [0], [1], [0, 0, 1, 1], [], []>} : vector<64x128xbf16>, vector<128x128xbf16>, vector<64x128xf32> -> vector<64x128xf32>
    %9 = arith.addf %5, %8 : vector<64x128xf32>
    %c0_11 = arith.constant 0 : index
    %c0_12 = arith.constant 0 : index
    %10 = vector.load %arg5[%c0_11, %c0_12] : memref<64x128xf32, #tpu.memory_space<vmem>>, vector<64x128xf32>
    tpu.vector_store %arg5[%c0_11, %c0_12], %9 {strides = array<i32>} : memref<64x128xf32, #tpu.memory_space<vmem>>, vector<64x128xf32>,
    %c0_13 = arith.constant 0 : index
    %c9 = arith.constant 9 : index
    %c0_14 = arith.constant 0 : index
    %c0_15 = arith.constant 0 : index
    %11 = vector.load %arg1[%c0_13, %c9, %c0_14, %c0_15] : memref<1x36x9x128xbf16, #tpu.memory_space<vmem>>, vector<1x8x8x128xbf16>
    %12 = vector.shape_cast %11 : vector<1x8x8x128xbf16> to vector<8x8x128xbf16>
    %13 = vector.shape_cast %12 : vector<8x8x128xbf16> to vector<64x128xbf16>
    %c0_16 = arith.constant 0 : index
    %c0_17 = arith.constant 0 : index
    %14 = vector.load %arg5[%c0_16, %c0_17] : memref<64x128xf32, #tpu.memory_space<vmem>>, vector<64x128xf32>
    %c1 = arith.constant 1 : index
    %c0_18 = arith.constant 0 : index
    %c0_19 = arith.constant 0 : index
    %15 = vector.load %arg2[%c1, %c0_18, %c0_19] : memref<9x128x128xbf16, #tpu.memory_space<vmem>>, vector<1x128x128xbf16>
    %16 = vector.shape_cast %15 : vector<1x128x128xbf16> to vector<128x128xbf16>
    %cst_20 = arith.constant dense<0.000000e+00> : vector<64x128xf32>
    %17 = tpu.matmul %13, %16, %cst_20 {dimension_numbers = #tpu.dot_dimension_numbers<[1], [0], [0], [1], [0, 0, 1, 1], [], []>} : vector<64x128xbf16>, vector<128x128xbf16>, vector<64x128xf32> -> vector<64x128xf32>
    %18 = arith.addf %14, %17 : vector<64x128xf32>
    %c0_21 = arith.constant 0 : index
    %c0_22 = arith.constant 0 : index
    %19 = vector.load %arg5[%c0_21, %c0_22] : memref<64x128xf32, #tpu.memory_space<vmem>>, vector<64x128xf32>
    tpu.vector_store %arg5[%c0_21, %c0_22], %18 {strides = array<i32>} : memref<64x128xf32, #tpu.memory_space<vmem>>, vector<64x128xf32>,
    %c0_23 = arith.constant 0 : index
    %c0_24 = arith.constant 0 : index
    %c1_25 = arith.constant 1 : index
    %c0_26 = arith.constant 0 : index
    %20 = vector.load %arg1[%c0_23, %c0_24, %c1_25, %c0_26] : memref<1x36x9x128xbf16, #tpu.memory_space<vmem>>, vector<1x8x8x128xbf16>
    %21 = vector.shape_cast %20 : vector<1x8x8x128xbf16> to vector<8x8x128xbf16>
    %22 = vector.shape_cast %21 : vector<8x8x128xbf16> to vector<64x128xbf16>
    %c0_27 = arith.constant 0 : index
    %c0_28 = arith.constant 0 : index
    %23 = vector.load %arg5[%c0_27, %c0_28] : memref<64x128xf32, #tpu.memory_space<vmem>>, vector<64x128xf32>
    %c2 = arith.constant 2 : index
    %c0_29 = arith.constant 0 : index
    %c0_30 = arith.constant 0 : index
    %24 = vector.load %arg2[%c2, %c0_29, %c0_30] : memref<9x128x128xbf16, #tpu.memory_space<vmem>>, vector<1x128x128xbf16>
    %25 = vector.shape_cast %24 : vector<1x128x128xbf16> to vector<128x128xbf16>
    %cst_31 = arith.constant dense<0.000000e+00> : vector<64x128xf32>
    %26 = tpu.matmul %22, %25, %cst_31 {dimension_numbers = #tpu.dot_dimension_numbers<[1], [0], [0], [1], [0, 0, 1, 1], [], []>} : vector<64x128xbf16>, vector<128x128xbf16>, vector<64x128xf32> -> vector<64x128xf32>
    %27 = arith.addf %23, %26 : vector<64x128xf32>
    %c0_32 = arith.constant 0 : index
    %c0_33 = arith.constant 0 : index
    %28 = vector.load %arg5[%c0_32, %c0_33] : memref<64x128xf32, #tpu.memory_space<vmem>>, vector<64x128xf32>
    tpu.vector_store %arg5[%c0_32, %c0_33], %27 {strides = array<i32>} : memref<64x128xf32, #tpu.memory_space<vmem>>, vector<64x128xf32>,
    %c0_34 = arith.constant 0 : index
    %c18 = arith.constant 18 : index
    %c0_35 = arith.constant 0 : index
    %c0_36 = arith.constant 0 : index
    %29 = vector.load %arg1[%c0_34, %c18, %c0_35, %c0_36] : memref<1x36x9x128xbf16, #tpu.memory_space<vmem>>, vector<1x8x8x128xbf16>
    %30 = vector.shape_cast %29 : vector<1x8x8x128xbf16> to vector<8x8x128xbf16>
    %31 = vector.shape_cast %30 : vector<8x8x128xbf16> to vector<64x128xbf16>
    %c0_37 = arith.constant 0 : index
    %c0_38 = arith.constant 0 : index
    %32 = vector.load %arg5[%c0_37, %c0_38] : memref<64x128xf32, #tpu.memory_space<vmem>>, vector<64x128xf32>
    %c3 = arith.constant 3 : index
    %c0_39 = arith.constant 0 : index
    %c0_40 = arith.constant 0 : index
    %33 = vector.load %arg2[%c3, %c0_39, %c0_40] : memref<9x128x128xbf16, #tpu.memory_space<vmem>>, vector<1x128x128xbf16>
    %34 = vector.shape_cast %33 : vector<1x128x128xbf16> to vector<128x128xbf16>
    %cst_41 = arith.constant dense<0.000000e+00> : vector<64x128xf32>
    %35 = tpu.matmul %31, %34, %cst_41 {dimension_numbers = #tpu.dot_dimension_numbers<[1], [0], [0], [1], [0, 0, 1, 1], [], []>} : vector<64x128xbf16>, vector<128x128xbf16>, vector<64x128xf32> -> vector<64x128xf32>
    %36 = arith.addf %32, %35 : vector<64x128xf32>
    %c0_42 = arith.constant 0 : index
    %c0_43 = arith.constant 0 : index
    %37 = vector.load %arg5[%c0_42, %c0_43] : memref<64x128xf32, #tpu.memory_space<vmem>>, vector<64x128xf32>
    tpu.vector_store %arg5[%c0_42, %c0_43], %36 {strides = array<i32>} : memref<64x128xf32, #tpu.memory_space<vmem>>, vector<64x128xf32>,
    %c0_44 = arith.constant 0 : index
    %c27 = arith.constant 27 : index
    %c0_45 = arith.constant 0 : index
    %c0_46 = arith.constant 0 : index
    %38 = vector.load %arg1[%c0_44, %c27, %c0_45, %c0_46] : memref<1x36x9x128xbf16, #tpu.memory_space<vmem>>, vector<1x8x8x128xbf16>
    %39 = vector.shape_cast %38 : vector<1x8x8x128xbf16> to vector<8x8x128xbf16>
    %40 = vector.shape_cast %39 : vector<8x8x128xbf16> to vector<64x128xbf16>
    %c0_47 = arith.constant 0 : index
    %c0_48 = arith.constant 0 : index
    %41 = vector.load %arg5[%c0_47, %c0_48] : memref<64x128xf32, #tpu.memory_space<vmem>>, vector<64x128xf32>
    %c4 = arith.constant 4 : index
    %c0_49 = arith.constant 0 : index
    %c0_50 = arith.constant 0 : index
    %42 = vector.load %arg2[%c4, %c0_49, %c0_50] : memref<9x128x128xbf16, #tpu.memory_space<vmem>>, vector<1x128x128xbf16>
    %43 = vector.shape_cast %42 : vector<1x128x128xbf16> to vector<128x128xbf16>
    %cst_51 = arith.constant dense<0.000000e+00> : vector<64x128xf32>
    %44 = tpu.matmul %40, %43, %cst_51 {dimension_numbers = #tpu.dot_dimension_numbers<[1], [0], [0], [1], [0, 0, 1, 1], [], []>} : vector<64x128xbf16>, vector<128x128xbf16>, vector<64x128xf32> -> vector<64x128xf32>
    %45 = arith.addf %41, %44 : vector<64x128xf32>
    %c0_52 = arith.constant 0 : index
    %c0_53 = arith.constant 0 : index
    %46 = vector.load %arg5[%c0_52, %c0_53] : memref<64x128xf32, #tpu.memory_space<vmem>>, vector<64x128xf32>
    tpu.vector_store %arg5[%c0_52, %c0_53], %45 {strides = array<i32>} : memref<64x128xf32, #tpu.memory_space<vmem>>, vector<64x128xf32>,
    %c0_54 = arith.constant 0 : index
    %c18_55 = arith.constant 18 : index
    %c1_56 = arith.constant 1 : index
    %c0_57 = arith.constant 0 : index
    %47 = vector.load %arg1[%c0_54, %c18_55, %c1_56, %c0_57] : memref<1x36x9x128xbf16, #tpu.memory_space<vmem>>, vector<1x8x8x128xbf16>
    %48 = vector.shape_cast %47 : vector<1x8x8x128xbf16> to vector<8x8x128xbf16>
    %49 = vector.shape_cast %48 : vector<8x8x128xbf16> to vector<64x128xbf16>
    %c0_58 = arith.constant 0 : index
    %c0_59 = arith.constant 0 : index
    %50 = vector.load %arg5[%c0_58, %c0_59] : memref<64x128xf32, #tpu.memory_space<vmem>>, vector<64x128xf32>
    %c5 = arith.constant 5 : index
    %c0_60 = arith.constant 0 : index
    %c0_61 = arith.constant 0 : index
    %51 = vector.load %arg2[%c5, %c0_60, %c0_61] : memref<9x128x128xbf16, #tpu.memory_space<vmem>>, vector<1x128x128xbf16>
    %52 = vector.shape_cast %51 : vector<1x128x128xbf16> to vector<128x128xbf16>
    %cst_62 = arith.constant dense<0.000000e+00> : vector<64x128xf32>
    %53 = tpu.matmul %49, %52, %cst_62 {dimension_numbers = #tpu.dot_dimension_numbers<[1], [0], [0], [1], [0, 0, 1, 1], [], []>} : vector<64x128xbf16>, vector<128x128xbf16>, vector<64x128xf32> -> vector<64x128xf32>
    %54 = arith.addf %50, %53 : vector<64x128xf32>
    %c0_63 = arith.constant 0 : index
    %c0_64 = arith.constant 0 : index
    %55 = vector.load %arg5[%c0_63, %c0_64] : memref<64x128xf32, #tpu.memory_space<vmem>>, vector<64x128xf32>
    tpu.vector_store %arg5[%c0_63, %c0_64], %54 {strides = array<i32>} : memref<64x128xf32, #tpu.memory_space<vmem>>, vector<64x128xf32>,
    %c0_65 = arith.constant 0 : index
    %c1_66 = arith.constant 1 : index
    %c0_67 = arith.constant 0 : index
    %c0_68 = arith.constant 0 : index
    %56 = vector.load %arg1[%c0_65, %c1_66, %c0_67, %c0_68] : memref<1x36x9x128xbf16, #tpu.memory_space<vmem>>, vector<1x8x8x128xbf16>
    %57 = vector.shape_cast %56 : vector<1x8x8x128xbf16> to vector<8x8x128xbf16>
    %58 = vector.shape_cast %57 : vector<8x8x128xbf16> to vector<64x128xbf16>
    %c0_69 = arith.constant 0 : index
    %c0_70 = arith.constant 0 : index
    %59 = vector.load %arg5[%c0_69, %c0_70] : memref<64x128xf32, #tpu.memory_space<vmem>>, vector<64x128xf32>
    %c6 = arith.constant 6 : index
    %c0_71 = arith.constant 0 : index
    %c0_72 = arith.constant 0 : index
    %60 = vector.load %arg2[%c6, %c0_71, %c0_72] : memref<9x128x128xbf16, #tpu.memory_space<vmem>>, vector<1x128x128xbf16>
    %61 = vector.shape_cast %60 : vector<1x128x128xbf16> to vector<128x128xbf16>
    %cst_73 = arith.constant dense<0.000000e+00> : vector<64x128xf32>
    %62 = tpu.matmul %58, %61, %cst_73 {dimension_numbers = #tpu.dot_dimension_numbers<[1], [0], [0], [1], [0, 0, 1, 1], [], []>} : vector<64x128xbf16>, vector<128x128xbf16>, vector<64x128xf32> -> vector<64x128xf32>
    %63 = arith.addf %59, %62 : vector<64x128xf32>
    %c0_74 = arith.constant 0 : index
    %c0_75 = arith.constant 0 : index
    %64 = vector.load %arg5[%c0_74, %c0_75] : memref<64x128xf32, #tpu.memory_space<vmem>>, vector<64x128xf32>
    tpu.vector_store %arg5[%c0_74, %c0_75], %63 {strides = array<i32>} : memref<64x128xf32, #tpu.memory_space<vmem>>, vector<64x128xf32>,
    %c0_76 = arith.constant 0 : index
    %c10 = arith.constant 10 : index
    %c0_77 = arith.constant 0 : index
    %c0_78 = arith.constant 0 : index
    %65 = vector.load %arg1[%c0_76, %c10, %c0_77, %c0_78] : memref<1x36x9x128xbf16, #tpu.memory_space<vmem>>, vector<1x8x8x128xbf16>
    %66 = vector.shape_cast %65 : vector<1x8x8x128xbf16> to vector<8x8x128xbf16>
    %67 = vector.shape_cast %66 : vector<8x8x128xbf16> to vector<64x128xbf16>
    %c0_79 = arith.constant 0 : index
    %c0_80 = arith.constant 0 : index
    %68 = vector.load %arg5[%c0_79, %c0_80] : memref<64x128xf32, #tpu.memory_space<vmem>>, vector<64x128xf32>
    %c7 = arith.constant 7 : index
    %c0_81 = arith.constant 0 : index
    %c0_82 = arith.constant 0 : index
    %69 = vector.load %arg2[%c7, %c0_81, %c0_82] : memref<9x128x128xbf16, #tpu.memory_space<vmem>>, vector<1x128x128xbf16>
    %70 = vector.shape_cast %69 : vector<1x128x128xbf16> to vector<128x128xbf16>
    %cst_83 = arith.constant dense<0.000000e+00> : vector<64x128xf32>
    %71 = tpu.matmul %67, %70, %cst_83 {dimension_numbers = #tpu.dot_dimension_numbers<[1], [0], [0], [1], [0, 0, 1, 1], [], []>} : vector<64x128xbf16>, vector<128x128xbf16>, vector<64x128xf32> -> vector<64x128xf32>
    %72 = arith.addf %68, %71 : vector<64x128xf32>
    %c0_84 = arith.constant 0 : index
    %c0_85 = arith.constant 0 : index
    %73 = vector.load %arg5[%c0_84, %c0_85] : memref<64x128xf32, #tpu.memory_space<vmem>>, vector<64x128xf32>
    tpu.vector_store %arg5[%c0_84, %c0_85], %72 {strides = array<i32>} : memref<64x128xf32, #tpu.memory_space<vmem>>, vector<64x128xf32>,
    %c0_86 = arith.constant 0 : index
    %c1_87 = arith.constant 1 : index
    %c1_88 = arith.constant 1 : index
    %c0_89 = arith.constant 0 : index
    %74 = vector.load %arg1[%c0_86, %c1_87, %c1_88, %c0_89] : memref<1x36x9x128xbf16, #tpu.memory_space<vmem>>, vector<1x8x8x128xbf16>
    %75 = vector.shape_cast %74 : vector<1x8x8x128xbf16> to vector<8x8x128xbf16>
    %76 = vector.shape_cast %75 : vector<8x8x128xbf16> to vector<64x128xbf16>
    %c0_90 = arith.constant 0 : index
    %c0_91 = arith.constant 0 : index
    %77 = vector.load %arg5[%c0_90, %c0_91] : memref<64x128xf32, #tpu.memory_space<vmem>>, vector<64x128xf32>
    %c8 = arith.constant 8 : index
    %c0_92 = arith.constant 0 : index
    %c0_93 = arith.constant 0 : index
    %78 = vector.load %arg2[%c8, %c0_92, %c0_93] : memref<9x128x128xbf16, #tpu.memory_space<vmem>>, vector<1x128x128xbf16>
    %79 = vector.shape_cast %78 : vector<1x128x128xbf16> to vector<128x128xbf16>
    %cst_94 = arith.constant dense<0.000000e+00> : vector<64x128xf32>
    %80 = tpu.matmul %76, %79, %cst_94 {dimension_numbers = #tpu.dot_dimension_numbers<[1], [0], [0], [1], [0, 0, 1, 1], [], []>} : vector<64x128xbf16>, vector<128x128xbf16>, vector<64x128xf32> -> vector<64x128xf32>
    %81 = arith.addf %77, %80 : vector<64x128xf32>
    %c0_95 = arith.constant 0 : index
    %c0_96 = arith.constant 0 : index
    %82 = vector.load %arg5[%c0_95, %c0_96] : memref<64x128xf32, #tpu.memory_space<vmem>>, vector<64x128xf32>
    tpu.vector_store %arg5[%c0_95, %c0_96], %81 {strides = array<i32>} : memref<64x128xf32, #tpu.memory_space<vmem>>, vector<64x128xf32>,
    %c0_97 = arith.constant 0 : index
    %c0_98 = arith.constant 0 : index
    %83 = vector.load %arg5[%c0_97, %c0_98] : memref<64x128xf32, #tpu.memory_space<vmem>>, vector<64x128xf32>
    %c0_99 = arith.constant 0 : index
    %c0_100 = arith.constant 0 : index
    %c0_101 = arith.constant 0 : index
    %84 = vector.load %arg3[%c0_99, %c0_100, %c0_101] : memref<1x64x128xf32, #tpu.memory_space<vmem>>, vector<1x64x128xf32>
    %85 = vector.shape_cast %84 : vector<1x64x128xf32> to vector<64x128xf32>
    %86 = vector.shape_cast %83 : vector<64x128xf32> to vector<1x64x128xf32>
    tpu.vector_store %arg3[%c0_99, %c0_100, %c0_101], %86 {strides = array<i32>} : memref<1x64x128xf32, #tpu.memory_space<vmem>>, vector<1x64x128xf32>,
    %cst_102 = arith.constant dense<0.000000e+00> : vector<128xf32>
    %87 = vector.multi_reduction <add>, %83, %cst_102 [0] : vector<64x128xf32> to vector<128xf32>
    %88 = vector.shape_cast %87 : vector<128xf32> to vector<1x128xf32>
    %89 = arith.mulf %83, %83 : vector<64x128xf32>
    %cst_103 = arith.constant dense<0.000000e+00> : vector<128xf32>
    %90 = vector.multi_reduction <add>, %89, %cst_103 [0] : vector<64x128xf32> to vector<128xf32>
    %91 = vector.shape_cast %90 : vector<128xf32> to vector<1x128xf32>
    %92 = tpu.concatenate %88, %91 in 0 : vector<1x128xf32>, vector<1x128xf32> -> vector<2x128xf32>
    %c0_104 = arith.constant 0 : index
    %c0_105 = arith.constant 0 : index
    %c0_106 = arith.constant 0 : index
    %93 = vector.load %arg4[%c0_104, %c0_105, %c0_106] : memref<1x2x128xf32, #tpu.memory_space<vmem>>, vector<1x2x128xf32>
    %94 = vector.shape_cast %93 : vector<1x2x128xf32> to vector<2x128xf32>
    %95 = vector.shape_cast %92 : vector<2x128xf32> to vector<1x2x128xf32>
    tpu.vector_store %arg4[%c0_104, %c0_105, %c0_106], %95 {strides = array<i32>} : memref<1x2x128xf32, #tpu.memory_space<vmem>>, vector<1x2x128xf32>,
    return
  }
  func.func @transform_0(%arg0: i32) -> (i32, i32, i32, i32) {
    %c0_i32 = arith.constant 0 : i32
    %c0_i32_0 = arith.constant 0 : i32
    %c0_i32_1 = arith.constant 0 : i32
    %c0_i32_2 = arith.constant 0 : i32
    return %arg0, %c0_i32, %c0_i32_0, %c0_i32_1 : i32, i32, i32, i32
  }
  func.func @transform_1(%arg0: i32) -> (i32, i32, i32) {
    %c0_i32 = arith.constant 0 : i32
    %c0_i32_0 = arith.constant 0 : i32
    %c0_i32_1 = arith.constant 0 : i32
    %c0_i32_2 = arith.constant 0 : i32
    return %c0_i32, %c0_i32_0, %c0_i32_1 : i32, i32, i32
  }
  func.func @transform_2(%arg0: i32) -> (i32, i32, i32) {
    %c0_i32 = arith.constant 0 : i32
    %c0_i32_0 = arith.constant 0 : i32
    %c0_i32_1 = arith.constant 0 : i32
    return %arg0, %c0_i32, %c0_i32_0 : i32, i32, i32
  }
  func.func @transform_3(%arg0: i32) -> (i32, i32, i32) {
    %c0_i32 = arith.constant 0 : i32
    %c0_i32_0 = arith.constant 0 : i32
    %c0_i32_1 = arith.constant 0 : i32
    return %arg0, %c0_i32, %c0_i32_0 : i32, i32, i32
  }
}

module attributes {stable_mosaic.version = 11 : i64} {
  func.func @_bn_shortcut_relu_kernel(%arg0: i32, %arg1: memref<1x64x128xf32, #tpu.memory_space<vmem>>, %arg2: memref<1x64x128xbf16, #tpu.memory_space<vmem>>, %arg3: memref<128x128xbf16, #tpu.memory_space<vmem>>, %arg4: memref<1x128xf32, #tpu.memory_space<vmem>>, %arg5: memref<1x128xf32, #tpu.memory_space<vmem>>, %arg6: memref<1x64x128xf32, #tpu.memory_space<vmem>>) attributes {dimension_semantics = [#tpu.dimension_semantics<parallel>], iteration_bounds = array<i64: 2>, scalar_prefetch = 0 : i64, scratch_operands = 0 : i64, tpu.core_type = #tpu.core_type<tc>, window_params = [{transform_indices = @transform_0, window_bounds = array<i64: 1, 64, 128>}, {transform_indices = @transform_1, window_bounds = array<i64: 1, 64, 128>}, {pipeline_mode = #tpu.pipeline_mode<synchronous>, transform_indices = @transform_2, window_bounds = array<i64: 128, 128>}, {pipeline_mode = #tpu.pipeline_mode<synchronous>, transform_indices = @transform_3, window_bounds = array<i64: 1, 128>}, {pipeline_mode = #tpu.pipeline_mode<synchronous>, transform_indices = @transform_4, window_bounds = array<i64: 1, 128>}, {transform_indices = @transform_5, window_bounds = array<i64: 1, 64, 128>}]} {
    %c0 = arith.constant 0 : index
    %c0_0 = arith.constant 0 : index
    %c0_1 = arith.constant 0 : index
    %0 = vector.load %arg2[%c0, %c0_0, %c0_1] : memref<1x64x128xbf16, #tpu.memory_space<vmem>>, vector<1x64x128xbf16>
    %1 = vector.shape_cast %0 : vector<1x64x128xbf16> to vector<64x128xbf16>
    %c0_2 = arith.constant 0 : index
    %c0_3 = arith.constant 0 : index
    %2 = vector.load %arg3[%c0_2, %c0_3] : memref<128x128xbf16, #tpu.memory_space<vmem>>, vector<128x128xbf16>
    %cst = arith.constant dense<0.000000e+00> : vector<64x128xf32>
    %3 = tpu.matmul %1, %2, %cst {dimension_numbers = #tpu.dot_dimension_numbers<[1], [0], [0], [1], [0, 0, 1, 1], [], []>} : vector<64x128xbf16>, vector<128x128xbf16>, vector<64x128xf32> -> vector<64x128xf32>
    %c0_4 = arith.constant 0 : index
    %c0_5 = arith.constant 0 : index
    %c0_6 = arith.constant 0 : index
    %4 = vector.load %arg1[%c0_4, %c0_5, %c0_6] : memref<1x64x128xf32, #tpu.memory_space<vmem>>, vector<1x64x128xf32>
    %5 = vector.shape_cast %4 : vector<1x64x128xf32> to vector<64x128xf32>
    %c0_7 = arith.constant 0 : index
    %c0_8 = arith.constant 0 : index
    %6 = vector.load %arg4[%c0_7, %c0_8] : memref<1x128xf32, #tpu.memory_space<vmem>>, vector<1x128xf32>
    %7 = vector.broadcast %6 : vector<1x128xf32> to vector<64x128xf32>
    %8 = arith.mulf %5, %7 : vector<64x128xf32>
    %c0_9 = arith.constant 0 : index
    %c0_10 = arith.constant 0 : index
    %9 = vector.load %arg5[%c0_9, %c0_10] : memref<1x128xf32, #tpu.memory_space<vmem>>, vector<1x128xf32>
    %10 = vector.broadcast %9 : vector<1x128xf32> to vector<64x128xf32>
    %11 = arith.addf %8, %10 : vector<64x128xf32>
    %12 = arith.addf %11, %3 : vector<64x128xf32>
    %cst_11 = arith.constant 0.000000e+00 : f32
    %13 = vector.broadcast %cst_11 : f32 to vector<64x128xf32>
    %14 = arith.maximumf %12, %13 : vector<64x128xf32>
    %c0_12 = arith.constant 0 : index
    %c0_13 = arith.constant 0 : index
    %c0_14 = arith.constant 0 : index
    %15 = vector.load %arg6[%c0_12, %c0_13, %c0_14] : memref<1x64x128xf32, #tpu.memory_space<vmem>>, vector<1x64x128xf32>
    %16 = vector.shape_cast %15 : vector<1x64x128xf32> to vector<64x128xf32>
    %17 = vector.shape_cast %14 : vector<64x128xf32> to vector<1x64x128xf32>
    tpu.vector_store %arg6[%c0_12, %c0_13, %c0_14], %17 {strides = array<i32>} : memref<1x64x128xf32, #tpu.memory_space<vmem>>, vector<1x64x128xf32>,
    return
  }
  func.func @transform_0(%arg0: i32) -> (i32, i32, i32) {
    %c0_i32 = arith.constant 0 : i32
    %c0_i32_0 = arith.constant 0 : i32
    %c0_i32_1 = arith.constant 0 : i32
    return %arg0, %c0_i32, %c0_i32_0 : i32, i32, i32
  }
  func.func @transform_1(%arg0: i32) -> (i32, i32, i32) {
    %c0_i32 = arith.constant 0 : i32
    %c0_i32_0 = arith.constant 0 : i32
    %c0_i32_1 = arith.constant 0 : i32
    return %arg0, %c0_i32, %c0_i32_0 : i32, i32, i32
  }
  func.func @transform_2(%arg0: i32) -> (i32, i32) {
    %c0_i32 = arith.constant 0 : i32
    %c0_i32_0 = arith.constant 0 : i32
    %c0_i32_1 = arith.constant 0 : i32
    return %c0_i32, %c0_i32_0 : i32, i32
  }
  func.func @transform_3(%arg0: i32) -> (i32, i32) {
    %c0_i32 = arith.constant 0 : i32
    %c0_i32_0 = arith.constant 0 : i32
    %c0_i32_1 = arith.constant 0 : i32
    return %c0_i32, %c0_i32_0 : i32, i32
  }
  func.func @transform_4(%arg0: i32) -> (i32, i32) {
    %c0_i32 = arith.constant 0 : i32
    %c0_i32_0 = arith.constant 0 : i32
    %c0_i32_1 = arith.constant 0 : i32
    return %c0_i32, %c0_i32_0 : i32, i32
  }
  func.func @transform_5(%arg0: i32) -> (i32, i32, i32) {
    %c0_i32 = arith.constant 0 : i32
    %c0_i32_0 = arith.constant 0 : i32
    %c0_i32_1 = arith.constant 0 : i32
    return %arg0, %c0_i32, %c0_i32_0 : i32, i32, i32
  }
}

module attributes {stable_mosaic.version = 11 : i64} {
  func.func @_bn_relu_conv3x3_stats_kernel(%arg0: i32, %arg1: memref<1x64x128xf32, #tpu.memory_space<vmem>>, %arg2: memref<9x128x128xbf16, #tpu.memory_space<vmem>>, %arg3: memref<1x128xf32, #tpu.memory_space<vmem>>, %arg4: memref<1x128xf32, #tpu.memory_space<vmem>>, %arg5: memref<1x64x128xf32, #tpu.memory_space<vmem>>, %arg6: memref<1x2x128xf32, #tpu.memory_space<vmem>>, %arg7: memref<10x10x128xf32, #tpu.memory_space<vmem>>, %arg8: memref<64x128xf32, #tpu.memory_space<vmem>>) attributes {dimension_semantics = [#tpu.dimension_semantics<parallel>], iteration_bounds = array<i64: 2>, scalar_prefetch = 0 : i64, scratch_operands = 2 : i64, tpu.core_type = #tpu.core_type<tc>, window_params = [{transform_indices = @transform_0, window_bounds = array<i64: 1, 64, 128>}, {pipeline_mode = #tpu.pipeline_mode<synchronous>, transform_indices = @transform_1, window_bounds = array<i64: 9, 128, 128>}, {pipeline_mode = #tpu.pipeline_mode<synchronous>, transform_indices = @transform_2, window_bounds = array<i64: 1, 128>}, {pipeline_mode = #tpu.pipeline_mode<synchronous>, transform_indices = @transform_3, window_bounds = array<i64: 1, 128>}, {transform_indices = @transform_4, window_bounds = array<i64: 1, 64, 128>}, {transform_indices = @transform_5, window_bounds = array<i64: 1, 2, 128>}]} {
    %c0 = arith.constant 0 : index
    %c0_0 = arith.constant 0 : index
    %c0_1 = arith.constant 0 : index
    %0 = vector.load %arg1[%c0, %c0_0, %c0_1] : memref<1x64x128xf32, #tpu.memory_space<vmem>>, vector<1x64x128xf32>
    %1 = vector.shape_cast %0 : vector<1x64x128xf32> to vector<64x128xf32>
    %c0_2 = arith.constant 0 : index
    %c0_3 = arith.constant 0 : index
    %2 = vector.load %arg3[%c0_2, %c0_3] : memref<1x128xf32, #tpu.memory_space<vmem>>, vector<1x128xf32>
    %3 = vector.broadcast %2 : vector<1x128xf32> to vector<64x128xf32>
    %4 = arith.mulf %1, %3 : vector<64x128xf32>
    %c0_4 = arith.constant 0 : index
    %c0_5 = arith.constant 0 : index
    %5 = vector.load %arg4[%c0_4, %c0_5] : memref<1x128xf32, #tpu.memory_space<vmem>>, vector<1x128xf32>
    %6 = vector.broadcast %5 : vector<1x128xf32> to vector<64x128xf32>
    %7 = arith.addf %4, %6 : vector<64x128xf32>
    %cst = arith.constant 0.000000e+00 : f32
    %8 = vector.broadcast %cst : f32 to vector<64x128xf32>
    %9 = arith.maximumf %7, %8 : vector<64x128xf32>
    %cst_6 = arith.constant 0.000000e+00 : f32
    %10 = vector.broadcast %cst_6 : f32 to vector<10x10x128xf32>
    %c0_7 = arith.constant 0 : index
    %c0_8 = arith.constant 0 : index
    %c0_9 = arith.constant 0 : index
    %11 = vector.load %arg7[%c0_7, %c0_8, %c0_9] : memref<10x10x128xf32, #tpu.memory_space<vmem>>, vector<10x10x128xf32>
    tpu.vector_store %arg7[%c0_7, %c0_8, %c0_9], %10 {strides = array<i32>} : memref<10x10x128xf32, #tpu.memory_space<vmem>>, vector<10x10x128xf32>,
    %12 = vector.shape_cast %9 : vector<64x128xf32> to vector<8x8x128xf32>
    %c1 = arith.constant 1 : index
    %c1_10 = arith.constant 1 : index
    %c0_11 = arith.constant 0 : index
    %13 = vector.load %arg7[%c1, %c1_10, %c0_11] : memref<10x10x128xf32, #tpu.memory_space<vmem>>, vector<8x8x128xf32>
    tpu.vector_store %arg7[%c1, %c1_10, %c0_11], %12 {strides = array<i32>} : memref<10x10x128xf32, #tpu.memory_space<vmem>>, vector<8x8x128xf32>,
    %cst_12 = arith.constant 0.000000e+00 : f32
    %14 = vector.broadcast %cst_12 : f32 to vector<64x128xf32>
    %c0_13 = arith.constant 0 : index
    %c0_14 = arith.constant 0 : index
    %15 = vector.load %arg8[%c0_13, %c0_14] : memref<64x128xf32, #tpu.memory_space<vmem>>, vector<64x128xf32>
    tpu.vector_store %arg8[%c0_13, %c0_14], %14 {strides = array<i32>} : memref<64x128xf32, #tpu.memory_space<vmem>>, vector<64x128xf32>,
    %c0_15 = arith.constant 0 : index
    %c0_16 = arith.constant 0 : index
    %c0_17 = arith.constant 0 : index
    %16 = vector.load %arg7[%c0_15, %c0_16, %c0_17] : memref<10x10x128xf32, #tpu.memory_space<vmem>>, vector<8x8x128xf32>
    %17 = vector.shape_cast %16 : vector<8x8x128xf32> to vector<64x128xf32>
    %18 = arith.truncf %17 : vector<64x128xf32> to vector<64x128xbf16>
    %c0_18 = arith.constant 0 : index
    %c0_19 = arith.constant 0 : index
    %19 = vector.load %arg8[%c0_18, %c0_19] : memref<64x128xf32, #tpu.memory_space<vmem>>, vector<64x128xf32>
    %c0_20 = arith.constant 0 : index
    %c0_21 = arith.constant 0 : index
    %c0_22 = arith.constant 0 : index
    %20 = vector.load %arg2[%c0_20, %c0_21, %c0_22] : memref<9x128x128xbf16, #tpu.memory_space<vmem>>, vector<1x128x128xbf16>
    %21 = vector.shape_cast %20 : vector<1x128x128xbf16> to vector<128x128xbf16>
    %cst_23 = arith.constant dense<0.000000e+00> : vector<64x128xf32>
    %22 = tpu.matmul %18, %21, %cst_23 {dimension_numbers = #tpu.dot_dimension_numbers<[1], [0], [0], [1], [0, 0, 1, 1], [], []>} : vector<64x128xbf16>, vector<128x128xbf16>, vector<64x128xf32> -> vector<64x128xf32>
    %23 = arith.addf %19, %22 : vector<64x128xf32>
    %c0_24 = arith.constant 0 : index
    %c0_25 = arith.constant 0 : index
    %24 = vector.load %arg8[%c0_24, %c0_25] : memref<64x128xf32, #tpu.memory_space<vmem>>, vector<64x128xf32>
    tpu.vector_store %arg8[%c0_24, %c0_25], %23 {strides = array<i32>} : memref<64x128xf32, #tpu.memory_space<vmem>>, vector<64x128xf32>,
    %c0_26 = arith.constant 0 : index
    %c1_27 = arith.constant 1 : index
    %c0_28 = arith.constant 0 : index
    %25 = vector.load %arg7[%c0_26, %c1_27, %c0_28] : memref<10x10x128xf32, #tpu.memory_space<vmem>>, vector<8x8x128xf32>
    %26 = vector.shape_cast %25 : vector<8x8x128xf32> to vector<64x128xf32>
    %27 = arith.truncf %26 : vector<64x128xf32> to vector<64x128xbf16>
    %c0_29 = arith.constant 0 : index
    %c0_30 = arith.constant 0 : index
    %28 = vector.load %arg8[%c0_29, %c0_30] : memref<64x128xf32, #tpu.memory_space<vmem>>, vector<64x128xf32>
    %c1_31 = arith.constant 1 : index
    %c0_32 = arith.constant 0 : index
    %c0_33 = arith.constant 0 : index
    %29 = vector.load %arg2[%c1_31, %c0_32, %c0_33] : memref<9x128x128xbf16, #tpu.memory_space<vmem>>, vector<1x128x128xbf16>
    %30 = vector.shape_cast %29 : vector<1x128x128xbf16> to vector<128x128xbf16>
    %cst_34 = arith.constant dense<0.000000e+00> : vector<64x128xf32>
    %31 = tpu.matmul %27, %30, %cst_34 {dimension_numbers = #tpu.dot_dimension_numbers<[1], [0], [0], [1], [0, 0, 1, 1], [], []>} : vector<64x128xbf16>, vector<128x128xbf16>, vector<64x128xf32> -> vector<64x128xf32>
    %32 = arith.addf %28, %31 : vector<64x128xf32>
    %c0_35 = arith.constant 0 : index
    %c0_36 = arith.constant 0 : index
    %33 = vector.load %arg8[%c0_35, %c0_36] : memref<64x128xf32, #tpu.memory_space<vmem>>, vector<64x128xf32>
    tpu.vector_store %arg8[%c0_35, %c0_36], %32 {strides = array<i32>} : memref<64x128xf32, #tpu.memory_space<vmem>>, vector<64x128xf32>,
    %c0_37 = arith.constant 0 : index
    %c2 = arith.constant 2 : index
    %c0_38 = arith.constant 0 : index
    %34 = vector.load %arg7[%c0_37, %c2, %c0_38] : memref<10x10x128xf32, #tpu.memory_space<vmem>>, vector<8x8x128xf32>
    %35 = vector.shape_cast %34 : vector<8x8x128xf32> to vector<64x128xf32>
    %36 = arith.truncf %35 : vector<64x128xf32> to vector<64x128xbf16>
    %c0_39 = arith.constant 0 : index
    %c0_40 = arith.constant 0 : index
    %37 = vector.load %arg8[%c0_39, %c0_40] : memref<64x128xf32, #tpu.memory_space<vmem>>, vector<64x128xf32>
    %c2_41 = arith.constant 2 : index
    %c0_42 = arith.constant 0 : index
    %c0_43 = arith.constant 0 : index
    %38 = vector.load %arg2[%c2_41, %c0_42, %c0_43] : memref<9x128x128xbf16, #tpu.memory_space<vmem>>, vector<1x128x128xbf16>
    %39 = vector.shape_cast %38 : vector<1x128x128xbf16> to vector<128x128xbf16>
    %cst_44 = arith.constant dense<0.000000e+00> : vector<64x128xf32>
    %40 = tpu.matmul %36, %39, %cst_44 {dimension_numbers = #tpu.dot_dimension_numbers<[1], [0], [0], [1], [0, 0, 1, 1], [], []>} : vector<64x128xbf16>, vector<128x128xbf16>, vector<64x128xf32> -> vector<64x128xf32>
    %41 = arith.addf %37, %40 : vector<64x128xf32>
    %c0_45 = arith.constant 0 : index
    %c0_46 = arith.constant 0 : index
    %42 = vector.load %arg8[%c0_45, %c0_46] : memref<64x128xf32, #tpu.memory_space<vmem>>, vector<64x128xf32>
    tpu.vector_store %arg8[%c0_45, %c0_46], %41 {strides = array<i32>} : memref<64x128xf32, #tpu.memory_space<vmem>>, vector<64x128xf32>,
    %c1_47 = arith.constant 1 : index
    %c0_48 = arith.constant 0 : index
    %c0_49 = arith.constant 0 : index
    %43 = vector.load %arg7[%c1_47, %c0_48, %c0_49] : memref<10x10x128xf32, #tpu.memory_space<vmem>>, vector<8x8x128xf32>
    %44 = vector.shape_cast %43 : vector<8x8x128xf32> to vector<64x128xf32>
    %45 = arith.truncf %44 : vector<64x128xf32> to vector<64x128xbf16>
    %c0_50 = arith.constant 0 : index
    %c0_51 = arith.constant 0 : index
    %46 = vector.load %arg8[%c0_50, %c0_51] : memref<64x128xf32, #tpu.memory_space<vmem>>, vector<64x128xf32>
    %c3 = arith.constant 3 : index
    %c0_52 = arith.constant 0 : index
    %c0_53 = arith.constant 0 : index
    %47 = vector.load %arg2[%c3, %c0_52, %c0_53] : memref<9x128x128xbf16, #tpu.memory_space<vmem>>, vector<1x128x128xbf16>
    %48 = vector.shape_cast %47 : vector<1x128x128xbf16> to vector<128x128xbf16>
    %cst_54 = arith.constant dense<0.000000e+00> : vector<64x128xf32>
    %49 = tpu.matmul %45, %48, %cst_54 {dimension_numbers = #tpu.dot_dimension_numbers<[1], [0], [0], [1], [0, 0, 1, 1], [], []>} : vector<64x128xbf16>, vector<128x128xbf16>, vector<64x128xf32> -> vector<64x128xf32>
    %50 = arith.addf %46, %49 : vector<64x128xf32>
    %c0_55 = arith.constant 0 : index
    %c0_56 = arith.constant 0 : index
    %51 = vector.load %arg8[%c0_55, %c0_56] : memref<64x128xf32, #tpu.memory_space<vmem>>, vector<64x128xf32>
    tpu.vector_store %arg8[%c0_55, %c0_56], %50 {strides = array<i32>} : memref<64x128xf32, #tpu.memory_space<vmem>>, vector<64x128xf32>,
    %c1_57 = arith.constant 1 : index
    %c1_58 = arith.constant 1 : index
    %c0_59 = arith.constant 0 : index
    %52 = vector.load %arg7[%c1_57, %c1_58, %c0_59] : memref<10x10x128xf32, #tpu.memory_space<vmem>>, vector<8x8x128xf32>
    %53 = vector.shape_cast %52 : vector<8x8x128xf32> to vector<64x128xf32>
    %54 = arith.truncf %53 : vector<64x128xf32> to vector<64x128xbf16>
    %c0_60 = arith.constant 0 : index
    %c0_61 = arith.constant 0 : index
    %55 = vector.load %arg8[%c0_60, %c0_61] : memref<64x128xf32, #tpu.memory_space<vmem>>, vector<64x128xf32>
    %c4 = arith.constant 4 : index
    %c0_62 = arith.constant 0 : index
    %c0_63 = arith.constant 0 : index
    %56 = vector.load %arg2[%c4, %c0_62, %c0_63] : memref<9x128x128xbf16, #tpu.memory_space<vmem>>, vector<1x128x128xbf16>
    %57 = vector.shape_cast %56 : vector<1x128x128xbf16> to vector<128x128xbf16>
    %cst_64 = arith.constant dense<0.000000e+00> : vector<64x128xf32>
    %58 = tpu.matmul %54, %57, %cst_64 {dimension_numbers = #tpu.dot_dimension_numbers<[1], [0], [0], [1], [0, 0, 1, 1], [], []>} : vector<64x128xbf16>, vector<128x128xbf16>, vector<64x128xf32> -> vector<64x128xf32>
    %59 = arith.addf %55, %58 : vector<64x128xf32>
    %c0_65 = arith.constant 0 : index
    %c0_66 = arith.constant 0 : index
    %60 = vector.load %arg8[%c0_65, %c0_66] : memref<64x128xf32, #tpu.memory_space<vmem>>, vector<64x128xf32>
    tpu.vector_store %arg8[%c0_65, %c0_66], %59 {strides = array<i32>} : memref<64x128xf32, #tpu.memory_space<vmem>>, vector<64x128xf32>,
    %c1_67 = arith.constant 1 : index
    %c2_68 = arith.constant 2 : index
    %c0_69 = arith.constant 0 : index
    %61 = vector.load %arg7[%c1_67, %c2_68, %c0_69] : memref<10x10x128xf32, #tpu.memory_space<vmem>>, vector<8x8x128xf32>
    %62 = vector.shape_cast %61 : vector<8x8x128xf32> to vector<64x128xf32>
    %63 = arith.truncf %62 : vector<64x128xf32> to vector<64x128xbf16>
    %c0_70 = arith.constant 0 : index
    %c0_71 = arith.constant 0 : index
    %64 = vector.load %arg8[%c0_70, %c0_71] : memref<64x128xf32, #tpu.memory_space<vmem>>, vector<64x128xf32>
    %c5 = arith.constant 5 : index
    %c0_72 = arith.constant 0 : index
    %c0_73 = arith.constant 0 : index
    %65 = vector.load %arg2[%c5, %c0_72, %c0_73] : memref<9x128x128xbf16, #tpu.memory_space<vmem>>, vector<1x128x128xbf16>
    %66 = vector.shape_cast %65 : vector<1x128x128xbf16> to vector<128x128xbf16>
    %cst_74 = arith.constant dense<0.000000e+00> : vector<64x128xf32>
    %67 = tpu.matmul %63, %66, %cst_74 {dimension_numbers = #tpu.dot_dimension_numbers<[1], [0], [0], [1], [0, 0, 1, 1], [], []>} : vector<64x128xbf16>, vector<128x128xbf16>, vector<64x128xf32> -> vector<64x128xf32>
    %68 = arith.addf %64, %67 : vector<64x128xf32>
    %c0_75 = arith.constant 0 : index
    %c0_76 = arith.constant 0 : index
    %69 = vector.load %arg8[%c0_75, %c0_76] : memref<64x128xf32, #tpu.memory_space<vmem>>, vector<64x128xf32>
    tpu.vector_store %arg8[%c0_75, %c0_76], %68 {strides = array<i32>} : memref<64x128xf32, #tpu.memory_space<vmem>>, vector<64x128xf32>,
    %c2_77 = arith.constant 2 : index
    %c0_78 = arith.constant 0 : index
    %c0_79 = arith.constant 0 : index
    %70 = vector.load %arg7[%c2_77, %c0_78, %c0_79] : memref<10x10x128xf32, #tpu.memory_space<vmem>>, vector<8x8x128xf32>
    %71 = vector.shape_cast %70 : vector<8x8x128xf32> to vector<64x128xf32>
    %72 = arith.truncf %71 : vector<64x128xf32> to vector<64x128xbf16>
    %c0_80 = arith.constant 0 : index
    %c0_81 = arith.constant 0 : index
    %73 = vector.load %arg8[%c0_80, %c0_81] : memref<64x128xf32, #tpu.memory_space<vmem>>, vector<64x128xf32>
    %c6 = arith.constant 6 : index
    %c0_82 = arith.constant 0 : index
    %c0_83 = arith.constant 0 : index
    %74 = vector.load %arg2[%c6, %c0_82, %c0_83] : memref<9x128x128xbf16, #tpu.memory_space<vmem>>, vector<1x128x128xbf16>
    %75 = vector.shape_cast %74 : vector<1x128x128xbf16> to vector<128x128xbf16>
    %cst_84 = arith.constant dense<0.000000e+00> : vector<64x128xf32>
    %76 = tpu.matmul %72, %75, %cst_84 {dimension_numbers = #tpu.dot_dimension_numbers<[1], [0], [0], [1], [0, 0, 1, 1], [], []>} : vector<64x128xbf16>, vector<128x128xbf16>, vector<64x128xf32> -> vector<64x128xf32>
    %77 = arith.addf %73, %76 : vector<64x128xf32>
    %c0_85 = arith.constant 0 : index
    %c0_86 = arith.constant 0 : index
    %78 = vector.load %arg8[%c0_85, %c0_86] : memref<64x128xf32, #tpu.memory_space<vmem>>, vector<64x128xf32>
    tpu.vector_store %arg8[%c0_85, %c0_86], %77 {strides = array<i32>} : memref<64x128xf32, #tpu.memory_space<vmem>>, vector<64x128xf32>,
    %c2_87 = arith.constant 2 : index
    %c1_88 = arith.constant 1 : index
    %c0_89 = arith.constant 0 : index
    %79 = vector.load %arg7[%c2_87, %c1_88, %c0_89] : memref<10x10x128xf32, #tpu.memory_space<vmem>>, vector<8x8x128xf32>
    %80 = vector.shape_cast %79 : vector<8x8x128xf32> to vector<64x128xf32>
    %81 = arith.truncf %80 : vector<64x128xf32> to vector<64x128xbf16>
    %c0_90 = arith.constant 0 : index
    %c0_91 = arith.constant 0 : index
    %82 = vector.load %arg8[%c0_90, %c0_91] : memref<64x128xf32, #tpu.memory_space<vmem>>, vector<64x128xf32>
    %c7 = arith.constant 7 : index
    %c0_92 = arith.constant 0 : index
    %c0_93 = arith.constant 0 : index
    %83 = vector.load %arg2[%c7, %c0_92, %c0_93] : memref<9x128x128xbf16, #tpu.memory_space<vmem>>, vector<1x128x128xbf16>
    %84 = vector.shape_cast %83 : vector<1x128x128xbf16> to vector<128x128xbf16>
    %cst_94 = arith.constant dense<0.000000e+00> : vector<64x128xf32>
    %85 = tpu.matmul %81, %84, %cst_94 {dimension_numbers = #tpu.dot_dimension_numbers<[1], [0], [0], [1], [0, 0, 1, 1], [], []>} : vector<64x128xbf16>, vector<128x128xbf16>, vector<64x128xf32> -> vector<64x128xf32>
    %86 = arith.addf %82, %85 : vector<64x128xf32>
    %c0_95 = arith.constant 0 : index
    %c0_96 = arith.constant 0 : index
    %87 = vector.load %arg8[%c0_95, %c0_96] : memref<64x128xf32, #tpu.memory_space<vmem>>, vector<64x128xf32>
    tpu.vector_store %arg8[%c0_95, %c0_96], %86 {strides = array<i32>} : memref<64x128xf32, #tpu.memory_space<vmem>>, vector<64x128xf32>,
    %c2_97 = arith.constant 2 : index
    %c2_98 = arith.constant 2 : index
    %c0_99 = arith.constant 0 : index
    %88 = vector.load %arg7[%c2_97, %c2_98, %c0_99] : memref<10x10x128xf32, #tpu.memory_space<vmem>>, vector<8x8x128xf32>
    %89 = vector.shape_cast %88 : vector<8x8x128xf32> to vector<64x128xf32>
    %90 = arith.truncf %89 : vector<64x128xf32> to vector<64x128xbf16>
    %c0_100 = arith.constant 0 : index
    %c0_101 = arith.constant 0 : index
    %91 = vector.load %arg8[%c0_100, %c0_101] : memref<64x128xf32, #tpu.memory_space<vmem>>, vector<64x128xf32>
    %c8 = arith.constant 8 : index
    %c0_102 = arith.constant 0 : index
    %c0_103 = arith.constant 0 : index
    %92 = vector.load %arg2[%c8, %c0_102, %c0_103] : memref<9x128x128xbf16, #tpu.memory_space<vmem>>, vector<1x128x128xbf16>
    %93 = vector.shape_cast %92 : vector<1x128x128xbf16> to vector<128x128xbf16>
    %cst_104 = arith.constant dense<0.000000e+00> : vector<64x128xf32>
    %94 = tpu.matmul %90, %93, %cst_104 {dimension_numbers = #tpu.dot_dimension_numbers<[1], [0], [0], [1], [0, 0, 1, 1], [], []>} : vector<64x128xbf16>, vector<128x128xbf16>, vector<64x128xf32> -> vector<64x128xf32>
    %95 = arith.addf %91, %94 : vector<64x128xf32>
    %c0_105 = arith.constant 0 : index
    %c0_106 = arith.constant 0 : index
    %96 = vector.load %arg8[%c0_105, %c0_106] : memref<64x128xf32, #tpu.memory_space<vmem>>, vector<64x128xf32>
    tpu.vector_store %arg8[%c0_105, %c0_106], %95 {strides = array<i32>} : memref<64x128xf32, #tpu.memory_space<vmem>>, vector<64x128xf32>,
    %c0_107 = arith.constant 0 : index
    %c0_108 = arith.constant 0 : index
    %97 = vector.load %arg8[%c0_107, %c0_108] : memref<64x128xf32, #tpu.memory_space<vmem>>, vector<64x128xf32>
    %c0_109 = arith.constant 0 : index
    %c0_110 = arith.constant 0 : index
    %c0_111 = arith.constant 0 : index
    %98 = vector.load %arg5[%c0_109, %c0_110, %c0_111] : memref<1x64x128xf32, #tpu.memory_space<vmem>>, vector<1x64x128xf32>
    %99 = vector.shape_cast %98 : vector<1x64x128xf32> to vector<64x128xf32>
    %100 = vector.shape_cast %97 : vector<64x128xf32> to vector<1x64x128xf32>
    tpu.vector_store %arg5[%c0_109, %c0_110, %c0_111], %100 {strides = array<i32>} : memref<1x64x128xf32, #tpu.memory_space<vmem>>, vector<1x64x128xf32>,
    %cst_112 = arith.constant dense<0.000000e+00> : vector<128xf32>
    %101 = vector.multi_reduction <add>, %97, %cst_112 [0] : vector<64x128xf32> to vector<128xf32>
    %102 = vector.shape_cast %101 : vector<128xf32> to vector<1x128xf32>
    %103 = arith.mulf %97, %97 : vector<64x128xf32>
    %cst_113 = arith.constant dense<0.000000e+00> : vector<128xf32>
    %104 = vector.multi_reduction <add>, %103, %cst_113 [0] : vector<64x128xf32> to vector<128xf32>
    %105 = vector.shape_cast %104 : vector<128xf32> to vector<1x128xf32>
    %106 = tpu.concatenate %102, %105 in 0 : vector<1x128xf32>, vector<1x128xf32> -> vector<2x128xf32>
    %c0_114 = arith.constant 0 : index
    %c0_115 = arith.constant 0 : index
    %c0_116 = arith.constant 0 : index
    %107 = vector.load %arg6[%c0_114, %c0_115, %c0_116] : memref<1x2x128xf32, #tpu.memory_space<vmem>>, vector<1x2x128xf32>
    %108 = vector.shape_cast %107 : vector<1x2x128xf32> to vector<2x128xf32>
    %109 = vector.shape_cast %106 : vector<2x128xf32> to vector<1x2x128xf32>
    tpu.vector_store %arg6[%c0_114, %c0_115, %c0_116], %109 {strides = array<i32>} : memref<1x2x128xf32, #tpu.memory_space<vmem>>, vector<1x2x128xf32>,
    return
  }
  func.func @transform_0(%arg0: i32) -> (i32, i32, i32) {
    %c0_i32 = arith.constant 0 : i32
    %c0_i32_0 = arith.constant 0 : i32
    %c0_i32_1 = arith.constant 0 : i32
    return %arg0, %c0_i32, %c0_i32_0 : i32, i32, i32
  }
  func.func @transform_1(%arg0: i32) -> (i32, i32, i32) {
    %c0_i32 = arith.constant 0 : i32
    %c0_i32_0 = arith.constant 0 : i32
    %c0_i32_1 = arith.constant 0 : i32
    %c0_i32_2 = arith.constant 0 : i32
    return %c0_i32, %c0_i32_0, %c0_i32_1 : i32, i32, i32
  }
  func.func @transform_2(%arg0: i32) -> (i32, i32) {
    %c0_i32 = arith.constant 0 : i32
    %c0_i32_0 = arith.constant 0 : i32
    %c0_i32_1 = arith.constant 0 : i32
    return %c0_i32, %c0_i32_0 : i32, i32
  }
  func.func @transform_3(%arg0: i32) -> (i32, i32) {
    %c0_i32 = arith.constant 0 : i32
    %c0_i32_0 = arith.constant 0 : i32
    %c0_i32_1 = arith.constant 0 : i32
    return %c0_i32, %c0_i32_0 : i32, i32
  }
  func.func @transform_4(%arg0: i32) -> (i32, i32, i32) {
    %c0_i32 = arith.constant 0 : i32
    %c0_i32_0 = arith.constant 0 : i32
    %c0_i32_1 = arith.constant 0 : i32
    return %arg0, %c0_i32, %c0_i32_0 : i32, i32, i32
  }
  func.func @transform_5(%arg0: i32) -> (i32, i32, i32) {
    %c0_i32 = arith.constant 0 : i32
    %c0_i32_0 = arith.constant 0 : i32
    %c0_i32_1 = arith.constant 0 : i32
    return %arg0, %c0_i32, %c0_i32_0 : i32, i32, i32
  }
}

</mosaic_0001>

<bundles_post_ra>
// kernel: residual_block_forward.5
= control target key start
LH: loop header
LB: loop body
LE: loop exit
PB: predicated region body
PF: predicated region fallthrough
CT: control target
= control target key end

     0   :  { %s676_s18 = smov 0   ;;  %s740_s0 = inlined_call_operand.vmem [shape: f32[2,64,128], index: 0, kind: input, shape index: {}]   ;;  %s741_s1 = inlined_call_operand.vmem [shape: bf16[2,64,128], index: 1, kind: input, shape index: {}]   ;;  %s742_s2 = inlined_call_operand.vmem [shape: bf16[128,128], index: 2, kind: input, shape index: {}]   ;;  %s743_s3 = inlined_call_operand.vmem [shape: f32[1,128], index: 3, kind: input, shape index: {}]   ;;  %s744_s4 = inlined_call_operand.vmem [shape: f32[1,128], index: 4, kind: input, shape index: {}]   ;;  %s745_s5 = inlined_call_operand.vmem [shape: f32[2,64,128], index: 5, kind: output, shape index: {}]  }
   0x1 LB: > { %s536_s19 = sadd.s32 4294967295, %s644_s18   ;;  %p540_p0 = scmp.ge.s32.totalorder %s644_s18, 1  ;;  %s644_s18 = sphi %s676_s18, %s15_s18  }
   0x2   : > { %p197_p1 = scmp.lt.s32.totalorder %s644_s18, 3 }
   0x4   : > { %p198_p2 = pnand %p540_p0, %p197_p1 }
   0x5   : > { %p230_p3 = scmp.lt.s32.totalorder (!%p198_p2), %s536_s19, 1 }
   0x6   : > { %201 = sbr.rel (%p198_p2) target bundleno = 248 (0xf8), region = 40 }
   0xb   : > { %v626_v0 = vld [vmem:[%s742_s2 + $0x38] sm:$0xff]   ;;  %v627_v1 = vld [vmem:[%s742_s2 + $0x30] sm:$0xff]   ;;  %s747_s19 = smov (!%p230_p3, %s536_s19), 1  ;;  %v628_v2 = vld [vmem:[%s742_s2 + $0x28] sm:$0xff]  }
   0xc   : > { %578 = vmatprep.subr.bf16.mxu0 %v626_v0  ;;  %602 = vmatprep.subr.bf16.mxu1 %v626_v0  ;;  %s564_s26 = sshll.u32 %s747_s19, 5  ;;  %v629_v3 = vld [vmem:[%s742_s2 + $0x20] sm:$0xff]   ;;  %v630_v6 = vld [vmem:[%s742_s2 + $0x18] sm:$0xff]   ;;  %v631_v7 = vld [vmem:[%s742_s2 + $0x10] sm:$0xff]   ;;  %s563_s15 = sshll.u32 %s747_s19, 6 }
   0xd   : > { %579 = vmatpush3.bf16.msra.mxu0 %v626_v0  ;;  %610 = vmatpush3.bf16.msra.mxu1 %v626_v0  ;;  %s699_s29 = scalar_lea.vmem %s741_s1, %s564_s26  ;;  %v632_v8 = vld [vmem:[%s742_s2 + $0x8] sm:$0xff]   ;;  %v633_v9 = vld [vmem:[%s742_s2] sm:$0xff]   ;;  %s234_s20 = scalar_lea.vmem %s740_s0, %s563_s15 }
   0xe   : > { %580 = vmatprep.subr.bf16.mxu0 %v627_v1  ;;  %603 = vmatprep.subr.bf16.mxu1 %v627_v1  ;;  %v634_v4 = vld [vmem:[%s699_s29] sm:$0xff]   ;;  %v635_v5 = vld [vmem:[%s699_s29 + $0x10] sm:$0xff]   ;;  %v636_v10 = vld [vmem:[%s699_s29 + $0x8] sm:$0xff]   ;;  %s244_s27 = scalar_lea.vmem %s745_s5, %s563_s15 }
   0xf   : > { %594 = vmatprep.mubr.bf16.mxu0 %v634_v4  ;;  %598 = vmatprep.mubr.bf16.mxu1 %v635_v5  ;;  %v637_v11 = vld [vmem:[%s699_s29 + $0x18] sm:$0xff]   ;;  %v409_v12 = vld [vmem:[%s234_s20 + $0x10] sm:$0xff]  ;;  %v559_v13 = vld [vmem:[%s743_s3] ss:$0 sm:$0xff] }
  0x10   : > { %v413_v14 = vld [vmem:[%s234_s20 + $0x30] sm:$0xff]  ;;  %v407_v15 = vld [vmem:[%s234_s20] sm:$0xff]  ;;  %v424_v17 = vmul.f32 %v559_v13, %v409_v12  ;;  %v410_v20 = vld [vmem:[%s234_s20 + $0x18] sm:$0xff] }
  0x11   : > { %581 = vmatpush3.bf16.msra.mxu0 %v627_v1  ;;  %611 = vmatpush3.bf16.msra.mxu1 %v627_v1  ;;  %v411_v16 = vld [vmem:[%s234_s20 + $0x20] sm:$0xff]  ;;  %v428_v18 = vmul.f32 %v559_v13, %v413_v14  ;;  %v414_v21 = vld [vmem:[%s234_s20 + $0x38] sm:$0xff]  ;;  %v422_v22 = vmul.f32 %v559_v13, %v407_v15  ;;  %v408_v24 = vld [vmem:[%s234_s20 + $0x8] sm:$0xff]  ;;  %v425_v28 = vmul.f32 %v559_v13, %v410_v20 }
  0x12   : > { %582 = vmatprep.subr.bf16.mxu0 %v628_v2  ;;  %604 = vmatprep.subr.bf16.mxu1 %v628_v2  ;;  %v560_v19 = vld [vmem:[%s744_s4] ss:$0 sm:$0xff]  ;;  %v426_v23 = vmul.f32 %v559_v13, %v411_v16  ;;  %v412_v25 = vld [vmem:[%s234_s20 + $0x28] sm:$0xff]  ;;  %v429_v29 = vmul.f32 %v559_v13, %v414_v21  ;;  %v423_v30 = vmul.f32 %v559_v13, %v408_v24 }
  0x13   : > { %v439_v26 = vadd.f32 %v560_v19, %v424_v17  ;;  %v443_v27 = vadd.f32 %v560_v19, %v428_v18  ;;  %v427_v31 = vmul.f32 %v559_v13, %v412_v25  ;;  %v437_v32 = vadd.f32 %v560_v19, %v422_v22 }
  0x14   : > { %v441_v33 = vadd.f32 %v560_v19, %v426_v23  ;;  %v440_v38 = vadd.f32 %v560_v19, %v425_v28  ;;  %v444_v39 = vadd.f32 %v560_v19, %v429_v29  ;;  %v438_v42 = vadd.f32 %v560_v19, %v423_v30 }
  0x15   : > { %583 = vmatpush3.bf16.msra.mxu0 %v628_v2  ;;  %612 = vmatpush3.bf16.msra.mxu1 %v628_v2  ;;  %v442_v43 = vadd.f32 %v560_v19, %v427_v31 }
  0x16   : > { %584 = vmatprep.subr.bf16.mxu0 %v629_v3  ;;  %605 = vmatprep.subr.bf16.mxu1 %v629_v3 }
  0x19   : > { %585 = vmatpush3.bf16.msra.mxu0 %v629_v3  ;;  %613 = vmatpush3.bf16.msra.mxu1 %v629_v3 }
  0x1a   : > { %586 = vmatprep.subr.bf16.mxu0 %v630_v6  ;;  %606 = vmatprep.subr.bf16.mxu1 %v630_v6 }
  0x1d   : > { %587 = vmatpush3.bf16.msra.mxu0 %v630_v6  ;;  %614 = vmatpush3.bf16.msra.mxu1 %v630_v6 }
  0x1e   : > { %588 = vmatprep.subr.bf16.mxu0 %v631_v7  ;;  %607 = vmatprep.subr.bf16.mxu1 %v631_v7 }
  0x21   : > { %589 = vmatpush3.bf16.msra.mxu0 %v631_v7  ;;  %615 = vmatpush3.bf16.msra.mxu1 %v631_v7 }
  0x22   : > { %590 = vmatprep.subr.bf16.mxu0 %v632_v8  ;;  %608 = vmatprep.subr.bf16.mxu1 %v632_v8 }
  0x25   : > { %591 = vmatpush3.bf16.msra.mxu0 %v632_v8  ;;  %616 = vmatpush3.bf16.msra.mxu1 %v632_v8 }
  0x26   : > { %592 = vmatprep.subr.bf16.mxu0 %v633_v9  ;;  %609 = vmatprep.subr.bf16.mxu1 %v633_v9 }
  0x29   : > { %593 = vmatpush3.bf16.msra.mxu0 %v633_v9  ;;  %617 = vmatpush3.bf16.msra.mxu1 %v633_v9 }
  0x2c   : > { %595 = vmatmul.mubr.bf16.vlgmr.msra.gmra.mxu0 %v636_v10  ;;  %599 = vmatmul.mubr.bf16.vlgmr.msra.gmra.mxu1 %v637_v11 }
  0xec   : > { %v596_v34 = vpop.f32.mrf.mxu0  ;;  %v600_v35 = vpop.f32.mrf.mxu1 }
  0xed   : > { %v447_v36 = vadd.f32 %v596_v34, %v439_v26  ;;  %v451_v37 = vadd.f32 %v600_v35, %v443_v27 }
  0xee   : > { %v376_v40 = vpop.f32.mrf.mxu0  ;;  %v392_v41 = vpop.f32.mrf.mxu1 }
  0xef   : > { %v455_v44 = vmax.f32 %v447_v36, 0.0  ;;  %v459_v45 = vmax.f32 %v451_v37, 0.0  ;;  %v445_v46 = vadd.f32 %v437_v32, %v376_v40  ;;  %v449_v47 = vadd.f32 %v441_v33, %v392_v41 }
  0xf0   : > { %v597_v48 = vpop.f32.mrf.mxu0  ;;  %v601_v49 = vpop.f32.mrf.mxu1 }
  0xf1   : > { %463 = vst [vmem:[%s244_s27 + $0x10] sm:$0xff] %v455_v44  ;;  %467 = vst [vmem:[%s244_s27 + $0x30] sm:$0xff] %v459_v45  ;;  %v453_v50 = vmax.f32 %v445_v46, 0.0  ;;  %v457_v51 = vmax.f32 %v449_v47, 0.0  ;;  %v448_v52 = vadd.f32 %v597_v48, %v440_v38  ;;  %v452_v53 = vadd.f32 %v601_v49, %v444_v39 }
  0xf2   : > { %v379_v54 = vpop.f32.mrf.mxu0  ;;  %v395_v55 = vpop.f32.mrf.mxu1 }
  0xf3   : > { %461 = vst [vmem:[%s244_s27] sm:$0xff] %v453_v50  ;;  %465 = vst [vmem:[%s244_s27 + $0x20] sm:$0xff] %v457_v51  ;;  %v456_v56 = vmax.f32 %v448_v52, 0.0  ;;  %v460_v57 = vmax.f32 %v452_v53, 0.0  ;;  %v446_v58 = vadd.f32 %v438_v42, %v379_v54  ;;  %v450_v59 = vadd.f32 %v442_v43, %v395_v55 }
  0xf5   : > { %464 = vst [vmem:[%s244_s27 + $0x18] sm:$0xff] %v456_v56  ;;  %468 = vst [vmem:[%s244_s27 + $0x38] sm:$0xff] %v460_v57  ;;  %v454_v60 = vmax.f32 %v446_v58, 0.0  ;;  %v458_v61 = vmax.f32 %v450_v59, 0.0 }
  0xf7   : > { %462 = vst [vmem:[%s244_s27 + $0x8] sm:$0xff] %v454_v60  ;;  %466 = vst [vmem:[%s244_s27 + $0x28] sm:$0xff] %v458_v61 }
  0xf8 PF: > { %s15_s18 = sadd.s32 1, %s644_s18  }
  0xf9   : > { %p12_p4 = scmp.ge.s32.totalorder %s15_s18, 4  }
  0xfb   :  { %14 = sbr.rel (!%p12_p4) target bundleno = 1 (0x1), region = 73 }

// kernel: residual_block_forward.4
= control target key start
LH: loop header
LB: loop body
LE: loop exit
PB: predicated region body
PF: predicated region fallthrough
CT: control target
= control target key end

     0   :  { %s2629_s18 = smov 0   ;;  %s3104_s0 = inlined_call_operand.vmem [shape: f32[2,64,128], index: 0, kind: input, shape index: {}]   ;;  %s3105_s1 = inlined_call_operand.vmem [shape: bf16[9,128,128], index: 1, kind: input, shape index: {}]   ;;  %s3106_s2 = inlined_call_operand.vmem [shape: f32[1,128], index: 2, kind: input, shape index: {}]   ;;  %s3107_s3 = inlined_call_operand.vmem [shape: f32[1,128], index: 3, kind: input, shape index: {}]   ;;  %s3108_s4 = inlined_call_operand.vmem [shape: f32[2,64,128], index: 4, kind: output, shape index: {0}]   ;;  %s3109_s5 = inlined_call_operand.vmem [shape: f32[2,2,128], index: 5, kind: output, shape index: {1}]  }
   0x1 LB: > { %s1953_s19 = sadd.s32 4294967295, %s2596_s18   ;;  %p1957_p0 = scmp.ge.s32.totalorder %s2596_s18, 1  ;;  %s2596_s18 = sphi %s2629_s18, %s16_s18  }
   0x2   : > { %p190_p1 = scmp.lt.s32.totalorder %s2596_s18, 3 }
   0x4   : > { %p191_p2 = pnand %p1957_p0, %p190_p1 }
   0x6   : > { %194 = sbr.rel (%p191_p2) target bundleno = 403 (0x193), region = 36 }
   0xb   : > { %v2518_v0 = vld [vmem:[%s3105_s1 + $0x38] sm:$0xff]   ;;  %v2520_v2 = vld [vmem:[%s3105_s1 + $0x30] sm:$0xff]   ;;  %p2648_p3 = scmp.lt.s32.totalorder %s1953_s19, 1  ;;  %v2598_v3 = vmov 0.0   ;;  %v2522_v5 = vld [vmem:[%s3105_s1 + $0x28] sm:$0xff]   ;;  %vm1864_vm0 = vcmask 1040384  }
   0xc   : > { %v2519_v1 = vld [vmem:[%s3105_s1 + $0x78] sm:$0xff]   ;;  %2277 = vmatprep.subr.bf16.mxu0 %v2518_v0  ;;  %283 = vst [vmem:[#allocation2] sm:$0xff] %v2598_v3  ;;  %285 = vst [vmem:[#allocation2 + $0x10] sm:$0xff] %v2598_v3  ;;  %v2521_v4 = vld [vmem:[%s3105_s1 + $0x70] sm:$0xff]  }
   0xd   : > { %286 = vst [vmem:[#allocation2 + $0x18] sm:$0x3] %v2598_v3  ;;  %284 = vst [vmem:[#allocation2 + $0x8] sm:$0x3] %v2598_v3  ;;  %2301 = vmatprep.subr.bf16.mxu1 %v2519_v1  ;;  %2278 = vmatpush3.bf16.msra.mxu0 %v2518_v0  ;;  %v2523_v6 = vld [vmem:[%s3105_s1 + $0x68] sm:$0xff]   ;;  %s3124_s19 = smov (!%p2648_p3, %s1953_s19), 1 }
   0xe   : > { %287 = vst [vmem:[#allocation2 + $0x20] sm:$0xff] %v2598_v3  ;;  %288 = vst [vmem:[#allocation2 + $0x28] sm:$0x3] %v2598_v3  ;;  %2302 = vmatpush3.bf16.msra.mxu1 %v2519_v1  ;;  %2279 = vmatprep.subr.bf16.mxu0 %v2520_v2  ;;  %v2524_v7 = vld [vmem:[%s3105_s1 + $0x20] sm:$0xff]   ;;  %s2167_s12 = sshll.u32 %s3124_s19, 6  ;;  %v2526_v9 = vld [vmem:[%s3105_s1 + $0x18] sm:$0xff]  }
   0xf   : > { %289 = vst [vmem:[#allocation2 + $0x30] sm:$0xff] %v2598_v3  ;;  %290 = vst [vmem:[#allocation2 + $0x38] sm:$0x3] %v2598_v3  ;;  %2303 = vmatprep.subr.bf16.mxu1 %v2521_v4  ;;  %v2525_v8 = vld [vmem:[%s3105_s1 + $0x60] sm:$0xff]   ;;  %v2527_v10 = vld [vmem:[%s3105_s1 + $0x58] sm:$0xff]   ;;  %s2705_s21 = scalar_lea.vmem %s3104_s0, %s2167_s12  ;;  %s3084_s20 = scalar_lea.vmem %s3108_s4, %s2167_s12 }
  0x10   : > { %291 = vst [vmem:[#allocation2 + $0x40] sm:$0xff] %v2598_v3  ;;  %292 = vst [vmem:[#allocation2 + $0x48] sm:$0x3] %v2598_v3  ;;  %v2528_v11 = vld [vmem:[%s3105_s1 + $0x10] sm:$0xff]   ;;  %v237_v12 = vld [vmem:[%s2705_s21] sm:$0xff]  ;;  %s1962_s12 = sshll.u32 %s3124_s19, 1 }
  0x11   : > { %293 = vst [vmem:[#allocation2 + $0x50] sm:$0xff] %v2598_v3  ;;  %294 = vst [vmem:[#allocation2 + $0x58] sm:$0x3] %v2598_v3  ;;  %2280 = vmatpush3.bf16.msra.mxu0 %v2520_v2  ;;  %v2714_v13 = vld [vmem:[%s3106_s2] ss:$0 sm:$0xff]  ;;  %v2529_v15 = vld [vmem:[%s3105_s1 + $0x50] sm:$0xff]   ;;  %s235_s24 = scalar_lea.vmem %s3109_s5, %s1962_s12 }
  0x12   : > { %295 = vst [vmem:[#allocation2 + $0x60] sm:$0xff] %v2598_v3  ;;  %296 = vst [vmem:[#allocation2 + $0x68] sm:$0x3] %v2598_v3  ;;  %2304 = vmatpush3.bf16.msra.mxu1 %v2521_v4  ;;  %2281 = vmatprep.subr.bf16.mxu0 %v2522_v5  ;;  %v2719_v14 = vld [vmem:[%s3107_s3] ss:$0 sm:$0xff]  ;;  %v252_v16 = vmul.f32 %v2714_v13, %v237_v12  ;;  %v238_v17 = vld [vmem:[%s2705_s21 + $0x8] sm:$0xff] }
  0x13   : > { %297 = vst [vmem:[#allocation2 + $0x70] sm:$0xff] %v2598_v3  ;;  %298 = vst [vmem:[#allocation2 + $0x78] sm:$0x3] %v2598_v3  ;;  %2305 = vmatprep.subr.bf16.mxu1 %v2523_v6  ;;  %v239_v18 = vld [vmem:[%s2705_s21 + $0x10] sm:$0xff]  ;;  %v253_v19 = vmul.f32 %v2714_v13, %v238_v17  ;;  %v2530_v21 = vld [vmem:[%s3105_s1 + $0x8] sm:$0xff]  }
  0x14   : > { %299 = vst [vmem:[#allocation2 + $0x80] sm:$0xff] %v2598_v3  ;;  %300 = vst [vmem:[#allocation2 + $0x88] sm:$0x3] %v2598_v3  ;;  %v254_v20 = vmul.f32 %v2714_v13, %v239_v18  ;;  %v267_v22 = vadd.f32 %v2719_v14, %v252_v16  ;;  %v485_v23 = vld [vmem:[#allocation2 + $0x1] sm:$0xff]  ;;  %v2534_v33 = vld [vmem:[%s3105_s1 + $0xb8] sm:$0xff]  }
  0x15   : > { %301 = vst [vmem:[#allocation2 + $0x90] sm:$0xff] %v2598_v3  ;;  %302 = vst [vmem:[#allocation2 + $0x98] sm:$0x3] %v2598_v3  ;;  %2282 = vmatpush3.bf16.msra.mxu0 %v2522_v5  ;;  %v268_v24 = vadd.f32 %v2719_v14, %v253_v19  ;;  %v2531_v26 = vld [vmem:[%s3105_s1 + $0x48] sm:$0xff]   ;;  %v2532_v31 = vld [vmem:[%s3105_s1] sm:$0xff]  }
  0x16   : > { %2306 = vmatpush3.bf16.msra.mxu1 %v2523_v6  ;;  %2283 = vmatprep.subr.bf16.mxu0 %v2524_v7  ;;  %v269_v25 = vadd.f32 %v2719_v14, %v254_v20  ;;  %v2738_v27 = vmax.f32 %v267_v22, 0.0  ;;  %v2533_v32 = vld [vmem:[%s3105_s1 + $0x40] sm:$0xff]   ;;  %v2535_v34 = vld [vmem:[%s3105_s1 + $0xf8] sm:$0xff]   ;;  %v242_v39 = vld [vmem:[%s2705_s21 + $0x28] sm:$0xff] }
  0x17   : > { %2307 = vmatprep.subr.bf16.mxu1 %v2525_v8  ;;  %v2740_v28 = vmax.f32 %v268_v24, 0.0  ;;  %v240_v35 = vld [vmem:[%s2705_s21 + $0x18] sm:$0xff]  ;;  %v241_v36 = vld [vmem:[%s2705_s21 + $0x20] sm:$0xff]  ;;  %v243_v40 = vld [vmem:[%s2705_s21 + $0x30] sm:$0xff]  ;;  %v257_v42 = vmul.f32 %v2714_v13, %v242_v39 }
  0x18   : > { %v2742_v29 = vmax.f32 %v269_v25, 0.0  ;;  %304 = vst [vmem:[#allocation2 + $0x11] sm:$0xff] %v2738_v27  ;;  %v493_v30 = vpack.c.bf16 %v2738_v27, %v485_v23  ;;  %v255_v37 = vmul.f32 %v2714_v13, %v240_v35  ;;  %v256_v38 = vmul.f32 %v2714_v13, %v241_v36  ;;  %v2536_v51 = vld [vmem:[%s3105_s1 + $0xb0] sm:$0xff]   ;;  %v2538_v60 = vld [vmem:[%s3105_s1 + $0xa8] sm:$0xff]   ;;  %v2540_v63 = vld [vmem:[%s3105_s1 + $0xa0] sm:$0xff]  }
  0x19   : > { %2284 = vmatpush3.bf16.msra.mxu0 %v2524_v7  ;;  %305 = vst [vmem:[#allocation2 + $0x21] sm:$0xff] %v2740_v28  ;;  %v258_v43 = vmul.f32 %v2714_v13, %v243_v40  ;;  %v272_v52 = vadd.f32 %v2719_v14, %v257_v42  ;;  %v2537_v54 = vld [vmem:[%s3105_s1 + $0xf0] sm:$0xff]   ;;  %v2539_v62 = vld [vmem:[%s3105_s1 + $0xe8] sm:$0xff]   ;;  %v2541_v4 = vld [vmem:[%s3105_s1 + $0xe0] sm:$0xff]  }
  0x1a   : > { %2308 = vmatpush3.bf16.msra.mxu1 %v2525_v8  ;;  %2285 = vmatprep.subr.bf16.mxu0 %v2526_v9  ;;  %306 = vst [vmem:[#allocation2 + $0x31] sm:$0xff] %v2742_v29  ;;  %v2776_v47 = vpack.c.bf16 %v2742_v29, %v2740_v28  ;;  %v270_v48 = vadd.f32 %v2719_v14, %v255_v37  ;;  %v651_v1 = vld [vmem:[#allocation2 + $0x2] sm:$0xff]  ;;  %v2542_v12 = vld [vmem:[%s3105_s1 + $0x98] sm:$0xff]   ;;  %v2544_v18 = vld [vmem:[%s3105_s1 + $0x90] sm:$0xff]  }
  0x1b   : > { %2309 = vmatprep.subr.bf16.mxu1 %v2527_v10  ;;  %2317 = vmatprep.mubr.bf16.mxu1 %v493_v30  ;;  %v271_v49 = vadd.f32 %v2719_v14, %v256_v38  ;;  %v273_v53 = vadd.f32 %v2719_v14, %v258_v43  ;;  %v2796_v57 = vmax.f32 %v272_v52, 0.0  ;;  %v2543_v16 = vld [vmem:[%s3105_s1 + $0xd8] sm:$0xff]   ;;  %v2545_v20 = vld [vmem:[%s3105_s1 + $0xd0] sm:$0xff]   ;;  %v2546_v22 = vld [vmem:[%s3105_s1 + $0x88] sm:$0xff]  }
  0x1c   : > { %v2791_v55 = vmax.f32 %v270_v48, 0.0  ;;  %v244_v17 = vld [vmem:[%s2705_s21 + $0x38] sm:$0xff]  ;;  %v2549_v24 = vld [vmem:[%s3105_s1 + $0xc0] sm:$0xff]   ;;  %v2552_v36 = vld [vmem:[%s3105_s1 + $0x130] sm:$0xff]  }
  0x1d   : > { %2286 = vmatpush3.bf16.msra.mxu0 %v2526_v9  ;;  %v2793_v56 = vmax.f32 %v271_v49, 0.0  ;;  %v2798_v58 = vmax.f32 %v273_v53, 0.0  ;;  %309 = vst [vmem:[#allocation2 + $0x61] sm:$0xff] %v2796_v57  ;;  %v259_v19 = vmul.f32 %v2714_v13, %v244_v17  ;;  %v2547_v13 = vld [vmem:[%s3105_s1 + $0xc8] sm:$0xff]   ;;  %v2550_v30 = vld [vmem:[%s3105_s1 + $0x138] sm:$0xff]   ;;  %v2553_v37 = vld [vmem:[%s3105_s1 + $0x170] sm:$0xff]  }
  0x1e   : > { %2310 = vmatpush3.bf16.msra.mxu1 %v2527_v10  ;;  %2287 = vmatprep.subr.bf16.mxu0 %v2528_v11  ;;  %307 = vst [vmem:[#allocation2 + $0x41] sm:$0xff] %v2791_v55  ;;  %v2554_v42 = vld [vmem:[%s3105_s1 + $0x128] sm:$0xff]   ;;  %v2556_v48 = vld [vmem:[%s3105_s1 + $0x120] sm:$0xff]   ;;  %v2558_v53 = vld [vmem:[%s3105_s1 + $0x118] sm:$0xff]  }
  0x1f   : > { %2311 = vmatprep.subr.bf16.mxu1 %v2529_v15  ;;  %v2766_v41 = vld [vmem:[#allocation2 + $0x10] sm:$0xff]  ;;  %308 = vst [vmem:[#allocation2 + $0x51] sm:$0xff] %v2793_v56  ;;  %v2805_v59 = vpack.c.bf16 %v2793_v56, %v2791_v55  ;;  %310 = vst [vmem:[#allocation2 + $0x71] sm:$0xff] %v2798_v58  ;;  %v993_v61 = vpack.c.bf16 %v2796_v57, %v2793_v56  ;;  %v2823_v0 = vpack.c.bf16 %v2798_v58, %v2796_v57  ;;  %v2557_v49 = vld [vmem:[%s3105_s1 + $0x160] sm:$0xff]  }
  0x20   : > { %v328_v44 = vpack.c.bf16 %v2766_v41, %v2598_v3  ;;  %v322_v45 = vld [vmem:[#allocation2 + $0x20] sm:$0xff]  ;;  %v2825_v2 = vld [vmem:[#allocation2 + $0x12] sm:$0xff] }
  0x21   : > { %2288 = vmatpush3.bf16.msra.mxu0 %v2528_v11  ;;  %v2772_v46 = vld [vmem:[#allocation2 + $0x30] sm:$0xff]  ;;  %v825_v7 = vpack.c.bf16 %v322_v45, %v2766_v41  ;;  %v659_v11 = vpack.c.bf16 %v2825_v2, %v651_v1  ;;  %v653_v25 = vld [vmem:[#allocation2 + $0x22] sm:$0xff]  ;;  %v2574_v57 = vld [vmem:[%s3105_s1 + $0x198] sm:$0xff]  }
  0x22   : > { %2312 = vmatpush3.bf16.msra.mxu1 %v2529_v15  ;;  %2289 = vmatprep.subr.bf16.mxu0 %v2530_v21  ;;  %v2781_v50 = vpack.c.bf16 %v2772_v46, %v322_v45  ;;  %v1157_v52 = vpack.c.bf16 %v653_v25, %v2825_v2  ;;  %v2565_v1 = vld [vmem:[%s3105_s1 + $0x140] sm:$0xff]   ;;  %v2566_v2 = vld [vmem:[%s3105_s1 + $0x1b8] sm:$0xff]  }
  0x23   : > { %2313 = vmatprep.subr.bf16.mxu1 %v2531_v26  ;;  %2293 = vmatprep.mubr.bf16.mxu0 %v328_v44  ;;  %v2555_v44 = vld [vmem:[%s3105_s1 + $0x168] sm:$0xff]   ;;  %v2572_v17 = vld [vmem:[%s3105_s1 + $0x1a0] sm:$0xff]  }
  0x24   : > { %v2839_v9 = vld [vmem:[#allocation2 + $0x60] sm:$0xff] }
  0x25   : > { %2290 = vmatpush3.bf16.msra.mxu0 %v2530_v21  ;;  %v2830_v5 = vld [vmem:[#allocation2 + $0x40] sm:$0xff]  ;;  %v274_v21 = vadd.f32 %v2719_v14, %v259_v19 }
  0x26   : > { %2314 = vmatpush3.bf16.msra.mxu1 %v2531_v26  ;;  %2291 = vmatprep.subr.bf16.mxu0 %v2532_v31  ;;  %v2832_v6 = vld [vmem:[#allocation2 + $0x50] sm:$0xff]  ;;  %v2548_v14 = vld [vmem:[%s3105_s1 + $0x80] sm:$0xff]   ;;  %v826_v35 = vpack.c.bf16 %v2830_v5, %v2772_v46 }
  0x27   : > { %2315 = vmatprep.subr.bf16.mxu1 %v2533_v32  ;;  %v2837_v8 = vpack.c.bf16 %v2832_v6, %v2830_v5  ;;  %v2841_v10 = vld [vmem:[#allocation2 + $0x70] sm:$0xff]  ;;  %v2869_v23 = vmax.f32 %v274_v21, 0.0  ;;  %v2908_v39 = vld [vmem:[#allocation2 + $0x62] sm:$0xff]  ;;  %v827_v41 = vpack.c.bf16 %v2839_v9, %v2832_v6  ;;  %v992_v5 = vpack.c.bf16 %v2791_v55, %v2742_v29  ;;  %v2582_v21 = vld [vmem:[%s3105_s1 + $0x238] sm:$0xff]  }
  0x28   : > { %v2850_v15 = vpack.c.bf16 %v2841_v10, %v2839_v9  ;;  %v2881_v26 = vld [vmem:[#allocation2 + $0x32] sm:$0xff]  ;;  %v2570_v29 = vld [vmem:[%s3105_s1 + $0x1a8] sm:$0xff]   ;;  %v2573_v56 = vld [vmem:[%s3105_s1 + $0x1e0] sm:$0xff]  }
  0x29   : > { %2292 = vmatpush3.bf16.msra.mxu0 %v2532_v31  ;;  %311 = vst [vmem:[#allocation2 + $0x81] sm:$0xff] %v2869_v23  ;;  %v2551_v31 = vld [vmem:[%s3105_s1 + $0x178] sm:$0xff]   ;;  %v2569_v9 = vld [vmem:[%s3105_s1 + $0x1f0] sm:$0xff]   ;;  %v2580_v19 = vld [vmem:[%s3105_s1 + $0x180] sm:$0xff]  }
  0x2a   : > { %2316 = vmatpush3.bf16.msra.mxu1 %v2533_v32  ;;  %2325 = vmatprep.subr.bf16.mxu0 %v2534_v33  ;;  %v2889_v32 = vld [vmem:[#allocation2 + $0x42] sm:$0xff]  ;;  %v2911_v40 = vld [vmem:[#allocation2 + $0x72] sm:$0xff] }
  0x2b   : > { %2349 = vmatprep.subr.bf16.mxu1 %v2535_v34  ;;  %v2926_v45 = vpack.c.bf16 %v2911_v40, %v2908_v39  ;;  %v1158_v6 = vpack.c.bf16 %v2889_v32, %v2881_v26 }
  0x2c   : > { %2294 = vmatmul.mubr.bf16.vlgmr.msra.gmra.mxu0 %v2781_v50 }
  0x2d   : > { %2318 = vmatmul.mubr.bf16.vlgmr.msra.gmra.mxu1 %v2776_v47  ;;  %2326 = vmatpush3.bf16.msra.mxu0 %v2534_v33  ;;  %v2892_v33 = vpack.c.bf16 %v2881_v26, %v653_v25  ;;  %v1655_v25 = vld [vmem:[#allocation2 + $0x92] sm:$0xff] }
  0x2e   : > { %2350 = vmatpush3.bf16.msra.mxu1 %v2535_v34  ;;  %2327 = vmatprep.subr.bf16.mxu0 %v2536_v51  ;;  %v2894_v34 = vld [vmem:[#allocation2 + $0x52] sm:$0xff] }
  0x2f   : > { %2351 = vmatprep.subr.bf16.mxu1 %v2537_v54  ;;  %2321 = vmatprep.mubr.bf16.mxu1 %v2805_v59  ;;  %v2906_v38 = vpack.c.bf16 %v2894_v34, %v2889_v32 }
  0x30   : > { %2297 = vmatprep.mubr.bf16.mxu0 %v2837_v8  ;;  %v2918_v43 = vld [vmem:[#allocation2 + $0x80] sm:$0xff] }
  0x31   : > { %2328 = vmatpush3.bf16.msra.mxu0 %v2536_v51  ;;  %v828_v46 = vpack.c.bf16 %v2918_v43, %v2841_v10  ;;  %v991_v51 = vpack.c.bf16 %v2740_v28, %v2738_v27  ;;  %v2560_v27 = vld [vmem:[%s3105_s1 + $0x110] sm:$0xff]   ;;  %v1159_v10 = vpack.c.bf16 %v2908_v39, %v2894_v34  ;;  %v2985_v55 = vld [vmem:[#allocation2 + $0x82] sm:$0xff] }
  0x32   : > { %2352 = vmatpush3.bf16.msra.mxu1 %v2537_v54  ;;  %2329 = vmatprep.subr.bf16.mxu0 %v2538_v60  ;;  %v2559_v54 = vld [vmem:[%s3105_s1 + $0x158] sm:$0xff]   ;;  %v2561_v28 = vld [vmem:[%s3105_s1 + $0x150] sm:$0xff]   ;;  %v1659_v26 = vpack.c.bf16 %v1655_v25, %v2985_v55 }
  0x33   : > { %2353 = vmatprep.subr.bf16.mxu1 %v2539_v62 }
  0x34   : > { %2298 = vmatmul.mubr.bf16.gmra.mxu0 %v2850_v15 }
  0x35   : > { %2330 = vmatpush3.bf16.msra.mxu0 %v2538_v60  ;;  %2322 = vmatmul.mubr.bf16.gmra.mxu1 %v2823_v0  ;;  %v2562_v60 = vld [vmem:[%s3105_s1 + $0x108] sm:$0xff]  }
  0x36   : > { %2354 = vmatpush3.bf16.msra.mxu1 %v2539_v62  ;;  %2331 = vmatprep.subr.bf16.mxu0 %v2540_v63  ;;  %v2563_v62 = vld [vmem:[%s3105_s1 + $0x148] sm:$0xff]  }
  0x37   : > { %2355 = vmatprep.subr.bf16.mxu1 %v2541_v4  ;;  %2365 = vmatprep.mubr.bf16.mxu1 %v825_v7  ;;  %v2568_v7 = vld [vmem:[%s3105_s1 + $0x1b0] sm:$0xff]  }
  0x38   : > { %2341 = vmatprep.mubr.bf16.mxu0 %v659_v11  ;;  %v2571_v11 = vld [vmem:[%s3105_s1 + $0x1e8] sm:$0xff]  }
  0x39   : > { %2332 = vmatpush3.bf16.msra.mxu0 %v2540_v63  ;;  %v2564_v63 = vld [vmem:[%s3105_s1 + $0x100] sm:$0xff]  }
  0x3a   : > { %2356 = vmatpush3.bf16.msra.mxu1 %v2541_v4  ;;  %2333 = vmatprep.subr.bf16.mxu0 %v2542_v12  ;;  %v2567_v4 = vld [vmem:[%s3105_s1 + $0x1f8] sm:$0xff]  }
  0x3b   : > { %2357 = vmatprep.subr.bf16.mxu1 %v2543_v16 }
  0x3d   : > { %2334 = vmatpush3.bf16.msra.mxu0 %v2542_v12  ;;  %v994_v12 = vpack.c.bf16 %v2869_v23, %v2798_v58  ;;  %v2575_v58 = vld [vmem:[%s3105_s1 + $0x1d8] sm:$0xff]  }
  0x3e   : > { %2358 = vmatpush3.bf16.msra.mxu1 %v2543_v16  ;;  %2335 = vmatprep.subr.bf16.mxu0 %v2544_v18  ;;  %v1160_v16 = vpack.c.bf16 %v2985_v55, %v2911_v40 }
  0x3f   : > { %2359 = vmatprep.subr.bf16.mxu1 %v2545_v20 }
  0x41   : > { %2336 = vmatpush3.bf16.msra.mxu0 %v2544_v18  ;;  %v2577_v18 = vld [vmem:[%s3105_s1 + $0x1d0] sm:$0xff]  }
  0x42   : > { %2360 = vmatpush3.bf16.msra.mxu1 %v2545_v20  ;;  %2337 = vmatprep.subr.bf16.mxu0 %v2546_v22  ;;  %v2581_v20 = vld [vmem:[%s3105_s1 + $0x1c0] sm:$0xff]  }
  0x43   : > { %2361 = vmatprep.subr.bf16.mxu1 %v2547_v13 }
  0x45   : > { %2338 = vmatpush3.bf16.msra.mxu0 %v2546_v22  ;;  %v2583_v22 = vld [vmem:[%s3105_s1 + $0x230] sm:$0xff]  }
  0x46   : > { %2362 = vmatpush3.bf16.msra.mxu1 %v2547_v13  ;;  %2339 = vmatprep.subr.bf16.mxu0 %v2548_v14  ;;  %v2584_v13 = vld [vmem:[%s3105_s1 + $0x228] sm:$0xff]  }
  0x47   : > { %2363 = vmatprep.subr.bf16.mxu1 %v2549_v24 }
  0x49   : > { %2340 = vmatpush3.bf16.msra.mxu0 %v2548_v14  ;;  %v1489_v14 = vld [vmem:[#allocation2 + $0x91] sm:$0xff] }
  0x4a   : > { %2364 = vmatpush3.bf16.msra.mxu1 %v2549_v24  ;;  %2373 = vmatprep.subr.bf16.mxu0 %v2550_v30  ;;  %v1327_v24 = vpack.c.bf16 %v2598_v3, %v2918_v43  ;;  %v2586_v3 = vld [vmem:[%s3105_s1 + $0x218] sm:$0xff]  }
  0x4b   : > { %2397 = vmatprep.subr.bf16.mxu1 %v2551_v31 }
  0x4c   : > { %2342 = vmatmul.mubr.bf16.vlgmr.msra.gmra.mxu0 %v2892_v33 }
  0x4d   : > { %2366 = vmatmul.mubr.bf16.vlgmr.msra.gmra.mxu1 %v826_v35  ;;  %2374 = vmatpush3.bf16.msra.mxu0 %v2550_v30 }
  0x4e   : > { %2398 = vmatpush3.bf16.msra.mxu1 %v2551_v31  ;;  %2375 = vmatprep.subr.bf16.mxu0 %v2552_v36 }
  0x4f   : > { %2399 = vmatprep.subr.bf16.mxu1 %v2553_v37  ;;  %2345 = vmatprep.mubr.bf16.mxu0 %v2906_v38 }
  0x50   : > { %2369 = vmatprep.mubr.bf16.mxu1 %v827_v41 }
  0x51   : > { %2376 = vmatpush3.bf16.msra.mxu0 %v2552_v36 }
  0x52   : > { %2400 = vmatpush3.bf16.msra.mxu1 %v2553_v37  ;;  %2377 = vmatprep.subr.bf16.mxu0 %v2554_v42 }
  0x53   : > { %2401 = vmatprep.subr.bf16.mxu1 %v2555_v44 }
  0x54   : > { %2346 = vmatmul.mubr.bf16.gmra.mxu0 %v2926_v45 }
  0x55   : > { %2378 = vmatpush3.bf16.msra.mxu0 %v2554_v42  ;;  %2370 = vmatmul.mubr.bf16.gmra.mxu1 %v828_v46 }
  0x56   : > { %2402 = vmatpush3.bf16.msra.mxu1 %v2555_v44  ;;  %2379 = vmatprep.subr.bf16.mxu0 %v2556_v48 }
  0x57   : > { %2403 = vmatprep.subr.bf16.mxu1 %v2557_v49  ;;  %2389 = vmatprep.mubr.bf16.mxu0 %v991_v51 }
  0x58   : > { %2413 = vmatprep.mubr.bf16.mxu1 %v1157_v52 }
  0x59   : > { %2380 = vmatpush3.bf16.msra.mxu0 %v2556_v48 }
  0x5a   : > { %2404 = vmatpush3.bf16.msra.mxu1 %v2557_v49  ;;  %2381 = vmatprep.subr.bf16.mxu0 %v2558_v53 }
  0x5b   : > { %2405 = vmatprep.subr.bf16.mxu1 %v2559_v54 }
  0x5d   : > { %2382 = vmatpush3.bf16.msra.mxu0 %v2558_v53 }
  0x5e   : > { %2406 = vmatpush3.bf16.msra.mxu1 %v2559_v54  ;;  %2383 = vmatprep.subr.bf16.mxu0 %v2560_v27 }
  0x5f   : > { %2407 = vmatprep.subr.bf16.mxu1 %v2561_v28 }
  0x61   : > { %2384 = vmatpush3.bf16.msra.mxu0 %v2560_v27 }
  0x62   : > { %2408 = vmatpush3.bf16.msra.mxu1 %v2561_v28  ;;  %2385 = vmatprep.subr.bf16.mxu0 %v2562_v60 }
  0x63   : > { %2409 = vmatprep.subr.bf16.mxu1 %v2563_v62 }
  0x65   : > { %2386 = vmatpush3.bf16.msra.mxu0 %v2562_v60 }
  0x66   : > { %2410 = vmatpush3.bf16.msra.mxu1 %v2563_v62  ;;  %2387 = vmatprep.subr.bf16.mxu0 %v2564_v63 }
  0x67   : > { %2411 = vmatprep.subr.bf16.mxu1 %v2565_v1 }
  0x69   : > { %2388 = vmatpush3.bf16.msra.mxu0 %v2564_v63 }
  0x6a   : > { %2412 = vmatpush3.bf16.msra.mxu1 %v2565_v1  ;;  %2421 = vmatprep.subr.bf16.mxu0 %v2566_v2 }
  0x6b   : > { %2445 = vmatprep.subr.bf16.mxu1 %v2567_v4 }
  0x6c   : > { %2390 = vmatmul.mubr.bf16.vlgmr.msra.gmra.mxu0 %v992_v5 }
  0x6d   : > { %2414 = vmatmul.mubr.bf16.vlgmr.msra.gmra.mxu1 %v1158_v6  ;;  %2422 = vmatpush3.bf16.msra.mxu0 %v2566_v2 }
  0x6e   : > { %2446 = vmatpush3.bf16.msra.mxu1 %v2567_v4  ;;  %2423 = vmatprep.subr.bf16.mxu0 %v2568_v7 }
  0x6f   : > { %2447 = vmatprep.subr.bf16.mxu1 %v2569_v9  ;;  %2393 = vmatprep.mubr.bf16.mxu0 %v993_v61  ;;  %v2576_v61 = vld [vmem:[%s3105_s1 + $0x190] sm:$0xff]  }
  0x70   : > { %2417 = vmatprep.mubr.bf16.mxu1 %v1159_v10 }
  0x71   : > { %2424 = vmatpush3.bf16.msra.mxu0 %v2568_v7 }
  0x72   : > { %2448 = vmatpush3.bf16.msra.mxu1 %v2569_v9  ;;  %2425 = vmatprep.subr.bf16.mxu0 %v2570_v29 }
  0x73   : > { %2449 = vmatprep.subr.bf16.mxu1 %v2571_v11 }
  0x74   : > { %2394 = vmatmul.mubr.bf16.gmra.mxu0 %v994_v12 }
  0x75   : > { %2426 = vmatpush3.bf16.msra.mxu0 %v2570_v29  ;;  %2418 = vmatmul.mubr.bf16.gmra.mxu1 %v1160_v16 }
  0x76   : > { %2450 = vmatpush3.bf16.msra.mxu1 %v2571_v11  ;;  %2427 = vmatprep.subr.bf16.mxu0 %v2572_v17 }
  0x77   : > { %2451 = vmatprep.subr.bf16.mxu1 %v2573_v56  ;;  %2437 = vmatprep.mubr.bf16.mxu0 %v2781_v50  ;;  %v2578_v50 = vld [vmem:[%s3105_s1 + $0x188] sm:$0xff]  }
  0x78   : > { %2461 = vmatprep.mubr.bf16.mxu1 %v2776_v47  ;;  %v2579_v47 = vld [vmem:[%s3105_s1 + $0x1c8] sm:$0xff]  }
  0x79   : > { %2428 = vmatpush3.bf16.msra.mxu0 %v2572_v17 }
  0x7a   : > { %2452 = vmatpush3.bf16.msra.mxu1 %v2573_v56  ;;  %2429 = vmatprep.subr.bf16.mxu0 %v2574_v57 }
  0x7b   : > { %2453 = vmatprep.subr.bf16.mxu1 %v2575_v58 }
  0x7d   : > { %2430 = vmatpush3.bf16.msra.mxu0 %v2574_v57 }
  0x7e   : > { %2454 = vmatpush3.bf16.msra.mxu1 %v2575_v58  ;;  %2431 = vmatprep.subr.bf16.mxu0 %v2576_v61 }
  0x7f   : > { %2455 = vmatprep.subr.bf16.mxu1 %v2577_v18 }
  0x81   : > { %2432 = vmatpush3.bf16.msra.mxu0 %v2576_v61 }
  0x82   : > { %2456 = vmatpush3.bf16.msra.mxu1 %v2577_v18  ;;  %2433 = vmatprep.subr.bf16.mxu0 %v2578_v50 }
  0x83   : > { %2457 = vmatprep.subr.bf16.mxu1 %v2579_v47 }
  0x85   : > { %2434 = vmatpush3.bf16.msra.mxu0 %v2578_v50 }
  0x86   : > { %2458 = vmatpush3.bf16.msra.mxu1 %v2579_v47  ;;  %2435 = vmatprep.subr.bf16.mxu0 %v2580_v19 }
  0x87   : > { %2459 = vmatprep.subr.bf16.mxu1 %v2581_v20 }
  0x89   : > { %2436 = vmatpush3.bf16.msra.mxu0 %v2580_v19 }
  0x8a   : > { %2460 = vmatpush3.bf16.msra.mxu1 %v2581_v20  ;;  %2469 = vmatprep.subr.bf16.mxu0 %v2582_v21 }
  0x8b   : > { %2493 = vmatprep.subr.bf16.mxu1 %v2582_v21 }
  0x8c   : > { %2438 = vmatmul.mubr.bf16.vlgmr.msra.gmra.mxu0 %v2837_v8  ;;  %v1493_v8 = vpack.c.bf16 %v1489_v14, %v2869_v23  ;;  %v2589_v23 = vld [vmem:[%s3105_s1 + $0x200] sm:$0xff]  }
  0x8d   : > { %2462 = vmatmul.mubr.bf16.vlgmr.msra.gmra.mxu1 %v2805_v59  ;;  %2470 = vmatpush3.bf16.msra.mxu0 %v2582_v21  ;;  %v2585_v59 = vld [vmem:[%s3105_s1 + $0x220] sm:$0xff]  }
  0x8e   : > { %2501 = vmatpush3.bf16.msra.mxu1 %v2582_v21  ;;  %2471 = vmatprep.subr.bf16.mxu0 %v2583_v22 }
  0x8f   : > { %2494 = vmatprep.subr.bf16.mxu1 %v2583_v22  ;;  %2441 = vmatprep.mubr.bf16.mxu0 %v2850_v15  ;;  %v2588_v15 = vld [vmem:[%s3105_s1 + $0x208] sm:$0xff]  }
  0x90   : > { %2465 = vmatprep.mubr.bf16.mxu1 %v2823_v0  ;;  %v2587_v0 = vld [vmem:[%s3105_s1 + $0x210] sm:$0xff]  }
  0x91   : > { %2472 = vmatpush3.bf16.msra.mxu0 %v2583_v22 }
  0x92   : > { %2502 = vmatpush3.bf16.msra.mxu1 %v2583_v22  ;;  %2473 = vmatprep.subr.bf16.mxu0 %v2584_v13 }
  0x93   : > { %2495 = vmatprep.subr.bf16.mxu1 %v2584_v13 }
  0x94   : > { %2442 = vmatmul.mubr.bf16.gmra.mxu0 %v1327_v24 }
  0x95   : > { %2474 = vmatpush3.bf16.msra.mxu0 %v2584_v13  ;;  %2466 = vmatmul.mubr.bf16.gmra.mxu1 %v1493_v8 }
  0x96   : > { %2503 = vmatpush3.bf16.msra.mxu1 %v2584_v13  ;;  %2475 = vmatprep.subr.bf16.mxu0 %v2585_v59 }
  0x97   : > { %2496 = vmatprep.subr.bf16.mxu1 %v2585_v59  ;;  %2485 = vmatprep.mubr.bf16.mxu0 %v2892_v33 }
  0x98   : > { %2489 = vmatprep.mubr.bf16.mxu1 %v2926_v45 }
  0x99   : > { %2476 = vmatpush3.bf16.msra.mxu0 %v2585_v59 }
  0x9a   : > { %2504 = vmatpush3.bf16.msra.mxu1 %v2585_v59  ;;  %2477 = vmatprep.subr.bf16.mxu0 %v2586_v3 }
  0x9b   : > { %2497 = vmatprep.subr.bf16.mxu1 %v2586_v3 }
  0x9d   : > { %2478 = vmatpush3.bf16.msra.mxu0 %v2586_v3 }
  0x9e   : > { %2505 = vmatpush3.bf16.msra.mxu1 %v2586_v3  ;;  %2479 = vmatprep.subr.bf16.mxu0 %v2587_v0 }
  0x9f   : > { %2498 = vmatprep.subr.bf16.mxu1 %v2587_v0 }
  0xa1   : > { %2480 = vmatpush3.bf16.msra.mxu0 %v2587_v0 }
  0xa2   : > { %2506 = vmatpush3.bf16.msra.mxu1 %v2587_v0  ;;  %2481 = vmatprep.subr.bf16.mxu0 %v2588_v15 }
  0xa3   : > { %2499 = vmatprep.subr.bf16.mxu1 %v2588_v15 }
  0xa5   : > { %2482 = vmatpush3.bf16.msra.mxu0 %v2588_v15 }
  0xa6   : > { %2507 = vmatpush3.bf16.msra.mxu1 %v2588_v15  ;;  %2483 = vmatprep.subr.bf16.mxu0 %v2589_v23 }
  0xa7   : > { %2500 = vmatprep.subr.bf16.mxu1 %v2589_v23 }
  0xa9   : > { %2484 = vmatpush3.bf16.msra.mxu0 %v2589_v23 }
  0xaa   : > { %2508 = vmatpush3.bf16.msra.mxu1 %v2589_v23 }
  0xac   : > { %2486 = vmatmul.mubr.bf16.vlgmr.msra.gmra.mxu0 %v2906_v38 }
  0xad   : > { %2490 = vmatmul.mubr.bf16.vlgmr.msra.gmra.mxu1 %v1659_v26 }
  0xec   : > { %v2295_v30 = vpop.f32.mrf.mxu0 }
  0xed   : > { %v2319_v31 = vpop.f32.mrf.mxu1 }
  0xee   : > { %v438_v32 = vpop.f32.mrf.mxu0  ;;  %v637_v14 = vadd.f32 %v2319_v31, %v2295_v30 }
  0xef   : > { %v604_v33 = vpop.f32.mrf.mxu1 }
  0xf0   : > { %v2296_v34 = vpop.f32.mrf.mxu0  ;;  %v635_v59 = vadd.f32 %v604_v33, %v438_v32 }
  0xf1   : > { %v2320_v35 = vpop.f32.mrf.mxu1 }
  0xf2   : > { %v441_v36 = vpop.f32.mrf.mxu0  ;;  %v638_v25 = vadd.f32 %v2320_v35, %v2296_v34 }
  0xf3   : > { %v607_v37 = vpop.f32.mrf.mxu1 }
  0xf4   : > { %v2299_v39 = vpop.f32.mrf.mxu0 }
  0xf5   : > { %v2323_v40 = vpop.f32.mrf.mxu1 }
  0xf6   : > { %v454_v41 = vpop.f32.mrf.mxu0  ;;  %v641_v24 = vadd.f32 %v2323_v40, %v2299_v39 }
  0xf7   : > { %v620_v42 = vpop.f32.mrf.mxu1 }
  0xf8   : > { %v2300_v43 = vpop.f32.mrf.mxu0  ;;  %v639_v15 = vadd.f32 %v620_v42, %v454_v41 }
  0xf9   : > { %v2324_v44 = vpop.f32.mrf.mxu1 }
  0xfa   : > { %v457_v45 = vpop.f32.mrf.mxu0 }
  0xfb   : > { %v623_v46 = vpop.f32.mrf.mxu1 }
  0xfc   : > { %v640_v39 = vadd.f32 %v623_v46, %v457_v45 }
 0x10c   : > { %v2343_v48 = vpop.f32.mrf.mxu0 }
 0x10d   : > { %v2367_v49 = vpop.f32.mrf.mxu1  ;;  %v803_v3 = vadd.f32 %v2343_v48, %v637_v14 }
 0x10e   : > { %v770_v38 = vpop.f32.mrf.mxu0 }
 0x10f   : > { %v936_v51 = vpop.f32.mrf.mxu1  ;;  %v801_v26 = vadd.f32 %v770_v38, %v635_v59 }
 0x110   : > { %v2344_v52 = vpop.f32.mrf.mxu0 }
 0x111   : > { %v2368_v53 = vpop.f32.mrf.mxu1  ;;  %v804_v30 = vadd.f32 %v2344_v52, %v638_v25  ;;  %v967_v33 = vadd.f32 %v936_v51, %v801_v26 }
 0x112   : > { %v773_v54 = vpop.f32.mrf.mxu0 }
 0x113   : > { %v3064_v27 = vpop.f32.mrf.mxu1 }
 0x114   : > { %3111 = vst [vmem:[#allocation4_spill] sm:$0xff] %v3064_v27  ;;  %v2347_v28 = vpop.f32.mrf.mxu0 }
 0x115   : > { %v2371_v60 = vpop.f32.mrf.mxu1  ;;  %v807_v23 = vadd.f32 %v2347_v28, %v641_v24  ;;  %v970_v28 = vadd.f32 %v2368_v53, %v804_v30 }
 0x116   : > { %v786_v62 = vpop.f32.mrf.mxu0 }
 0x117   : > { %v952_v63 = vpop.f32.mrf.mxu1  ;;  %v973_v40 = vadd.f32 %v2371_v60, %v807_v23 }
 0x118   : > { %v2348_v1 = vpop.f32.mrf.mxu0 }
 0x119   : > { %v2372_v2 = vpop.f32.mrf.mxu1 }
 0x11a   : > { %v789_v4 = vpop.f32.mrf.mxu0 }
 0x11b   : > { %v955_v5 = vpop.f32.mrf.mxu1  ;;  %v806_v41 = vadd.f32 %v789_v4, %v640_v39  ;;  %v3117_v38 = vld [vmem:[#allocation4_spill] sm:$0xff] }
 0x11d   : > { %v972_v52 = vadd.f32 %v955_v5, %v806_v41 }
 0x12c   : > { %v2391_v6 = vpop.f32.mrf.mxu0 }
 0x12d   : > { %v2415_v7 = vpop.f32.mrf.mxu1 }
 0x12e   : > { %v1102_v9 = vpop.f32.mrf.mxu0 }
 0x12f   : > { %v1268_v10 = vpop.f32.mrf.mxu1  ;;  %v1133_v34 = vadd.f32 %v1102_v9, %v967_v33 }
 0x130   : > { %v2392_v29 = vpop.f32.mrf.mxu0 }
 0x131   : > { %v3066_v55 = vpop.f32.mrf.mxu1  ;;  %v1299_v51 = vadd.f32 %v1268_v10, %v1133_v34 }
 0x132   : > { %3112 = vst [vmem:[#allocation5_spill] sm:$0xff] %v3066_v55  ;;  %v1105_v11 = vpop.f32.mrf.mxu0  ;;  %v805_v55 = vadd.f32 %v786_v62, %v639_v15 }
 0x133   : > { %v3068_v12 = vpop.f32.mrf.mxu1 }
 0x134   : > { %3113 = vst [vmem:[#allocation6_spill] sm:$0xff] %v3068_v12  ;;  %v2395_v16 = vpop.f32.mrf.mxu0  ;;  %v642_v12 = vadd.f32 %v2324_v44, %v2300_v43 }
 0x135   : > { %v2419_v17 = vpop.f32.mrf.mxu1  ;;  %v1139_v42 = vadd.f32 %v2395_v16, %v973_v40 }
 0x136   : > { %v1118_v56 = vpop.f32.mrf.mxu0  ;;  %v808_v32 = vadd.f32 %v2348_v1, %v642_v12 }
 0x137   : > { %v1284_v57 = vpop.f32.mrf.mxu1  ;;  %v1305_v45 = vadd.f32 %v2419_v17, %v1139_v42 }
 0x138   : > { %v2396_v58 = vpop.f32.mrf.mxu0  ;;  %v974_v43 = vadd.f32 %v2372_v2, %v808_v32 }
 0x139   : > { %v2420_v61 = vpop.f32.mrf.mxu1 }
 0x13a   : > { %v1121_v18 = vpop.f32.mrf.mxu0  ;;  %v1140_v46 = vadd.f32 %v2396_v58, %v974_v43 }
 0x13b   : > { %v1287_v50 = vpop.f32.mrf.mxu1  ;;  %v1138_v4 = vadd.f32 %v1121_v18, %v972_v52 }
 0x13d   : > { %v1304_v58 = vadd.f32 %v1287_v50, %v1138_v4 }
 0x14c   : > { %v2439_v47 = vpop.f32.mrf.mxu0 }
 0x14d   : > { %v2463_v19 = vpop.f32.mrf.mxu1 }
 0x14e   : > { %v1435_v20 = vpop.f32.mrf.mxu0 }
 0x14f   : > { %v3070_v21 = vpop.f32.mrf.mxu1  ;;  %v1466_v2 = vadd.f32 %v1435_v20, %v1299_v51 }
 0x150   : > { %3114 = vst [vmem:[#allocation7_spill] sm:$0xff] %v3070_v21  ;;  %v2440_v22 = vpop.f32.mrf.mxu0  ;;  %v636_v21 = vadd.f32 %v607_v37, %v441_v36 }
 0x151   : > { %v3072_v13 = vpop.f32.mrf.mxu1 }
 0x152   : > { %3115 = vst [vmem:[#allocation8_spill] sm:$0xff] %v3072_v13  ;;  %v1438_v8 = vpop.f32.mrf.mxu0  ;;  %v969_v13 = vadd.f32 %v2367_v49, %v803_v3  ;;  %v802_v14 = vadd.f32 %v773_v54, %v636_v21  ;;  %v1136_v49 = vadd.f32 %v2392_v29, %v970_v28 }
 0x153   : > { %v3074_v0 = vpop.f32.mrf.mxu1 }
 0x154   : > { %3116 = vst [vmem:[#allocation9_spill] sm:$0xff] %v3074_v0  ;;  %v2443_v27 = vpop.f32.mrf.mxu0  ;;  %v1135_v48 = vadd.f32 %v2391_v6, %v969_v13  ;;  %v971_v0 = vadd.f32 %v952_v63, %v805_v55  ;;  %v968_v36 = vadd.f32 %v3117_v38, %v802_v14  ;;  %v3118_v6 = vld [vmem:[#allocation5_spill] sm:$0xff]  ;;  %v1306_v55 = vadd.f32 %v2420_v61, %v1140_v46 }
 0x155   : > { %v2467_v31 = vpop.f32.mrf.mxu1  ;;  %v1472_v53 = vadd.f32 %v2443_v27, %v1305_v45  ;;  %v1302_v9 = vadd.f32 %v3118_v6, %v1136_v49 }
 0x156   : > { %v1451_v24 = vpop.f32.mrf.mxu0  ;;  %v1137_v44 = vadd.f32 %v1118_v56, %v971_v0  ;;  %v1301_v37 = vadd.f32 %v2415_v7, %v1135_v48  ;;  %v1134_v54 = vadd.f32 %v1105_v11, %v968_v36  ;;  %v3119_v7 = vld [vmem:[#allocation6_spill] sm:$0xff] }
 0x157   : > { %v1617_v35 = vpop.f32.mrf.mxu1  ;;  %v1469_v17 = vadd.f32 %v2440_v22, %v1302_v9  ;;  %v1638_v10 = vadd.f32 %v2467_v31, %v1472_v53 }
 0x158   : > { %v2444_v60 = vpop.f32.mrf.mxu0  ;;  %v1468_v62 = vadd.f32 %v2439_v47, %v1301_v37  ;;  %v1303_v1 = vadd.f32 %v1284_v57, %v1137_v44  ;;  %v1300_v29 = vadd.f32 %v3119_v7, %v1134_v54  ;;  %v3120_v57 = vld [vmem:[#allocation7_spill] sm:$0xff] }
 0x159   : > { %v2468_v63 = vpop.f32.mrf.mxu1  ;;  %v1473_v11 = vadd.f32 %v2444_v60, %v1306_v55  ;;  %v1632_v61 = vadd.f32 %v3120_v57, %v1466_v2  ;;  %v3121_v13 = vld [vmem:[#allocation8_spill] sm:$0xff] }
 0x15a   : > { %v1470_v12 = vadd.f32 %v1451_v24, %v1303_v1  ;;  %v1454_v16 = vpop.f32.mrf.mxu0  ;;  %v1634_v5 = vadd.f32 %v2463_v19, %v1468_v62  ;;  %v1467_v18 = vadd.f32 %v1438_v8, %v1300_v29  ;;  %v1635_v59 = vadd.f32 %v3121_v13, %v1469_v17 }
 0x15b   : > { %v1620_v56 = vpop.f32.mrf.mxu1  ;;  %v1471_v21 = vadd.f32 %v1454_v16, %v1304_v58  ;;  %v1639_v15 = vadd.f32 %v2468_v63, %v1473_v11  ;;  %v3122_v25 = vld [vmem:[#allocation9_spill] sm:$0xff] }
 0x15c   : > { %v1636_v20 = vadd.f32 %v1617_v35, %v1470_v12  ;;  %v1633_v26 = vadd.f32 %v3122_v25, %v1467_v18 }
 0x15d   : > { %v1637_v39 = vadd.f32 %v1620_v56, %v1471_v21 }
 0x16c   : > { %v2487_v27 = vpop.f32.mrf.mxu0 }
 0x16d   : > { %v1800_v47 = vadd.f32 %v2487_v27, %v1634_v5  ;;  %v2491_v19 = vpop.f32.mrf.mxu1 }
 0x16e   : > { %v1804_v50 = vadd.f32 %v2491_v19, %v1638_v10  ;;  %v1767_v22 = vpop.f32.mrf.mxu0 }
 0x16f   : > { %1824 = vst [vmem:[%s3084_s20 + $0x10] sm:$0xff] %v1800_v47  ;;  %v1798_v3 = vadd.f32 %v1767_v22, %v1632_v61  ;;  %v1783_v0 = vpop.f32.mrf.mxu1  ;;  %v1845_v28 = vmul.f32 %v1800_v47, %v1800_v47 }
 0x170   : > { %1828 = vst [vmem:[%s3084_s20 + $0x30] sm:$0xff] %v1804_v50  ;;  %v1802_v23 = vadd.f32 %v1783_v0, %v1636_v20  ;;  %v2488_v8 = vpop.f32.mrf.mxu0  ;;  %v1849_v60 = vmul.f32 %v1804_v50, %v1804_v50 }
 0x171   : > { %1822 = vst [vmem:[%s3084_s20] sm:$0xff] %v1798_v3  ;;  %v1801_v30 = vadd.f32 %v2488_v8, %v1635_v59  ;;  %v2492_v31 = vpop.f32.mrf.mxu1  ;;  %v1843_v41 = vmul.f32 %v1798_v3, %v1798_v3 }
 0x172   : > { %1826 = vst [vmem:[%s3084_s20 + $0x20] sm:$0xff] %v1802_v23  ;;  %v1805_v40 = vadd.f32 %v2492_v31, %v1639_v15  ;;  %v1770_v32 = vpop.f32.mrf.mxu0  ;;  %v1847_v36 = vmul.f32 %v1802_v23, %v1802_v23 }
 0x173   : > { %1825 = vst [vmem:[%s3084_s20 + $0x18] sm:$0xff] %v1801_v30  ;;  %v1799_v33 = vadd.f32 %v1770_v32, %v1633_v26  ;;  %v1786_v14 = vpop.f32.mrf.mxu1  ;;  %v1846_v43 = vmul.f32 %v1801_v30, %v1801_v30 }
 0x174   : > { %1829 = vst [vmem:[%s3084_s20 + $0x38] sm:$0xff] %v1805_v40  ;;  %v1803_v48 = vadd.f32 %v1786_v14, %v1637_v39  ;;  %v1850_v62 = vmul.f32 %v1805_v40, %v1805_v40 }
 0x175   : > { %1823 = vst [vmem:[%s3084_s20 + $0x8] sm:$0xff] %v1799_v33  ;;  %v1830_v42 = vadd.f32 %v1799_v33, %v1798_v3  ;;  %v1844_v24 = vmul.f32 %v1799_v33, %v1799_v33 }
 0x176   : > { %1827 = vst [vmem:[%s3084_s20 + $0x28] sm:$0xff] %v1803_v48  ;;  %v1848_v45 = vmul.f32 %v1803_v48, %v1803_v48 }
 0x177   : > { %v1831_v34 = vadd.f32 %v1830_v42, %v1800_v47  ;;  %v1851_v35 = vadd.f32 %v1844_v24, %v1843_v41 }
 0x179   : > { %v1852_v44 = vadd.f32 %v1851_v35, %v1845_v28  ;;  %v1832_v38 = vadd.f32 %v1831_v34, %v1801_v30 }
 0x17b   : > { %v1833_v37 = vadd.f32 %v1832_v38, %v1802_v23  ;;  %v1853_v49 = vadd.f32 %v1852_v44, %v1846_v43 }
 0x17d   : > { %v1834_v52 = vadd.f32 %v1833_v37, %v1803_v48  ;;  %v1854_v46 = vadd.f32 %v1853_v49, %v1847_v36 }
 0x17f   : > { %v1835_v51 = vadd.f32 %v1834_v52, %v1804_v50  ;;  %v1855_v54 = vadd.f32 %v1854_v46, %v1848_v45 }
 0x181   : > { %v1836_v63 = vadd.f32 %v1835_v51, %v1805_v40  ;;  %v1856_v1 = vadd.f32 %v1855_v54, %v1849_v60 }
 0x183   : > { %v1837_v4 = vrot.slane %v1836_v63, 4  ;;  %v1857_v53 = vadd.f32 %v1856_v1, %v1850_v62 }
 0x185   : > { %v1838_v6 = vadd.f32 %v1837_v4, %v1836_v63  ;;  %v1858_v9 = vrot.slane %v1857_v53, 4 }
 0x187   : > { %v1839_v2 = vrot.slane %v1838_v6, 2  ;;  %v1859_v55 = vadd.f32 %v1858_v9, %v1857_v53 }
 0x189   : > { %v1840_v12 = vadd.f32 %v1839_v2, %v1838_v6  ;;  %v1860_v16 = vrot.slane %v1859_v55, 2 }
 0x18b   : > { %v1841_v7 = vrot.slane %v1840_v12, 1  ;;  %v1861_v29 = vadd.f32 %v1860_v16, %v1859_v55 }
 0x18d   : > { %v1862_v5 = vrot.slane %v1861_v29, 1  ;;  %v1842_v17 = vadd.f32 %v1841_v7, %v1840_v12 }
 0x18f   : > { %v1863_v56 = vadd.f32 %v1862_v5, %v1861_v29 }
 0x191   : > { %v1865_v58 = vsel %vm1864_vm0, %v1842_v17, %v1863_v56 }
 0x192   : > { %1866 = vst [vmem:[%s235_s24] sm:$0x3] %v1865_v58 }
 0x193 PF: > { %s16_s18 = sadd.s32 1, %s2596_s18  }
 0x194   : > { %p13_p4 = scmp.ge.s32.totalorder %s16_s18, 4  }
 0x196   :  { %15 = sbr.rel (!%p13_p4) target bundleno = 1 (0x1), region = 88 }

// kernel: residual_block_forward.3
= control target key start
LH: loop header
LB: loop body
LE: loop exit
PB: predicated region body
PF: predicated region fallthrough
CT: control target
= control target key end

     0   :  { %s3140_s12 = smov 0   ;;  %s3543_s0 = inlined_call_operand.vmem [shape: bf16[2,36,9,128], index: 0, kind: input, shape index: {}]   ;;  %s3544_s1 = inlined_call_operand.vmem [shape: bf16[9,128,128], index: 1, kind: input, shape index: {}]   ;;  %s3545_s2 = inlined_call_operand.vmem [shape: f32[2,64,128], index: 2, kind: output, shape index: {0}]   ;;  %s3546_s3 = inlined_call_operand.vmem [shape: f32[2,2,128], index: 3, kind: output, shape index: {1}]  }
   0x1 LB: > { %s2347_s13 = sadd.s32 4294967295, %s3118_s12   ;;  %p2351_p0 = scmp.ge.s32.totalorder %s3118_s12, 1  ;;  %s3118_s12 = sphi %s3140_s12, %s14_s12  }
   0x2   : > { %p140_p1 = scmp.lt.s32.totalorder %s3118_s12, 3 }
   0x4   : > { %p141_p2 = pnand %p2351_p0, %p140_p1 }
   0x6   : > { %144 = sbr.rel (%p141_p2) target bundleno = 403 (0x193), region = 28 }
   0xb   : > { %v3016_v0 = vld [vmem:[%s3544_s1 + $0x38] sm:$0xff]   ;;  %p168_p3 = scmp.lt.s32.totalorder %s2347_s13, 1  ;;  %v3018_v2 = vld [vmem:[%s3544_s1 + $0x30] sm:$0xff]   ;;  %v3020_v4 = vld [vmem:[%s3544_s1 + $0x28] sm:$0xff]   ;;  %vm579_vm0 = vsmask.f32 3328 }
   0xc   : > { %v3017_v1 = vld [vmem:[%s3544_s1 + $0x78] sm:$0xff]   ;;  %2775 = vmatprep.subr.bf16.mxu0 %v3016_v0  ;;  %v3019_v3 = vld [vmem:[%s3544_s1 + $0x70] sm:$0xff]   ;;  %v3021_v5 = vld [vmem:[%s3544_s1 + $0x68] sm:$0xff]   ;;  %vm580_vm1 = vsmask.f32 7440  ;;  %vm2258_vm3 = vcmask 1040384  }
   0xd   : > { %2799 = vmatprep.subr.bf16.mxu1 %v3017_v1  ;;  %2776 = vmatpush3.bf16.msra.mxu0 %v3016_v0  ;;  %s3564_s13 = smov (!%p168_p3, %s2347_s13), 1  ;;  %v3022_v6 = vld [vmem:[%s3544_s1 + $0x20] sm:$0xff]   ;;  %v3024_v8 = vld [vmem:[%s3544_s1 + $0x18] sm:$0xff]   ;;  %v3026_v10 = vld [vmem:[%s3544_s1 + $0x10] sm:$0xff]  }
   0xe   : > { %2800 = vmatpush3.bf16.msra.mxu1 %v3017_v1  ;;  %2777 = vmatprep.subr.bf16.mxu0 %v3018_v2  ;;  %v3023_v7 = vld [vmem:[%s3544_s1 + $0x60] sm:$0xff]   ;;  %s3007_s30 = smul.u32 288, %s3564_s13  ;;  %v3025_v9 = vld [vmem:[%s3544_s1 + $0x58] sm:$0xff]   ;;  %v3027_v11 = vld [vmem:[%s3544_s1 + $0x50] sm:$0xff]   ;;  %s2666_s16 = sshll.u32 %s3564_s13, 6 }
   0xf   : > { %2801 = vmatprep.subr.bf16.mxu1 %v3019_v3  ;;  %v3028_v14 = vld [vmem:[%s3544_s1 + $0x8] sm:$0xff]   ;;  %v3030_v16 = vld [vmem:[%s3544_s1] sm:$0xff]   ;;  %v3036_v19 = vld [vmem:[%s3544_s1 + $0xb8] sm:$0xff]   ;;  %s3523_s19 = scalar_lea.vmem %s3545_s2, %s2666_s16  ;;  %s2355_s20 = sshll.u32 %s3564_s13, 1 }
  0x10   : > { %s3184_s10 = scalar_lea.vmem %s3543_s0, %s3007_s30  ;;  %v3029_v15 = vld [vmem:[%s3544_s1 + $0x48] sm:$0xff]   ;;  %v3031_v17 = vld [vmem:[%s3544_s1 + $0x40] sm:$0xff]   ;;  %v3037_v20 = vld [vmem:[%s3544_s1 + $0xf8] sm:$0xff]   ;;  %s181_s23 = scalar_lea.vmem %s3546_s3, %s2355_s20 }
  0x11   : > { %2778 = vmatpush3.bf16.msra.mxu0 %v3018_v2  ;;  %v3032_v12 = vld [vmem:[%s3184_s10] ss:$8 sps:$4 sm:$0xff]   ;;  %v3034_v18 = vld [vmem:[%s3184_s10 + $0x10] ss:$8 sps:$4 sm:$0xff]   ;;  %v564_v33 = vld [vmem:[%s3184_s10 + $0x4] sm:$0x1] }
  0x12   : > { %2802 = vmatpush3.bf16.msra.mxu1 %v3019_v3  ;;  %2779 = vmatprep.subr.bf16.mxu0 %v3020_v4  ;;  %v3033_v13 = vld [vmem:[%s3184_s10 + $0x48] ss:$8 sps:$4 sm:$0xff]   ;;  %v3035_v21 = vld [vmem:[%s3184_s10 + $0x58] ss:$8 sps:$4 sm:$0xff]   ;;  %v566_v35 = vld [vmem:[%s3184_s10 + $0xc] sm:$0x1] }
  0x13   : > { %2803 = vmatprep.subr.bf16.mxu1 %v3021_v5  ;;  %2791 = vmatprep.mubr.bf16.mxu0 %v3032_v12  ;;  %v3038_v22 = vld [vmem:[%s3544_s1 + $0xb0] sm:$0xff]   ;;  %v3046_v24 = vld [vmem:[%s3184_s10 + $0x20] ss:$8 sps:$4 sm:$0xff]   ;;  %v3044_v36 = vld [vmem:[%s3544_s1 + $0x98] sm:$0xff]   ;;  %v592_v39 = vshll.u32 %v564_v33, 16  ;;  %v606_v44 = vshll.u32 %v566_v35, 16 }
  0x14   : > { %2815 = vmatprep.mubr.bf16.mxu1 %v3033_v13  ;;  %v3039_v23 = vld [vmem:[%s3544_s1 + $0xf0] sm:$0xff]   ;;  %v3040_v26 = vld [vmem:[%s3544_s1 + $0xa8] sm:$0xff]   ;;  %v3042_v28 = vld [vmem:[%s3544_s1 + $0xa0] sm:$0xff]  }
  0x15   : > { %2780 = vmatpush3.bf16.msra.mxu0 %v3020_v4  ;;  %v3047_v25 = vld [vmem:[%s3184_s10 + $0x68] ss:$8 sps:$4 sm:$0xff]   ;;  %v3043_v30 = vld [vmem:[%s3544_s1 + $0xe0] sm:$0xff]   ;;  %v3045_v42 = vld [vmem:[%s3544_s1 + $0xd8] sm:$0xff]   ;;  %v594_v49 = vrot.slane %v592_v39, 5  ;;  %v608_v53 = vrot.slane %v606_v44, 5 }
  0x16   : > { %2804 = vmatpush3.bf16.msra.mxu1 %v3021_v5  ;;  %2781 = vmatprep.subr.bf16.mxu0 %v3022_v6  ;;  %v3041_v27 = vld [vmem:[%s3544_s1 + $0xe8] sm:$0xff]   ;;  %v3048_v29 = vld [vmem:[%s3184_s10 + $0x30] ss:$8 sps:$4 sm:$0xff]   ;;  %v563_v32 = vld [vmem:[%s3184_s10] sm:$0xf] }
  0x17   : > { %2805 = vmatprep.subr.bf16.mxu1 %v3023_v7  ;;  %v3049_v31 = vld [vmem:[%s3184_s10 + $0x78] ss:$8 sps:$4 sm:$0xff]   ;;  %v565_v34 = vld [vmem:[%s3184_s10 + $0x8] sm:$0xf]  ;;  %v583_v37 = vshrl.u32 %v563_v32, 16  ;;  %v586_v38 = vshll.u32 %v563_v32, 16  ;;  %vm3255_vm2 = vmor %vm579_vm0, %vm580_vm1 }
  0x18   : > { %v597_v40 = vshrl.u32 %v565_v34, 16  ;;  %v567_v41 = vld [vmem:[%s3184_s10 + $0x10] sm:$0xf]  ;;  %v600_v43 = vshll.u32 %v565_v34, 16  ;;  %v568_v45 = vld [vmem:[%s3184_s10 + $0x14] sm:$0x1] }
  0x19   : > { %2782 = vmatpush3.bf16.msra.mxu0 %v3022_v6  ;;  %v569_v46 = vld [vmem:[%s3184_s10 + $0x18] sm:$0xf]  ;;  %v585_v47 = vrot.slane %v583_v37, 4  ;;  %v588_v48 = vrot.slane %v586_v38, 5  ;;  %v570_v51 = vld [vmem:[%s3184_s10 + $0x1c] sm:$0x1] }
  0x1a   : > { %2806 = vmatpush3.bf16.msra.mxu1 %v3023_v7  ;;  %2783 = vmatprep.subr.bf16.mxu0 %v3024_v8  ;;  %v599_v50 = vrot.slane %v597_v40, 4  ;;  %v602_v52 = vrot.slane %v600_v43, 5  ;;  %v611_v54 = vshrl.u32 %v567_v41, 16  ;;  %v614_v55 = vshll.u32 %v567_v41, 16  ;;  %v3050_v60 = vld [vmem:[%s3544_s1 + $0x90] sm:$0xff]   ;;  %v3052_v12 = vld [vmem:[%s3544_s1 + $0x88] sm:$0xff]  }
  0x1b   : > { %2807 = vmatprep.subr.bf16.mxu1 %v3025_v9  ;;  %v589_v56 = vor.u32 %v588_v48, %v585_v47  ;;  %v620_v57 = vshll.u32 %v568_v45, 16  ;;  %v625_v58 = vshrl.u32 %v569_v46, 16  ;;  %v628_v59 = vshll.u32 %v569_v46, 16  ;;  %v3056_v2 = vld [vmem:[%s3184_s10 + $0x90] ss:$8 sps:$4 sm:$0xff]  }
  0x1c   : > { %v603_v62 = vor.u32 %v602_v52, %v599_v50  ;;  %v613_v63 = vrot.slane %v611_v54, 4  ;;  %v616_v0 = vrot.slane %v614_v55, 5  ;;  %v634_v1 = vshll.u32 %v570_v51, 16  ;;  %v3051_v3 = vld [vmem:[%s3544_s1 + $0xd0] sm:$0xff]   ;;  %v577_v41 = vld [vmem:[%s3184_s10 + $0x38] sm:$0xf] }
  0x1d   : > { %2784 = vmatpush3.bf16.msra.mxu0 %v3024_v8  ;;  %v590_v4 = vrot.slane %v589_v56, 4  ;;  %v627_v5 = vrot.slane %v625_v58, 4  ;;  %v630_v6 = vrot.slane %v628_v59, 5  ;;  %v575_v32 = vld [vmem:[%s3184_s10 + $0x30] sm:$0xf]  ;;  %v681_v50 = vshrl.u32 %v577_v41, 16 }
  0x1e   : > { %2808 = vmatpush3.bf16.msra.mxu1 %v3025_v9  ;;  %2785 = vmatprep.subr.bf16.mxu0 %v3026_v10  ;;  %v604_v7 = vrot.slane %v603_v62, 4  ;;  %v617_v8 = vor.u32 %v616_v0, %v613_v63  ;;  %v3263_v9 = vrot.slane %v620_v57, 5  ;;  %v667_v37 = vshrl.u32 %v575_v32, 16  ;;  %v578_v45 = vld [vmem:[%s3184_s10 + $0x3c] sm:$0x1] }
  0x1f   : > { %2809 = vmatprep.subr.bf16.mxu1 %v3027_v11  ;;  %v684_v51 = vshll.u32 %v577_v41, 16  ;;  %v3057_v52 = vld [vmem:[%s3544_s1 + $0x138] sm:$0xff]   ;;  %v690_v54 = vshll.u32 %v578_v45, 16  ;;  %v3059_v56 = vld [vmem:[%s3184_s10 + $0xa0] ss:$8 sps:$4 sm:$0xff]   ;;  %v683_v59 = vrot.slane %v681_v50, 4 }
  0x20   : > { %v609_v13 = vsel %vm3255_vm2, %v604_v7, %v608_v53  ;;  %v669_v46 = vrot.slane %v667_v37, 4  ;;  %v3058_v55 = vld [vmem:[%s3544_s1 + $0x178] sm:$0xff]   ;;  %v3061_v7 = vld [vmem:[%s3544_s1 + $0x170] sm:$0xff]   ;;  %v2509_v41 = vld [vmem:[%s3184_s10 + $0xa4] sm:$0x1] }
  0x21   : > { %2786 = vmatpush3.bf16.msra.mxu0 %v3026_v10  ;;  %v595_v10 = vsel %vm3255_vm2, %v590_v4, %v594_v49 }
  0x22   : > { %2810 = vmatpush3.bf16.msra.mxu1 %v3027_v11  ;;  %2787 = vmatprep.subr.bf16.mxu0 %v3028_v14  ;;  %v631_v11 = vor.u32 %v630_v6, %v627_v5  ;;  %v692_v5 = vrot.slane %v690_v54, 5  ;;  %v3064_v6 = vld [vmem:[%s3184_s10 + $0xb0] ss:$8 sps:$4 sm:$0xff]  }
  0x23   : > { %2811 = vmatprep.subr.bf16.mxu1 %v3029_v15 }
  0x25   : > { %2788 = vmatpush3.bf16.msra.mxu0 %v3028_v14  ;;  %v618_v14 = vrot.slane %v617_v8, 4 }
  0x26   : > { %2812 = vmatpush3.bf16.msra.mxu1 %v3029_v15  ;;  %2789 = vmatprep.subr.bf16.mxu0 %v3030_v16  ;;  %v636_v15 = vrot.slane %v634_v1, 5  ;;  %v3060_v1 = vld [vmem:[%s3544_s1 + $0x130] sm:$0xff]  }
  0x27   : > { %2813 = vmatprep.subr.bf16.mxu1 %v3031_v17 }
  0x29   : > { %2790 = vmatpush3.bf16.msra.mxu0 %v3030_v16  ;;  %v3053_v16 = vld [vmem:[%s3544_s1 + $0xc8] sm:$0xff]  }
  0x2a   : > { %2814 = vmatpush3.bf16.msra.mxu1 %v3031_v17  ;;  %2823 = vmatprep.subr.bf16.mxu0 %v3036_v19  ;;  %v2420_v17 = vcombine.low %v595_v10, %v609_v13  ;;  %v3062_v10 = vld [vmem:[%s3544_s1 + $0x128] sm:$0xff]  }
  0x2b   : > { %2847 = vmatprep.subr.bf16.mxu1 %v3037_v20  ;;  %v3063_v13 = vld [vmem:[%s3544_s1 + $0x168] sm:$0xff]  }
  0x2c   : > { %2792 = vmatmul.mubr.bf16.vlgmr.msra.gmra.mxu0 %v3034_v18  ;;  %v632_v18 = vrot.slane %v631_v11, 4 }
  0x2d   : > { %2816 = vmatmul.mubr.bf16.vlgmr.msra.gmra.mxu1 %v3035_v21  ;;  %2824 = vmatpush3.bf16.msra.mxu0 %v3036_v19  ;;  %v571_v19 = vld [vmem:[%s3184_s10 + $0x20] sm:$0xf] }
  0x2e   : > { %2848 = vmatpush3.bf16.msra.mxu1 %v3037_v20  ;;  %2825 = vmatprep.subr.bf16.mxu0 %v3038_v22  ;;  %v572_v20 = vld [vmem:[%s3184_s10 + $0x24] sm:$0x1] }
  0x2f   : > { %2849 = vmatprep.subr.bf16.mxu1 %v3039_v23  ;;  %2795 = vmatprep.mubr.bf16.mxu0 %v3046_v24  ;;  %v3054_v21 = vld [vmem:[%s3544_s1 + $0x80] sm:$0xff]   ;;  %v574_v24 = vld [vmem:[%s3184_s10 + $0x2c] sm:$0x1] }
  0x30   : > { %2819 = vmatprep.mubr.bf16.mxu1 %v3047_v25  ;;  %v639_v25 = vshrl.u32 %v571_v19, 16  ;;  %v662_v35 = vshll.u32 %v574_v24, 16  ;;  %v2507_v24 = vld [vmem:[%s3184_s10 + $0x9c] sm:$0x1] }
  0x31   : > { %2826 = vmatpush3.bf16.msra.mxu0 %v3038_v22  ;;  %v623_v22 = vsel %vm3255_vm2, %v618_v14, %v3263_v9 }
  0x32   : > { %2850 = vmatpush3.bf16.msra.mxu1 %v3039_v23  ;;  %2827 = vmatprep.subr.bf16.mxu0 %v3040_v26  ;;  %v573_v23 = vld [vmem:[%s3184_s10 + $0x28] sm:$0xf]  ;;  %v641_v33 = vrot.slane %v639_v25, 4  ;;  %v664_v44 = vrot.slane %v662_v35, 5 }
  0x33   : > { %2851 = vmatprep.subr.bf16.mxu1 %v3041_v27 }
  0x34   : > { %2796 = vmatmul.mubr.bf16.gmra.mxu0 %v3048_v29  ;;  %v648_v29 = vshll.u32 %v572_v20, 16  ;;  %v3069_v20 = vld [vmem:[%s3544_s1 + $0x158] sm:$0xff]  }
  0x35   : > { %2828 = vmatpush3.bf16.msra.mxu0 %v3040_v26  ;;  %2820 = vmatmul.mubr.bf16.gmra.mxu1 %v3049_v31  ;;  %v642_v26 = vshll.u32 %v571_v19, 16  ;;  %v656_v31 = vshll.u32 %v573_v23, 16  ;;  %v3076_v19 = vld [vmem:[%s3184_s10 + $0xd8] ss:$8 sps:$4 sm:$0xff]  }
  0x36   : > { %2852 = vmatpush3.bf16.msra.mxu1 %v3041_v27  ;;  %2829 = vmatprep.subr.bf16.mxu0 %v3042_v28  ;;  %v3055_v27 = vld [vmem:[%s3544_s1 + $0xc0] sm:$0xff]   ;;  %v650_v38 = vrot.slane %v648_v29, 5 }
  0x37   : > { %2853 = vmatprep.subr.bf16.mxu1 %v3043_v30  ;;  %2863 = vmatprep.mubr.bf16.mxu1 %v3056_v2  ;;  %v644_v34 = vrot.slane %v642_v26, 5  ;;  %v658_v40 = vrot.slane %v656_v31, 5  ;;  %v3070_v31 = vld [vmem:[%s3544_s1 + $0x110] sm:$0xff]  }
  0x38   : > { %2839 = vmatprep.mubr.bf16.mxu0 %v2420_v17  ;;  %v3067_v17 = vld [vmem:[%s3544_s1 + $0x160] sm:$0xff]  }
  0x39   : > { %2830 = vmatpush3.bf16.msra.mxu0 %v3042_v28  ;;  %v637_v28 = vsel %vm3255_vm2, %v632_v18, %v636_v15  ;;  %v645_v43 = vor.u32 %v644_v34, %v641_v33  ;;  %v3065_v15 = vld [vmem:[%s3184_s10 + $0xc0] ss:$8 sps:$4 sm:$0xff]   ;;  %v3068_v18 = vld [vmem:[%s3544_s1 + $0x118] sm:$0xff]   ;;  %v3071_v34 = vld [vmem:[%s3544_s1 + $0x150] sm:$0xff]  }
  0x3a   : > { %2854 = vmatpush3.bf16.msra.mxu1 %v3043_v30  ;;  %2831 = vmatprep.subr.bf16.mxu0 %v3044_v36  ;;  %v653_v30 = vshrl.u32 %v573_v23, 16  ;;  %v2421_v62 = vcombine.low %v623_v22, %v637_v28  ;;  %v2505_v22 = vld [vmem:[%s3184_s10 + $0x94] sm:$0x1]  ;;  %v2506_v23 = vld [vmem:[%s3184_s10 + $0x98] sm:$0xf] }
  0x3b   : > { %2855 = vmatprep.subr.bf16.mxu1 %v3045_v42  ;;  %v646_v53 = vrot.slane %v645_v43, 4  ;;  %v1269_v28 = vshrl.u32 %v2506_v23, 16  ;;  %v1272_v29 = vshll.u32 %v2506_v23, 16  ;;  %v2510_v43 = vld [vmem:[%s3184_s10 + $0xa8] sm:$0xf] }
  0x3c   : > { %v655_v39 = vrot.slane %v653_v30, 4  ;;  %v1278_v30 = vshll.u32 %v2507_v24, 16  ;;  %v1300_v50 = vshll.u32 %v2510_v43, 16  ;;  %v2517_v24 = vld [vmem:[%s3184_s10 + $0xc4] sm:$0x1] }
  0x3d   : > { %2832 = vmatpush3.bf16.msra.mxu0 %v3044_v36  ;;  %v576_v36 = vld [vmem:[%s3184_s10 + $0x34] sm:$0x1]  ;;  %v651_v63 = vsel %vm3255_vm2, %v646_v53, %v650_v38  ;;  %v1274_v37 = vrot.slane %v1272_v29, 5  ;;  %v2518_v29 = vld [vmem:[%s3184_s10 + $0xc8] sm:$0xf] }
  0x3e   : > { %2856 = vmatpush3.bf16.msra.mxu1 %v3045_v42  ;;  %2833 = vmatprep.subr.bf16.mxu0 %v3050_v60  ;;  %v670_v42 = vshll.u32 %v575_v32, 16  ;;  %v676_v47 = vshll.u32 %v576_v36, 16  ;;  %v659_v48 = vor.u32 %v658_v40, %v655_v39  ;;  %v1271_v36 = vrot.slane %v1269_v28, 4  ;;  %v2508_v40 = vld [vmem:[%s3184_s10 + $0xa0] sm:$0xf] }
  0x3f   : > { %2857 = vmatprep.subr.bf16.mxu1 %v3051_v3  ;;  %v1280_v38 = vrot.slane %v1278_v30, 5  ;;  %v1283_v45 = vshrl.u32 %v2508_v40, 16 }
  0x40   : > { %v672_v49 = vrot.slane %v670_v42, 5  ;;  %v660_v57 = vrot.slane %v659_v48, 4  ;;  %v678_v0 = vrot.slane %v676_v47, 5  ;;  %v1275_v42 = vor.u32 %v1274_v37, %v1271_v36  ;;  %v3081_v37 = vld [vmem:[%s3544_s1 + $0x1f0] sm:$0xff]  }
  0x41   : > { %2834 = vmatpush3.bf16.msra.mxu0 %v3050_v60  ;;  %v686_v60 = vrot.slane %v684_v51, 5  ;;  %v1292_v48 = vshll.u32 %v2509_v41, 16  ;;  %v1353_v41 = vshrl.u32 %v2518_v29, 16 }
  0x42   : > { %2858 = vmatpush3.bf16.msra.mxu1 %v3051_v3  ;;  %2835 = vmatprep.subr.bf16.mxu0 %v3052_v12  ;;  %v673_v58 = vor.u32 %v672_v49, %v669_v46  ;;  %v665_v2 = vsel %vm3255_vm2, %v660_v57, %v664_v44  ;;  %v2511_v44 = vld [vmem:[%s3184_s10 + $0xac] sm:$0x1]  ;;  %v1286_v46 = vshll.u32 %v2508_v40, 16  ;;  %v1297_v49 = vshrl.u32 %v2510_v43, 16 }
  0x43   : > { %2859 = vmatprep.subr.bf16.mxu1 %v3053_v16  ;;  %v687_v4 = vor.u32 %v686_v60, %v683_v59  ;;  %v2422_v8 = vcombine.low %v651_v63, %v665_v2  ;;  %v1276_v51 = vrot.slane %v1275_v42, 4  ;;  %v1306_v54 = vshll.u32 %v2511_v44, 16  ;;  %v3073_v59 = vld [vmem:[%s3544_s1 + $0x148] sm:$0xff]  }
  0x44   : > { %v674_v3 = vrot.slane %v673_v58, 4  ;;  %v1288_v53 = vrot.slane %v1286_v46, 5  ;;  %v1299_v57 = vrot.slane %v1297_v49, 4  ;;  %v1302_v58 = vrot.slane %v1300_v50, 5  ;;  %v3084_v49 = vld [vmem:[%s3544_s1 + $0x1a8] sm:$0xff]  }
  0x45   : > { %2836 = vmatpush3.bf16.msra.mxu0 %v3052_v12  ;;  %v688_v9 = vrot.slane %v687_v4, 4  ;;  %v1281_v60 = vsel %vm3255_vm2, %v1276_v51, %v1280_v38  ;;  %v1294_v63 = vrot.slane %v1292_v48, 5  ;;  %v1308_v2 = vrot.slane %v1306_v54, 5 }
  0x46   : > { %2860 = vmatpush3.bf16.msra.mxu1 %v3053_v16  ;;  %2837 = vmatprep.subr.bf16.mxu0 %v3054_v21  ;;  %v679_v11 = vsel %vm3255_vm2, %v674_v3, %v678_v0  ;;  %v3066_v16 = vld [vmem:[%s3544_s1 + $0x120] sm:$0xff]   ;;  %v1348_v40 = vshll.u32 %v2517_v24, 16  ;;  %v1356_v43 = vshll.u32 %v2518_v29, 16  ;;  %v1355_v48 = vrot.slane %v1353_v41, 4  ;;  %v2628_v24 = vld [vmem:[%s3184_s10 + $0x28] sm:$0xf] }
  0x47   : > { %2861 = vmatprep.subr.bf16.mxu1 %v3055_v27  ;;  %v693_v12 = vsel %vm3255_vm2, %v688_v9, %v692_v5  ;;  %v3074_v3 = vld [vmem:[%s3544_s1 + $0x100] sm:$0xff]   ;;  %v3078_v9 = vld [vmem:[%s3544_s1 + $0x1b8] sm:$0xff]   ;;  %v3101_v41 = vld [vmem:[%s3544_s1 + $0x230] sm:$0xff]  }
  0x48   : > { %v2423_v14 = vcombine.low %v679_v11, %v693_v12  ;;  %v3075_v5 = vld [vmem:[%s3544_s1 + $0x140] sm:$0xff]   ;;  %v2513_v11 = vld [vmem:[%s3184_s10 + $0xb4] sm:$0x1]  ;;  %v2514_v12 = vld [vmem:[%s3184_s10 + $0xb8] sm:$0xf]  ;;  %v1350_v51 = vrot.slane %v1348_v40, 5 }
  0x49   : > { %2838 = vmatpush3.bf16.msra.mxu0 %v3054_v21  ;;  %v2504_v21 = vld [vmem:[%s3184_s10 + $0x90] sm:$0xf] }
  0x4a   : > { %2862 = vmatpush3.bf16.msra.mxu1 %v3055_v27  ;;  %2871 = vmatprep.subr.bf16.mxu0 %v3057_v52  ;;  %v1255_v25 = vshrl.u32 %v2504_v21, 16  ;;  %v1258_v26 = vshll.u32 %v2504_v21, 16  ;;  %v1264_v27 = vshll.u32 %v2505_v22, 16  ;;  %v1325_v21 = vshrl.u32 %v2514_v12, 16 }
  0x4b   : > { %2895 = vmatprep.subr.bf16.mxu1 %v3058_v55  ;;  %v1328_v22 = vshll.u32 %v2514_v12, 16  ;;  %v3094_v12 = vld [vmem:[%s3544_s1 + $0x180] sm:$0xff]  }
  0x4c   : > { %2840 = vmatmul.mubr.bf16.vlgmr.msra.gmra.mxu0 %v2421_v62  ;;  %v1257_v32 = vrot.slane %v1255_v25, 4  ;;  %v1260_v33 = vrot.slane %v1258_v26, 5  ;;  %v1266_v35 = vrot.slane %v1264_v27, 5 }
  0x4d   : > { %2864 = vmatmul.mubr.bf16.vlgmr.msra.gmra.mxu1 %v3059_v56  ;;  %2872 = vmatpush3.bf16.msra.mxu0 %v3057_v52  ;;  %v1285_v52 = vrot.slane %v1283_v45, 4  ;;  %v3082_v45 = vld [vmem:[%s3184_s10 + $0xf8] ss:$8 sps:$4 sm:$0xff]  }
  0x4e   : > { %2896 = vmatpush3.bf16.msra.mxu1 %v3058_v55  ;;  %2873 = vmatprep.subr.bf16.mxu0 %v3060_v1  ;;  %v1261_v39 = vor.u32 %v1260_v33, %v1257_v32  ;;  %v3072_v55 = vld [vmem:[%s3544_s1 + $0x108] sm:$0xff]   ;;  %v1327_v32 = vrot.slane %v1325_v21, 4  ;;  %v1330_v33 = vrot.slane %v1328_v22, 5  ;;  %v3097_v21 = vld [vmem:[%s3184_s10 + $0x18] ss:$8 sps:$4 sm:$0xff]  }
  0x4f   : > { %2897 = vmatprep.subr.bf16.mxu1 %v3061_v7  ;;  %2843 = vmatprep.mubr.bf16.mxu0 %v2422_v8  ;;  %v1289_v62 = vor.u32 %v1288_v53, %v1285_v52  ;;  %v2512_v8 = vld [vmem:[%s3184_s10 + $0xb0] sm:$0xf]  ;;  %v1358_v52 = vrot.slane %v1356_v43, 5  ;;  %v3099_v22 = vld [vmem:[%s3544_s1 + $0x238] sm:$0xff]  }
  0x50   : > { %2867 = vmatprep.mubr.bf16.mxu1 %v3064_v6  ;;  %v1262_v47 = vrot.slane %v1261_v39, 4  ;;  %v1331_v42 = vor.u32 %v1330_v33, %v1327_v32  ;;  %v2631_v33 = vld [vmem:[%s3184_s10 + $0x34] sm:$0x1] }
  0x51   : > { %2874 = vmatpush3.bf16.msra.mxu0 %v3060_v1  ;;  %v1303_v1 = vor.u32 %v1302_v58, %v1299_v57  ;;  %v1290_v4 = vrot.slane %v1289_v62, 4  ;;  %v1359_v58 = vor.u32 %v1358_v52, %v1355_v48 }
  0x52   : > { %2898 = vmatpush3.bf16.msra.mxu1 %v3061_v7  ;;  %2875 = vmatprep.subr.bf16.mxu0 %v3062_v10  ;;  %v1267_v56 = vsel %vm3255_vm2, %v1262_v47, %v1266_v35  ;;  %v2519_v35 = vld [vmem:[%s3184_s10 + $0xcc] sm:$0x1]  ;;  %v1332_v50 = vrot.slane %v1331_v42, 4 }
  0x53   : > { %2899 = vmatprep.subr.bf16.mxu1 %v3063_v13  ;;  %v2536_v0 = vcombine.low %v1267_v56, %v1281_v60  ;;  %v1304_v6 = vrot.slane %v1303_v1, 4  ;;  %v1295_v7 = vsel %vm3255_vm2, %v1290_v4, %v1294_v63  ;;  %v1362_v44 = vshll.u32 %v2519_v35, 16  ;;  %v3083_v56 = vld [vmem:[%s3184_s10 + $0x108] ss:$8 sps:$4 sm:$0xff]   ;;  %v3086_v1 = vld [vmem:[%s3544_s1 + $0x1a0] sm:$0xff]  }
  0x54   : > { %2844 = vmatmul.mubr.bf16.gmra.mxu0 %v2423_v14  ;;  %v3079_v14 = vld [vmem:[%s3544_s1 + $0x1f8] sm:$0xff]   ;;  %v1360_v63 = vrot.slane %v1359_v58, 4  ;;  %v3096_v4 = vld [vmem:[%s3184_s10 + $0x8] ss:$8 sps:$4 sm:$0xff]   ;;  %v1986_v35 = vshll.u32 %v2628_v24, 16 }
  0x55   : > { %2876 = vmatpush3.bf16.msra.mxu0 %v3062_v10  ;;  %2868 = vmatmul.mubr.bf16.gmra.mxu1 %v3065_v15  ;;  %v1309_v10 = vsel %vm3255_vm2, %v1304_v6, %v1308_v2  ;;  %v3098_v6 = vld [vmem:[%s3184_s10 + $0x50] ss:$8 sps:$4 sm:$0xff]   ;;  %v3104_v58 = vld [vmem:[%s3544_s1 + $0x228] sm:$0xff]  }
  0x56   : > { %2900 = vmatpush3.bf16.msra.mxu1 %v3063_v13  ;;  %2877 = vmatprep.subr.bf16.mxu0 %v3066_v16  ;;  %v2515_v13 = vld [vmem:[%s3184_s10 + $0xbc] sm:$0x1]  ;;  %v2537_v15 = vcombine.low %v1295_v7, %v1309_v10  ;;  %v3092_v10 = vld [vmem:[%s3544_s1 + $0x188] sm:$0xff]  }
  0x57   : > { %2901 = vmatprep.subr.bf16.mxu1 %v3067_v17  ;;  %2887 = vmatprep.mubr.bf16.mxu0 %v3076_v19  ;;  %v2516_v19 = vld [vmem:[%s3184_s10 + $0xc0] sm:$0xf]  ;;  %v1334_v23 = vshll.u32 %v2515_v13, 16  ;;  %v3089_v7 = vld [vmem:[%s3544_s1 + $0x1d8] sm:$0xff]  }
  0x58   : > { %2911 = vmatprep.mubr.bf16.mxu1 %v2536_v0  ;;  %v1339_v25 = vshrl.u32 %v2516_v19, 16  ;;  %v1342_v30 = vshll.u32 %v2516_v19, 16  ;;  %v3095_v13 = vld [vmem:[%s3544_s1 + $0x1c0] sm:$0xff]  }
  0x59   : > { %2878 = vmatpush3.bf16.msra.mxu0 %v3066_v16  ;;  %v1311_v16 = vshrl.u32 %v2512_v8, 16 }
  0x5a   : > { %2902 = vmatpush3.bf16.msra.mxu1 %v3067_v17  ;;  %2879 = vmatprep.subr.bf16.mxu0 %v3068_v18  ;;  %v1314_v17 = vshll.u32 %v2512_v8, 16  ;;  %v1341_v36 = vrot.slane %v1339_v25, 4  ;;  %v1344_v39 = vrot.slane %v1342_v30, 5  ;;  %v3090_v8 = vld [vmem:[%s3544_s1 + $0x190] sm:$0xff]   ;;  %v2629_v25 = vld [vmem:[%s3184_s10 + $0x2c] sm:$0x1] }
  0x5b   : > { %2903 = vmatprep.subr.bf16.mxu1 %v3069_v20  ;;  %v1313_v26 = vrot.slane %v1311_v16, 4  ;;  %v2622_v16 = vld [vmem:[%s3184_s10 + $0x10] sm:$0xf] }
  0x5c   : > { %v1316_v27 = vrot.slane %v1314_v17, 5  ;;  %v1345_v47 = vor.u32 %v1344_v39, %v1341_v36  ;;  %v2623_v17 = vld [vmem:[%s3184_s10 + $0x14] sm:$0x1]  ;;  %v2630_v30 = vld [vmem:[%s3184_s10 + $0x30] sm:$0xf] }
  0x5d   : > { %2880 = vmatpush3.bf16.msra.mxu0 %v3068_v18  ;;  %v1320_v18 = vshll.u32 %v2513_v11, 16  ;;  %v3093_v11 = vld [vmem:[%s3544_s1 + $0x1c8] sm:$0xff]   ;;  %v1950_v32 = vshll.u32 %v2623_v17, 16  ;;  %v1997_v39 = vshrl.u32 %v2630_v30, 16  ;;  %v2000_v40 = vshll.u32 %v2630_v30, 16 }
  0x5e   : > { %2904 = vmatpush3.bf16.msra.mxu1 %v3069_v20  ;;  %2881 = vmatprep.subr.bf16.mxu0 %v3070_v31  ;;  %v3077_v20 = vld [vmem:[%s3184_s10 + $0xe8] ss:$8 sps:$4 sm:$0xff]   ;;  %v1317_v38 = vor.u32 %v1316_v27, %v1313_v26  ;;  %v1346_v54 = vrot.slane %v1345_v47, 4 }
  0x5f   : > { %2905 = vmatprep.subr.bf16.mxu1 %v3071_v34  ;;  %v1322_v28 = vrot.slane %v1320_v18, 5  ;;  %v3100_v36 = vld [vmem:[%s3184_s10 + $0x60] ss:$8 sps:$4 sm:$0xff]   ;;  %v1999_v48 = vrot.slane %v1997_v39, 4 }
  0x60   : > { %v1318_v46 = vrot.slane %v1317_v38, 4  ;;  %v1351_v62 = vsel %vm3255_vm2, %v1346_v54, %v1350_v51  ;;  %v1992_v38 = vshll.u32 %v2629_v25, 16 }
  0x61   : > { %2882 = vmatpush3.bf16.msra.mxu0 %v3070_v31  ;;  %v3080_v31 = vld [vmem:[%s3544_s1 + $0x1b0] sm:$0xff]  }
  0x62   : > { %2906 = vmatpush3.bf16.msra.mxu1 %v3071_v34  ;;  %2883 = vmatprep.subr.bf16.mxu0 %v3072_v55  ;;  %v1336_v34 = vrot.slane %v1334_v23, 5  ;;  %v1323_v53 = vsel %vm3255_vm2, %v1318_v46, %v1322_v28  ;;  %v1944_v23 = vshll.u32 %v2622_v16, 16  ;;  %v3102_v46 = vld [vmem:[%s3184_s10 + $0x28] ss:$8 sps:$4 sm:$0xff]  }
  0x63   : > { %2907 = vmatprep.subr.bf16.mxu1 %v3073_v59 }
  0x64   : > { %v1337_v57 = vsel %vm3255_vm2, %v1332_v50, %v1336_v34  ;;  %v1983_v34 = vshrl.u32 %v2628_v24, 16  ;;  %v3105_v50 = vld [vmem:[%s3184_s10 + $0x70] ss:$8 sps:$4 sm:$0xff]  }
  0x65   : > { %2884 = vmatpush3.bf16.msra.mxu0 %v3072_v55  ;;  %v1364_v55 = vrot.slane %v1362_v44, 5  ;;  %v2538_v60 = vcombine.low %v1323_v53, %v1337_v57  ;;  %v1988_v44 = vrot.slane %v1986_v35, 5  ;;  %v1952_v53 = vrot.slane %v1950_v32, 5  ;;  %v2635_v32 = vld [vmem:[%s3184_s10 + $0x44] sm:$0x1] }
  0x66   : > { %2908 = vmatpush3.bf16.msra.mxu1 %v3073_v59  ;;  %2885 = vmatprep.subr.bf16.mxu0 %v3074_v3  ;;  %v3085_v59 = vld [vmem:[%s3544_s1 + $0x1e8] sm:$0xff]   ;;  %v1985_v43 = vrot.slane %v1983_v34, 4 }
  0x67   : > { %2909 = vmatprep.subr.bf16.mxu1 %v3075_v5  ;;  %v1365_v0 = vsel %vm3255_vm2, %v1360_v63, %v1364_v55  ;;  %v1994_v55 = vrot.slane %v1992_v38, 5 }
  0x68   : > { %v2539_v2 = vcombine.low %v1351_v62, %v1365_v0  ;;  %v1989_v54 = vor.u32 %v1988_v44, %v1985_v43  ;;  %v3103_v62 = vld [vmem:[%s3184_s10 + $0x38] ss:$8 sps:$4 sm:$0xff]  }
  0x69   : > { %2886 = vmatpush3.bf16.msra.mxu0 %v3074_v3  ;;  %v3087_v3 = vld [vmem:[%s3544_s1 + $0x1e0] sm:$0xff]  }
  0x6a   : > { %2910 = vmatpush3.bf16.msra.mxu1 %v3075_v5  ;;  %2919 = vmatprep.subr.bf16.mxu0 %v3078_v9  ;;  %v3088_v5 = vld [vmem:[%s3544_s1 + $0x198] sm:$0xff]  }
  0x6b   : > { %2943 = vmatprep.subr.bf16.mxu1 %v3079_v14 }
  0x6c   : > { %2888 = vmatmul.mubr.bf16.vlgmr.msra.gmra.mxu0 %v3077_v20  ;;  %v1941_v20 = vshrl.u32 %v2622_v16, 16 }
  0x6d   : > { %2912 = vmatmul.mubr.bf16.vlgmr.msra.gmra.mxu1 %v2537_v15  ;;  %2920 = vmatpush3.bf16.msra.mxu0 %v3078_v9  ;;  %v3091_v9 = vld [vmem:[%s3544_s1 + $0x1d0] sm:$0xff]   ;;  %v2621_v15 = vld [vmem:[%s3184_s10 + $0xc] sm:$0x1] }
  0x6e   : > { %2944 = vmatpush3.bf16.msra.mxu1 %v3079_v14  ;;  %2921 = vmatprep.subr.bf16.mxu0 %v3080_v31  ;;  %v2620_v14 = vld [vmem:[%s3184_s10 + $0x8] sm:$0xf]  ;;  %v1936_v28 = vshll.u32 %v2621_v15, 16  ;;  %v1943_v29 = vrot.slane %v1941_v20, 4  ;;  %v3108_v15 = vld [vmem:[%s3544_s1 + $0x218] sm:$0xff]   ;;  %v3109_v20 = vld [vmem:[%s3544_s1 + $0x210] sm:$0xff]  }
  0x6f   : > { %2945 = vmatprep.subr.bf16.mxu1 %v3081_v37  ;;  %2891 = vmatprep.mubr.bf16.mxu0 %v3082_v45  ;;  %v1927_v18 = vshrl.u32 %v2620_v14, 16  ;;  %v1930_v19 = vshll.u32 %v2620_v14, 16  ;;  %v2006_v45 = vshll.u32 %v2631_v33, 16 }
  0x70   : > { %2915 = vmatprep.mubr.bf16.mxu1 %v2538_v60  ;;  %v1938_v47 = vrot.slane %v1936_v28, 5 }
  0x71   : > { %2922 = vmatpush3.bf16.msra.mxu0 %v3080_v31  ;;  %v1929_v26 = vrot.slane %v1927_v18, 4  ;;  %v1932_v27 = vrot.slane %v1930_v19, 5  ;;  %v1946_v31 = vrot.slane %v1944_v23, 5  ;;  %v2008_v57 = vrot.slane %v2006_v45, 5 }
  0x72   : > { %2946 = vmatpush3.bf16.msra.mxu1 %v3081_v37  ;;  %2923 = vmatprep.subr.bf16.mxu0 %v3084_v49 }
  0x73   : > { %2947 = vmatprep.subr.bf16.mxu1 %v3085_v59  ;;  %v1933_v37 = vor.u32 %v1932_v27, %v1929_v26  ;;  %v1947_v42 = vor.u32 %v1946_v31, %v1943_v29  ;;  %v2627_v26 = vld [vmem:[%s3184_s10 + $0x24] sm:$0x1]  ;;  %v2633_v31 = vld [vmem:[%s3184_s10 + $0x3c] sm:$0x1] }
  0x74   : > { %2892 = vmatmul.mubr.bf16.gmra.mxu0 %v3083_v56  ;;  %v2020_v39 = vshll.u32 %v2633_v31, 16 }
  0x75   : > { %2924 = vmatpush3.bf16.msra.mxu0 %v3084_v49  ;;  %2916 = vmatmul.mubr.bf16.gmra.mxu1 %v2539_v2  ;;  %v2002_v49 = vrot.slane %v2000_v40, 5  ;;  %v1934_v51 = vrot.slane %v1933_v37, 4  ;;  %v1948_v52 = vrot.slane %v1947_v42, 4  ;;  %v3110_v37 = vld [vmem:[%s3544_s1 + $0x208] sm:$0xff]  }
  0x76   : > { %2948 = vmatpush3.bf16.msra.mxu1 %v3085_v59  ;;  %2925 = vmatprep.subr.bf16.mxu0 %v3086_v1  ;;  %v1990_v59 = vrot.slane %v1989_v54, 4 }
  0x77   : > { %2949 = vmatprep.subr.bf16.mxu1 %v3087_v3  ;;  %2935 = vmatprep.mubr.bf16.mxu0 %v3096_v4  ;;  %v2003_v56 = vor.u32 %v2002_v49, %v1999_v48  ;;  %v1939_v63 = vsel %vm3255_vm2, %v1934_v51, %v1938_v47  ;;  %v1953_v0 = vsel %vm3255_vm2, %v1948_v52, %v1952_v53  ;;  %v3107_v4 = vld [vmem:[%s3544_s1 + $0x220] sm:$0xff]   ;;  %v2022_v48 = vrot.slane %v2020_v39, 5 }
  0x78   : > { %2959 = vmatprep.mubr.bf16.mxu1 %v3098_v6  ;;  %v1995_v2 = vsel %vm3255_vm2, %v1990_v59, %v1994_v55  ;;  %v2626_v6 = vld [vmem:[%s3184_s10 + $0x20] sm:$0xf] }
  0x79   : > { %2926 = vmatpush3.bf16.msra.mxu0 %v3086_v1  ;;  %v2004_v60 = vrot.slane %v2003_v56, 4  ;;  %v3106_v1 = vld [vmem:[%s3184_s10 + $0x80] ss:$8 sps:$4 sm:$0xff]   ;;  %v1972_v14 = vshll.u32 %v2626_v6, 16 }
  0x7a   : > { %2950 = vmatpush3.bf16.msra.mxu1 %v3087_v3  ;;  %2927 = vmatprep.subr.bf16.mxu0 %v3088_v5 }
  0x7b   : > { %2951 = vmatprep.subr.bf16.mxu1 %v3089_v7  ;;  %v2009_v3 = vsel %vm3255_vm2, %v2004_v60, %v2008_v57  ;;  %v1974_v25 = vrot.slane %v1972_v14, 5 }
  0x7d   : > { %2928 = vmatpush3.bf16.msra.mxu0 %v3088_v5  ;;  %v2624_v5 = vld [vmem:[%s3184_s10 + $0x18] sm:$0xf] }
  0x7e   : > { %2952 = vmatpush3.bf16.msra.mxu1 %v3089_v7  ;;  %2929 = vmatprep.subr.bf16.mxu0 %v3090_v8  ;;  %v2652_v7 = vcombine.low %v1939_v63, %v1953_v0 }
  0x7f   : > { %2953 = vmatprep.subr.bf16.mxu1 %v3091_v9 }
  0x81   : > { %2930 = vmatpush3.bf16.msra.mxu0 %v3090_v8  ;;  %v2632_v8 = vld [vmem:[%s3184_s10 + $0x38] sm:$0xf] }
  0x82   : > { %2954 = vmatpush3.bf16.msra.mxu1 %v3091_v9  ;;  %2931 = vmatprep.subr.bf16.mxu0 %v3092_v10  ;;  %v2634_v9 = vld [vmem:[%s3184_s10 + $0x40] sm:$0xf]  ;;  %v2011_v16 = vshrl.u32 %v2632_v8, 16  ;;  %v2014_v17 = vshll.u32 %v2632_v8, 16 }
  0x83   : > { %2955 = vmatprep.subr.bf16.mxu1 %v3093_v11  ;;  %v2025_v18 = vshrl.u32 %v2634_v9, 16  ;;  %v2028_v19 = vshll.u32 %v2634_v9, 16 }
  0x84   : > { %v2013_v27 = vrot.slane %v2011_v16, 4  ;;  %v2016_v28 = vrot.slane %v2014_v17, 5 }
  0x85   : > { %2932 = vmatpush3.bf16.msra.mxu0 %v3092_v10  ;;  %v2654_v10 = vcombine.low %v1995_v2, %v2009_v3  ;;  %v2027_v29 = vrot.slane %v2025_v18, 4  ;;  %v2030_v30 = vrot.slane %v2028_v19, 5 }
  0x86   : > { %2956 = vmatpush3.bf16.msra.mxu1 %v3093_v11  ;;  %2933 = vmatprep.subr.bf16.mxu0 %v3094_v12  ;;  %v1955_v11 = vshrl.u32 %v2624_v5, 16  ;;  %v2017_v38 = vor.u32 %v2016_v28, %v2013_v27 }
  0x87   : > { %2957 = vmatprep.subr.bf16.mxu1 %v3095_v13  ;;  %v2031_v40 = vor.u32 %v2030_v30, %v2027_v29 }
  0x88   : > { %v2018_v47 = vrot.slane %v2017_v38, 4 }
  0x89   : > { %2934 = vmatpush3.bf16.msra.mxu0 %v3094_v12  ;;  %v1958_v12 = vshll.u32 %v2624_v5, 16  ;;  %v2032_v49 = vrot.slane %v2031_v40, 4 }
  0x8a   : > { %2958 = vmatpush3.bf16.msra.mxu1 %v3095_v13  ;;  %2967 = vmatprep.subr.bf16.mxu0 %v3099_v22  ;;  %v1969_v13 = vshrl.u32 %v2626_v6, 16  ;;  %v2023_v53 = vsel %vm3255_vm2, %v2018_v47, %v2022_v48 }
  0x8b   : > { %2991 = vmatprep.subr.bf16.mxu1 %v3099_v22  ;;  %v1960_v23 = vrot.slane %v1958_v12, 5 }
  0x8c   : > { %2936 = vmatmul.mubr.bf16.vlgmr.msra.gmra.mxu0 %v3097_v21  ;;  %v2625_v21 = vld [vmem:[%s3184_s10 + $0x1c] sm:$0x1]  ;;  %v1971_v24 = vrot.slane %v1969_v13, 4 }
  0x8d   : > { %2960 = vmatmul.mubr.bf16.vlgmr.msra.gmra.mxu1 %v3100_v36  ;;  %2968 = vmatpush3.bf16.msra.mxu0 %v3099_v22  ;;  %v1964_v34 = vshll.u32 %v2625_v21, 16  ;;  %v1978_v36 = vshll.u32 %v2627_v26, 16 }
  0x8e   : > { %2999 = vmatpush3.bf16.msra.mxu1 %v3099_v22  ;;  %2969 = vmatprep.subr.bf16.mxu0 %v3101_v41  ;;  %v1957_v22 = vrot.slane %v1955_v11, 4  ;;  %v1975_v35 = vor.u32 %v1974_v25, %v1971_v24 }
  0x8f   : > { %2992 = vmatprep.subr.bf16.mxu1 %v3101_v41  ;;  %2939 = vmatprep.mubr.bf16.mxu0 %v3102_v46  ;;  %v1966_v43 = vrot.slane %v1964_v34, 5  ;;  %v1980_v45 = vrot.slane %v1978_v36, 5  ;;  %v3111_v46 = vld [vmem:[%s3544_s1 + $0x200] sm:$0xff]  }
  0x90   : > { %2963 = vmatprep.mubr.bf16.mxu1 %v3105_v50  ;;  %v1961_v33 = vor.u32 %v1960_v23, %v1957_v22  ;;  %v1976_v44 = vrot.slane %v1975_v35, 4 }
  0x91   : > { %2970 = vmatpush3.bf16.msra.mxu0 %v3101_v41 }
  0x92   : > { %3000 = vmatpush3.bf16.msra.mxu1 %v3101_v41  ;;  %2971 = vmatprep.subr.bf16.mxu0 %v3104_v58  ;;  %v2034_v41 = vshll.u32 %v2635_v32, 16  ;;  %v1962_v42 = vrot.slane %v1961_v33, 4  ;;  %v1981_v52 = vsel %vm3255_vm2, %v1976_v44, %v1980_v45 }
  0x93   : > { %2993 = vmatprep.subr.bf16.mxu1 %v3104_v58 }
  0x94   : > { %2940 = vmatmul.mubr.bf16.gmra.mxu0 %v3103_v62  ;;  %v2036_v50 = vrot.slane %v2034_v41, 5  ;;  %v1967_v51 = vsel %vm3255_vm2, %v1962_v42, %v1966_v43 }
  0x95   : > { %2972 = vmatpush3.bf16.msra.mxu0 %v3104_v58  ;;  %2964 = vmatmul.mubr.bf16.gmra.mxu1 %v3106_v1  ;;  %v2653_v55 = vcombine.low %v1967_v51, %v1981_v52 }
  0x96   : > { %3001 = vmatpush3.bf16.msra.mxu1 %v3104_v58  ;;  %2973 = vmatprep.subr.bf16.mxu0 %v3107_v4  ;;  %v2037_v54 = vsel %vm3255_vm2, %v2032_v49, %v2036_v50 }
  0x97   : > { %2994 = vmatprep.subr.bf16.mxu1 %v3107_v4  ;;  %2983 = vmatprep.mubr.bf16.mxu0 %v2652_v7  ;;  %v2655_v56 = vcombine.low %v2023_v53, %v2037_v54 }
  0x98   : > { %2987 = vmatprep.mubr.bf16.mxu1 %v2654_v10 }
  0x99   : > { %2974 = vmatpush3.bf16.msra.mxu0 %v3107_v4 }
  0x9a   : > { %3002 = vmatpush3.bf16.msra.mxu1 %v3107_v4  ;;  %2975 = vmatprep.subr.bf16.mxu0 %v3108_v15 }
  0x9b   : > { %2995 = vmatprep.subr.bf16.mxu1 %v3108_v15 }
  0x9d   : > { %2976 = vmatpush3.bf16.msra.mxu0 %v3108_v15 }
  0x9e   : > { %3003 = vmatpush3.bf16.msra.mxu1 %v3108_v15  ;;  %2977 = vmatprep.subr.bf16.mxu0 %v3109_v20 }
  0x9f   : > { %2996 = vmatprep.subr.bf16.mxu1 %v3109_v20 }
  0xa1   : > { %2978 = vmatpush3.bf16.msra.mxu0 %v3109_v20 }
  0xa2   : > { %3004 = vmatpush3.bf16.msra.mxu1 %v3109_v20  ;;  %2979 = vmatprep.subr.bf16.mxu0 %v3110_v37 }
  0xa3   : > { %2997 = vmatprep.subr.bf16.mxu1 %v3110_v37 }
  0xa5   : > { %2980 = vmatpush3.bf16.msra.mxu0 %v3110_v37 }
  0xa6   : > { %3005 = vmatpush3.bf16.msra.mxu1 %v3110_v37  ;;  %2981 = vmatprep.subr.bf16.mxu0 %v3111_v46 }
  0xa7   : > { %2998 = vmatprep.subr.bf16.mxu1 %v3111_v46 }
  0xa9   : > { %2982 = vmatpush3.bf16.msra.mxu0 %v3111_v46 }
  0xaa   : > { %3006 = vmatpush3.bf16.msra.mxu1 %v3111_v46 }
  0xac   : > { %2984 = vmatmul.mubr.bf16.vlgmr.msra.gmra.mxu0 %v2653_v55 }
  0xad   : > { %2988 = vmatmul.mubr.bf16.vlgmr.msra.gmra.mxu1 %v2655_v56 }
  0xec   : > { %v2793_v57 = vpop.f32.mrf.mxu0 }
  0xed   : > { %v2817_v58 = vpop.f32.mrf.mxu1 }
  0xee   : > { %v329_v59 = vpop.f32.mrf.mxu0  ;;  %v549_v47 = vadd.f32 %v2817_v58, %v2793_v57 }
  0xef   : > { %v516_v60 = vpop.f32.mrf.mxu1 }
  0xf0   : > { %v2794_v62 = vpop.f32.mrf.mxu0  ;;  %v547_v50 = vadd.f32 %v516_v60, %v329_v59 }
  0xf1   : > { %v2818_v63 = vpop.f32.mrf.mxu1 }
  0xf2   : > { %v332_v0 = vpop.f32.mrf.mxu0  ;;  %v550_v55 = vadd.f32 %v2818_v63, %v2794_v62 }
  0xf3   : > { %v519_v1 = vpop.f32.mrf.mxu1 }
  0xf4   : > { %v2797_v2 = vpop.f32.mrf.mxu0 }
  0xf5   : > { %v2821_v3 = vpop.f32.mrf.mxu1 }
  0xf6   : > { %v345_v4 = vpop.f32.mrf.mxu0  ;;  %v553_v48 = vadd.f32 %v2821_v3, %v2797_v2 }
  0xf7   : > { %v532_v61 = vpop.f32.mrf.mxu1 }
  0xf8   : > { %v2798_v5 = vpop.f32.mrf.mxu0  ;;  %v551_v53 = vadd.f32 %v532_v61, %v345_v4 }
  0xf9   : > { %v2822_v6 = vpop.f32.mrf.mxu1 }
  0xfa   : > { %v348_v7 = vpop.f32.mrf.mxu0 }
  0xfb   : > { %v535_v8 = vpop.f32.mrf.mxu1 }
  0xfc   : > { %v552_v58 = vadd.f32 %v535_v8, %v348_v7 }
 0x10c   : > { %v2841_v9 = vpop.f32.mrf.mxu0 }
 0x10d   : > { %v2865_v10 = vpop.f32.mrf.mxu1  ;;  %v850_v51 = vadd.f32 %v2841_v9, %v549_v47 }
 0x10e   : > { %v817_v11 = vpop.f32.mrf.mxu0 }
 0x10f   : > { %v1004_v12 = vpop.f32.mrf.mxu1  ;;  %v848_v56 = vadd.f32 %v817_v11, %v547_v50 }
 0x110   : > { %v2842_v13 = vpop.f32.mrf.mxu0 }
 0x111   : > { %v2866_v14 = vpop.f32.mrf.mxu1  ;;  %v1035_v59 = vadd.f32 %v1004_v12, %v848_v56 }
 0x112   : > { %v820_v15 = vpop.f32.mrf.mxu0 }
 0x113   : > { %v3501_v16 = vpop.f32.mrf.mxu1 }
 0x114   : > { %3549 = vst [vmem:[#allocation3_spill] sm:$0xff] %v3501_v16  ;;  %v2845_v17 = vpop.f32.mrf.mxu0  ;;  %v548_v16 = vadd.f32 %v519_v1, %v332_v0 }
 0x115   : > { %v2869_v18 = vpop.f32.mrf.mxu1  ;;  %v854_v54 = vadd.f32 %v2845_v17, %v553_v48 }
 0x116   : > { %v833_v19 = vpop.f32.mrf.mxu0  ;;  %v849_v60 = vadd.f32 %v820_v15, %v548_v16 }
 0x117   : > { %v1020_v20 = vpop.f32.mrf.mxu1  ;;  %v1041_v2 = vadd.f32 %v2869_v18, %v854_v54 }
 0x118   : > { %v2846_v21 = vpop.f32.mrf.mxu0 }
 0x119   : > { %v2870_v22 = vpop.f32.mrf.mxu1 }
 0x11a   : > { %v836_v23 = vpop.f32.mrf.mxu0 }
 0x11b   : > { %v1023_v24 = vpop.f32.mrf.mxu1  ;;  %v3556_v11 = vld [vmem:[#allocation3_spill] sm:$0xff] }
 0x11c   : > { %v1036_v0 = vadd.f32 %v3556_v11, %v849_v60 }
 0x12c   : > { %v2889_v25 = vpop.f32.mrf.mxu0 }
 0x12d   : > { %v2913_v26 = vpop.f32.mrf.mxu1 }
 0x12e   : > { %v1191_v27 = vpop.f32.mrf.mxu0 }
 0x12f   : > { %v1489_v28 = vpop.f32.mrf.mxu1  ;;  %v1222_v62 = vadd.f32 %v1191_v27, %v1035_v59 }
 0x130   : > { %v2890_v29 = vpop.f32.mrf.mxu0 }
 0x131   : > { %v3503_v30 = vpop.f32.mrf.mxu1  ;;  %v1520_v15 = vadd.f32 %v1489_v28, %v1222_v62 }
 0x132   : > { %3550 = vst [vmem:[#allocation4_spill] sm:$0xff] %v3503_v30  ;;  %v1194_v31 = vpop.f32.mrf.mxu0 }
 0x133   : > { %v3505_v32 = vpop.f32.mrf.mxu1  ;;  %v1223_v16 = vadd.f32 %v1194_v31, %v1036_v0 }
 0x134   : > { %3551 = vst [vmem:[#allocation5_spill] sm:$0xff] %v3505_v32  ;;  %v2893_v33 = vpop.f32.mrf.mxu0  ;;  %v852_v32 = vadd.f32 %v833_v19, %v551_v53 }
 0x135   : > { %v2917_v34 = vpop.f32.mrf.mxu1  ;;  %v1228_v4 = vadd.f32 %v2893_v33, %v1041_v2 }
 0x136   : > { %v1207_v35 = vpop.f32.mrf.mxu0  ;;  %v1039_v47 = vadd.f32 %v1020_v20, %v852_v32 }
 0x137   : > { %v1505_v36 = vpop.f32.mrf.mxu1  ;;  %v1526_v8 = vadd.f32 %v2917_v34, %v1228_v4 }
 0x138   : > { %v2894_v37 = vpop.f32.mrf.mxu0 }
 0x139   : > { %v2918_v38 = vpop.f32.mrf.mxu1 }
 0x13a   : > { %v1210_v39 = vpop.f32.mrf.mxu0 }
 0x13b   : > { %v3507_v40 = vpop.f32.mrf.mxu1 }
 0x13c   : > { %3552 = vst [vmem:[#allocation6_spill] sm:$0xff] %v3507_v40  ;;  %v554_v40 = vadd.f32 %v2822_v6, %v2798_v5  ;;  %v1226_v6 = vadd.f32 %v1207_v35, %v1039_v47 }
 0x13e   : > { %v855_v3 = vadd.f32 %v2846_v21, %v554_v40  ;;  %v1524_v20 = vadd.f32 %v1505_v36, %v1226_v6 }
 0x140   : > { %v1042_v5 = vadd.f32 %v2870_v22, %v855_v3 }
 0x14c   : > { %v2937_v41 = vpop.f32.mrf.mxu0 }
 0x14d   : > { %v2961_v42 = vpop.f32.mrf.mxu1 }
 0x14e   : > { %v1676_v43 = vpop.f32.mrf.mxu0 }
 0x14f   : > { %v3509_v44 = vpop.f32.mrf.mxu1  ;;  %v1707_v22 = vadd.f32 %v1676_v43, %v1520_v15 }
 0x150   : > { %3553 = vst [vmem:[#allocation7_spill] sm:$0xff] %v3509_v44  ;;  %v2938_v45 = vpop.f32.mrf.mxu0  ;;  %v1037_v44 = vadd.f32 %v2865_v10, %v850_v51 }
 0x151   : > { %v3511_v46 = vpop.f32.mrf.mxu1 }
 0x152   : > { %3554 = vst [vmem:[#allocation8_spill] sm:$0xff] %v3511_v46  ;;  %v1679_v49 = vpop.f32.mrf.mxu0  ;;  %v851_v46 = vadd.f32 %v2842_v13, %v550_v55  ;;  %v1224_v9 = vadd.f32 %v2889_v25, %v1037_v44  ;;  %v1229_v13 = vadd.f32 %v2894_v37, %v1042_v5  ;;  %v3559_v37 = vld [vmem:[#allocation6_spill] sm:$0xff] }
 0x153   : > { %v3513_v52 = vpop.f32.mrf.mxu1 }
 0x154   : > { %3555 = vst [vmem:[#allocation9_spill] sm:$0xff] %v3513_v52  ;;  %v2941_v30 = vpop.f32.mrf.mxu0  ;;  %v853_v52 = vadd.f32 %v836_v23, %v552_v58  ;;  %v1038_v17 = vadd.f32 %v2866_v14, %v851_v46  ;;  %v1522_v1 = vadd.f32 %v2913_v26, %v1224_v9  ;;  %v3557_v23 = vld [vmem:[#allocation4_spill] sm:$0xff]  ;;  %v1527_v27 = vadd.f32 %v2918_v38, %v1229_v13  ;;  %v3558_v26 = vld [vmem:[#allocation5_spill] sm:$0xff] }
 0x155   : > { %v2965_v57 = vpop.f32.mrf.mxu1  ;;  %v1713_v14 = vadd.f32 %v2941_v30, %v1526_v8 }
 0x156   : > { %v1692_v61 = vpop.f32.mrf.mxu0  ;;  %v1225_v10 = vadd.f32 %v2890_v29, %v1038_v17  ;;  %v1040_v7 = vadd.f32 %v1023_v24, %v853_v52  ;;  %v1709_v18 = vadd.f32 %v2937_v41, %v1522_v1  ;;  %v1521_v29 = vadd.f32 %v3558_v26, %v1223_v16 }
 0x157   : > { %v1879_v63 = vpop.f32.mrf.mxu1  ;;  %v1711_v32 = vadd.f32 %v1692_v61, %v1524_v20  ;;  %v1900_v31 = vadd.f32 %v2965_v57, %v1713_v14  ;;  %v3560_v36 = vld [vmem:[#allocation7_spill] sm:$0xff] }
 0x158   : > { %v2942_v12 = vpop.f32.mrf.mxu0  ;;  %v1227_v21 = vadd.f32 %v1210_v39, %v1040_v7  ;;  %v1523_v25 = vadd.f32 %v3557_v23, %v1225_v10  ;;  %v1896_v24 = vadd.f32 %v2961_v42, %v1709_v18  ;;  %v1894_v38 = vadd.f32 %v3560_v36, %v1707_v22 }
 0x159   : > { %v2966_v19 = vpop.f32.mrf.mxu1  ;;  %v1714_v40 = vadd.f32 %v2942_v12, %v1527_v27  ;;  %v1708_v39 = vadd.f32 %v1679_v49, %v1521_v29  ;;  %v1898_v43 = vadd.f32 %v1879_v63, %v1711_v32  ;;  %v3561_v48 = vld [vmem:[#allocation8_spill] sm:$0xff] }
 0x15a   : > { %v1695_v33 = vpop.f32.mrf.mxu0  ;;  %v1710_v34 = vadd.f32 %v2938_v45, %v1523_v25  ;;  %v1525_v28 = vadd.f32 %v3559_v37, %v1227_v21 }
 0x15b   : > { %v1882_v35 = vpop.f32.mrf.mxu1  ;;  %v1901_v53 = vadd.f32 %v2966_v19, %v1714_v40  ;;  %v3562_v55 = vld [vmem:[#allocation9_spill] sm:$0xff] }
 0x15c   : > { %v1712_v44 = vadd.f32 %v1695_v33, %v1525_v28  ;;  %v1897_v50 = vadd.f32 %v3561_v48, %v1710_v34  ;;  %v1895_v56 = vadd.f32 %v3562_v55, %v1708_v39 }
 0x15e   : > { %v1899_v2 = vadd.f32 %v1882_v35, %v1712_v44 }
 0x16c   : > { %v2985_v30 = vpop.f32.mrf.mxu0 }
 0x16d   : > { %v2194_v41 = vadd.f32 %v2985_v30, %v1896_v24  ;;  %v2989_v42 = vpop.f32.mrf.mxu1 }
 0x16e   : > { %v2198_v45 = vadd.f32 %v2989_v42, %v1900_v31  ;;  %v2161_v46 = vpop.f32.mrf.mxu0 }
 0x16f   : > { %2218 = vst [vmem:[%s3523_s19 + $0x10] sm:$0xff] %v2194_v41  ;;  %v2192_v51 = vadd.f32 %v2161_v46, %v1894_v38  ;;  %v2177_v52 = vpop.f32.mrf.mxu1  ;;  %v2239_v62 = vmul.f32 %v2194_v41, %v2194_v41 }
 0x170   : > { %2222 = vst [vmem:[%s3523_s19 + $0x30] sm:$0xff] %v2198_v45  ;;  %v2196_v54 = vadd.f32 %v2177_v52, %v1898_v43  ;;  %v2986_v49 = vpop.f32.mrf.mxu0  ;;  %v2243_v15 = vmul.f32 %v2198_v45, %v2198_v45 }
 0x171   : > { %2216 = vst [vmem:[%s3523_s19] sm:$0xff] %v2192_v51  ;;  %v2195_v57 = vadd.f32 %v2986_v49, %v1897_v50  ;;  %v2990_v58 = vpop.f32.mrf.mxu1  ;;  %v2237_v4 = vmul.f32 %v2192_v51, %v2192_v51 }
 0x172   : > { %2220 = vst [vmem:[%s3523_s19 + $0x20] sm:$0xff] %v2196_v54  ;;  %v2199_v3 = vadd.f32 %v2990_v58, %v1901_v53  ;;  %v2164_v59 = vpop.f32.mrf.mxu0  ;;  %v2241_v1 = vmul.f32 %v2196_v54, %v2196_v54 }
 0x173   : > { %2219 = vst [vmem:[%s3523_s19 + $0x18] sm:$0xff] %v2195_v57  ;;  %v2193_v60 = vadd.f32 %v2164_v59, %v1895_v56  ;;  %v2180_v9 = vpop.f32.mrf.mxu1  ;;  %v2240_v6 = vmul.f32 %v2195_v57, %v2195_v57 }
 0x174   : > { %2223 = vst [vmem:[%s3523_s19 + $0x38] sm:$0xff] %v2199_v3  ;;  %v2197_v47 = vadd.f32 %v2180_v9, %v1899_v2  ;;  %v2244_v19 = vmul.f32 %v2199_v3, %v2199_v3 }
 0x175   : > { %2217 = vst [vmem:[%s3523_s19 + $0x8] sm:$0xff] %v2193_v60  ;;  %v2224_v61 = vadd.f32 %v2193_v60, %v2192_v51  ;;  %v2238_v17 = vmul.f32 %v2193_v60, %v2193_v60 }
 0x176   : > { %2221 = vst [vmem:[%s3523_s19 + $0x28] sm:$0xff] %v2197_v47  ;;  %v2242_v13 = vmul.f32 %v2197_v47, %v2197_v47 }
 0x177   : > { %v2225_v63 = vadd.f32 %v2224_v61, %v2194_v41  ;;  %v2245_v5 = vadd.f32 %v2238_v17, %v2237_v4 }
 0x179   : > { %v2246_v11 = vadd.f32 %v2245_v5, %v2239_v62  ;;  %v2226_v0 = vadd.f32 %v2225_v63, %v2195_v57 }
 0x17b   : > { %v2227_v10 = vadd.f32 %v2226_v0, %v2196_v54  ;;  %v2247_v7 = vadd.f32 %v2246_v11, %v2240_v6 }
 0x17d   : > { %v2228_v8 = vadd.f32 %v2227_v10, %v2197_v47  ;;  %v2248_v12 = vadd.f32 %v2247_v7, %v2241_v1 }
 0x17f   : > { %v2229_v16 = vadd.f32 %v2228_v8, %v2198_v45  ;;  %v2249_v18 = vadd.f32 %v2248_v12, %v2242_v13 }
 0x181   : > { %v2230_v20 = vadd.f32 %v2229_v16, %v2199_v3  ;;  %v2250_v21 = vadd.f32 %v2249_v18, %v2243_v15 }
 0x183   : > { %v2231_v14 = vrot.slane %v2230_v20, 4  ;;  %v2251_v23 = vadd.f32 %v2250_v21, %v2244_v19 }
 0x185   : > { %v2232_v25 = vadd.f32 %v2231_v14, %v2230_v20  ;;  %v2252_v22 = vrot.slane %v2251_v23, 4 }
 0x187   : > { %v2233_v27 = vrot.slane %v2232_v25, 2  ;;  %v2253_v32 = vadd.f32 %v2252_v22, %v2251_v23 }
 0x189   : > { %v2234_v33 = vadd.f32 %v2233_v27, %v2232_v25  ;;  %v2254_v26 = vrot.slane %v2253_v32, 2 }
 0x18b   : > { %v2235_v29 = vrot.slane %v2234_v33, 1  ;;  %v2255_v24 = vadd.f32 %v2254_v26, %v2253_v32 }
 0x18d   : > { %v2256_v34 = vrot.slane %v2255_v24, 1  ;;  %v2236_v35 = vadd.f32 %v2235_v29, %v2234_v33 }
 0x18f   : > { %v2257_v37 = vadd.f32 %v2256_v34, %v2255_v24 }
 0x191   : > { %v2259_v28 = vsel %vm2258_vm3, %v2236_v35, %v2257_v37 }
 0x192   : > { %2260 = vst [vmem:[%s181_s23] sm:$0x3] %v2259_v28 }
 0x193 PF: > { %s14_s12 = sadd.s32 1, %s3118_s12  }
 0x194   : > { %p11_p4 = scmp.ge.s32.totalorder %s14_s12, 4  }
 0x196   :  { %13 = sbr.rel (!%p11_p4) target bundleno = 1 (0x1), region = 83 }

</bundles_post_ra>
